<compile_context>
chip_gen: v6e
topology: v6e:2x2x1
jax: 0.10.0
libtpu: 0.0.40
codegen_flags: <defaults>
</compile_context>

<pallas_src>
import functools
from types import SimpleNamespace

import numpy as np
import jax
import jax.numpy as jnp
from jax import lax
from jax.experimental import pallas as pl
from jax.experimental.pallas import tpu as pltpu


# ----------------------------------------------------------------------------
# Pallas kernel: fused multi-slice fixed-point solve + phantom-grad refinement
# ----------------------------------------------------------------------------
def _deq_fused_kernel(z_ref, w_ref, inj_ref, z_out_ref, stats_ref,
                      *, slices, tau, eps, stop_mode):
    tb = z_ref.shape[0]
    w_bf = w_ref[...]                         # [H, H] bf16, VMEM-resident for all steps
    inj = inj_ref[...].astype(jnp.float32)    # [tb, H] f32

    def fn(z_f32):
        # f(z) = tanh(z @ W + inj): bf16 MXU matmul with f32 accumulation.
        acc = jnp.dot(z_f32.astype(jnp.bfloat16), w_bf,
                      preferred_element_type=jnp.float32)
        return jnp.tanh(acc + inj)

    def solve(z0, n_solver):
        # Fixed-point iteration tracking the lowest-residual iterate.
        # Squared metrics inside the loop; sqrt only once afterwards.
        big = jnp.full((tb, 1), 1e20, jnp.float32)

        def body(step, carry):
            z, z_best, abs2_low, rel2_low, best_step = carry
            z_new = fn(z)
            diff = z_new - z
            abs2 = jnp.sum(diff * diff, axis=1, keepdims=True)
            z2 = jnp.sum(z_new * z_new, axis=1, keepdims=True)
            rel2 = abs2 * pl.reciprocal(z2 + 1e-18, approx=True)
            metric2 = abs2 if stop_mode == "abs" else rel2
            low2 = abs2_low if stop_mode == "abs" else rel2_low
            improved = metric2 < low2
            z_best = jnp.where(improved, z_new, z_best)
            best_step = jnp.where(improved, (step + 1).astype(jnp.int32), best_step)
            abs2_low = jnp.minimum(abs2_low, abs2)
            rel2_low = jnp.minimum(rel2_low, rel2)
            return (z_new, z_best, abs2_low, rel2_low, best_step)

        carry0 = (z0, z0, big, big, jnp.zeros((tb, 1), jnp.int32))
        # TODO(synk): the reference solver breaks the loop once the stop-mode
        # residual < eps (data-dependent break); not ported — we always run the
        # full static threshold and return the lowest-residual iterate.
        return lax.fori_loop(0, n_solver, body, carry0, unroll=True)

    z = z_ref[...].astype(jnp.float32)
    abs2_low = jnp.zeros((tb, 1), jnp.float32)
    rel2_low = jnp.zeros((tb, 1), jnp.float32)
    best_step = jnp.zeros((tb, 1), jnp.int32)

    for s, (n_solver, n_phantom) in enumerate(slices):
        _, z_best, abs2_low, rel2_low, best_step = solve(z, n_solver)
        # Reference f_solver returns the lowest-residual iterate; phantom-grad
        # refinement (backward_factory forward) is applied to that z_star.
        z = z_best
        if n_phantom > 0:
            def pbody(_, zz):
                return tau * fn(zz) + (1.0 - tau) * zz
            z = lax.fori_loop(0, n_phantom, pbody, z, unroll=True)
        z_out_ref[s] = z.astype(z_out_ref.dtype)

    # Solver info from the LAST slice (matches the PyTorch module, which keeps
    # the last slice's info), packed lane-dense:
    #   lane 0 = abs_lowest, lane 1 = rel_lowest, lane 2 = nstep (as f32).
    lane = lax.broadcasted_iota(jnp.int32, (tb, 128), 1)
    abs_low = jnp.sqrt(abs2_low)
    rel_low = jnp.sqrt(rel2_low)
    stats = jnp.where(lane == 0, abs_low,
            jnp.where(lane == 1, rel_low,
            jnp.where(lane == 2, best_step.astype(jnp.float32), 0.0)))
    stats_ref[...] = stats


def deq_solve_slices(z_init, w_bf16, inj, *, slices, tau, eps, stop_mode, tb=None):
    """Run all DEQ slices in one kernel: for each (n_solver, n_phantom) slice,
    n_solver fixed-point steps (tracking lowest residual) + n_phantom tau steps."""
    B, H = z_init.shape
    if tb is None:
        tb = B if B <= 256 else 256       # fill the MXU M-dim as much as possible
    assert B % tb == 0, "batch tile must divide B"
    nb = B // tb
    n_slices = len(slices)

    kernel = functools.partial(
        _deq_fused_kernel,
        slices=tuple(tuple(int(v) for v in s) for s in slices),
        tau=float(tau), eps=float(eps), stop_mode=stop_mode)

    out_shape = (
        jax.ShapeDtypeStruct((n_slices, B, H), jnp.float32),  # z after each slice
        jax.ShapeDtypeStruct((B, 128), jnp.float32),          # packed solver stats
    )
    return pl.pallas_call(
        kernel,
        out_shape=out_shape,
        grid=(nb,),
        in_specs=[
            pl.BlockSpec((tb, H), lambda i: (i, 0)),   # z_init tile
            pl.BlockSpec((H, H), lambda i: (0, 0)),    # W (bf16, same block every step)
            pl.BlockSpec((tb, H), lambda i: (i, 0)),   # injection tile
        ],
        out_specs=[
            pl.BlockSpec((n_slices, tb, H), lambda i: (0, i, 0)),
            pl.BlockSpec((tb, 128), lambda i: (i, 0)),
        ],
        compiler_params=pltpu.CompilerParams(
            dimension_semantics=("parallel",),
            vmem_limit_bytes=64 << 20),
    )(z_init, w_bf16, inj)


# ----------------------------------------------------------------------------
# Synthetic deq_func (the module takes an arbitrary callable; we use the
# canonical f(z) = tanh(z W + x U + b) with the injection built in plain JAX)
# ----------------------------------------------------------------------------
class SyntheticDEQFunc:
    def __init__(self, w, u, b, state_shape):
        self.w = w                              # [H, H] f32
        self.w_bf16 = w.astype(jnp.bfloat16)    # MXU-native operand for the kernel
        self.u = u                              # [D, H]
        self.b = b                              # [H]
        self.state_shape = state_shape          # (C, Hs, Ws) for vec2list

    def injection(self, x):                     # x: [B, D]  (glue, plain JAX)
        return x @ self.u + self.b[None, :]

    def list2vec(self, z_nchw):                 # [B, C, Hs, Ws] -> [B, H]
        return z_nchw.reshape(z_nchw.shape[0], -1)

    def vec2list(self, z_vec):                  # [B, H] -> [[B, C, Hs, Ws]]
        C, Hs, Ws = self.state_shape
        return [z_vec.reshape(z_vec.shape[0], C, Hs, Ws)]


# ----------------------------------------------------------------------------
# DEQSliced forward-pass port (eval + training branches)
# ----------------------------------------------------------------------------
class DEQSlicedPallas:
    def __init__(self, args):
        self.args = args
        self.f_thres = args.f_thres
        self.f_eps = args.f_eps
        self.f_stop_mode = args.f_stop_mode
        self.eval_f_thres = (args.eval_f_thres if args.eval_f_thres > 0
                             else int(self.f_thres * args.eval_factor))
        # slice indexing (same arithmetic as the PyTorch __init__)
        if args.n_losses > 1:
            self.indexing = [int(args.f_thres // args.n_losses)
                             for _ in range(args.n_losses)]
        else:
            self.indexing = np.diff([0, *args.indexing, args.f_thres]).tolist()
        # make_pair(indexing, phantom_grad): one phantom-grad count per slice
        pg = args.phantom_grad
        self.phantom_per_slice = (list(pg) if isinstance(pg, (list, tuple))
                                  else [pg] * len(self.indexing))
        self.tau = args.tau
        self.training = False
        # TODO(synk): args.ift / safe_ift (implicit-function-theorem backward
        # hooks) are autograd-only; no forward-pass Pallas equivalent.

    def _run(self, deq_func, x, z_vec, slices):
        inj = deq_func.injection(x)             # plain-JAX glue, [B, H] f32
        z_stack, stats = deq_solve_slices(
            z_vec, deq_func.w_bf16, inj,
            slices=slices, tau=self.tau, eps=self.f_eps,
            stop_mode=self.f_stop_mode)
        info = {"abs_lowest": stats[:, 0],
                "rel_lowest": stats[:, 1],
                "nstep": stats[:, 2].astype(jnp.int32)}
        return z_stack, info

    def forward(self, deq_func, x, z_init_nchw, sradius_mode=False):
        z_vec = deq_func.list2vec(z_init_nchw)
        if self.training:
            slices = tuple(zip(self.indexing, self.phantom_per_slice))
            z_stack, info = self._run(deq_func, x, z_vec, slices)
            z_out = [deq_func.vec2list(z_stack[s]) for s in range(len(slices))]
        else:
            z_stack, info = self._run(deq_func, x, z_vec,
                                      ((self.eval_f_thres, 0),))
            # TODO(synk): sradius power-method (75 autograd VJP iters) not
            # ported; matches the default sradius_mode=False path (zeros).
            info["sradius"] = jnp.zeros((1,), jnp.float32)
            z_out = [deq_func.vec2list(z_stack[0])]
        return z_out, info


# ----------------------------------------------------------------------------
if __name__ == "__main__":
    key = jax.random.PRNGKey(0)
    kw, ku, kx = jax.random.split(key, 3)

    # Small shapes: B=32, state = [C=2, Hs=8, Ws=8] -> H = 128 ; input feat D = 64
    B, C, Hs, Ws, D = 32, 2, 8, 8, 64
    H = C * Hs * Ws

    # Deterministic synthetic parameters (contractive W so the fixed point exists)
    w = jax.random.normal(kw, (H, H), jnp.float32) * (0.4 / np.sqrt(H))
    u = jax.random.normal(ku, (D, H), jnp.float32) * (1.0 / np.sqrt(D))
    b = jnp.zeros((H,), jnp.float32)
    deq_func = SyntheticDEQFunc(w, u, b, (C, Hs, Ws))

    x = jax.random.normal(kx, (B, D), jnp.float32)
    z_init = jnp.zeros((B, C, Hs, Ws), jnp.float32)   # NCHW, like the PyTorch module

    args = SimpleNamespace(
        f_solver="fixed_point", b_solver="fixed_point",
        f_thres=12, b_thres=12, f_eps=1e-3, b_eps=1e-3,
        f_stop_mode="abs", b_stop_mode="abs",
        eval_f_thres=0, eval_factor=1.5,
        n_losses=2, indexing=[], phantom_grad=1, tau=1.0,
        ift=False, safe_ift=False, sup_all=False,
    )
    deq = DEQSlicedPallas(args)

    # --- eval branch (single fused solve, eval_f_thres steps, no phantom) ---
    deq.training = False
    z_out_eval, info_eval = deq.forward(deq_func, x, z_init)
    jax.block_until_ready(z_out_eval[0][0])
    assert z_out_eval[0][0].shape == (B, C, Hs, Ws)
    assert jnp.all(jnp.isfinite(z_out_eval[0][0]))
    assert jnp.all(jnp.isfinite(info_eval["abs_lowest"]))
    assert jnp.all(jnp.isfinite(info_eval["rel_lowest"]))

    # --- training branch (all slices + phantom-grad fused into one kernel) ---
    deq.training = True
    z_out_train, info_train = deq.forward(deq_func, x, z_init)
    jax.block_until_ready(z_out_train[-1][0])
    assert len(z_out_train) == len(deq.indexing)
    assert z_out_train[-1][0].shape == (B, C, Hs, Ws)
    assert jnp.all(jnp.isfinite(z_out_train[-1][0]))
    assert jnp.all(info_train["nstep"] >= 1)

    print("KERNEL_OK")
</pallas_src>

<mosaic_0001>
module attributes {stable_mosaic.version = 11 : i64} {
  func.func @_deq_fused_kernel(%arg0: i32, %arg1: memref<32x128xf32, #tpu.memory_space<vmem>>, %arg2: memref<128x128xbf16, #tpu.memory_space<vmem>>, %arg3: memref<32x128xf32, #tpu.memory_space<vmem>>, %arg4: memref<1x32x128xf32, #tpu.memory_space<vmem>>, %arg5: memref<32x128xf32, #tpu.memory_space<vmem>>) attributes {dimension_semantics = [#tpu.dimension_semantics<parallel>], iteration_bounds = array<i64: 1>, scalar_prefetch = 0 : i64, scratch_operands = 0 : i64, tpu.core_type = #tpu.core_type<tc>, window_params = [{transform_indices = @transform_0, window_bounds = array<i64: 32, 128>}, {pipeline_mode = #tpu.pipeline_mode<synchronous>, transform_indices = @transform_1, window_bounds = array<i64: 128, 128>}, {transform_indices = @transform_2, window_bounds = array<i64: 32, 128>}, {transform_indices = @transform_3, window_bounds = array<i64: 1, 32, 128>}, {transform_indices = @transform_4, window_bounds = array<i64: 32, 128>}]} {
    %c0 = arith.constant 0 : index
    %c0_0 = arith.constant 0 : index
    %0 = vector.load %arg2[%c0, %c0_0] : memref<128x128xbf16, #tpu.memory_space<vmem>>, vector<128x128xbf16>
    %c0_1 = arith.constant 0 : index
    %c0_2 = arith.constant 0 : index
    %1 = vector.load %arg3[%c0_1, %c0_2] : memref<32x128xf32, #tpu.memory_space<vmem>>, vector<32x128xf32>
    %c0_3 = arith.constant 0 : index
    %c0_4 = arith.constant 0 : index
    %2 = vector.load %arg1[%c0_3, %c0_4] : memref<32x128xf32, #tpu.memory_space<vmem>>, vector<32x128xf32>
    %cst = arith.constant 1.000000e+20 : f32
    %3 = vector.broadcast %cst : f32 to vector<32x1xf32>
    %c0_i32 = arith.constant 0 : i32
    %4 = vector.broadcast %c0_i32 : i32 to vector<32x1xi32>
    %c0_i32_5 = arith.constant 0 : i32
    %5 = arith.truncf %2 : vector<32x128xf32> to vector<32x128xbf16>
    %cst_6 = arith.constant dense<0.000000e+00> : vector<32x128xf32>
    %6 = tpu.matmul %5, %0, %cst_6 {dimension_numbers = #tpu.dot_dimension_numbers<[1], [0], [0], [1], [0, 0, 1, 1], [], []>} : vector<32x128xbf16>, vector<128x128xbf16>, vector<32x128xf32> -> vector<32x128xf32>
    %7 = arith.addf %6, %1 : vector<32x128xf32>
    %8 = math.tanh %7 : vector<32x128xf32>
    %9 = arith.subf %8, %2 : vector<32x128xf32>
    %10 = arith.mulf %9, %9 : vector<32x128xf32>
    %cst_7 = arith.constant dense<0.000000e+00> : vector<32xf32>
    %11 = vector.multi_reduction <add>, %10, %cst_7 [1] : vector<32x128xf32> to vector<32xf32>
    %12 = vector.shape_cast %11 : vector<32xf32> to vector<32x1xf32>
    %13 = arith.mulf %8, %8 : vector<32x128xf32>
    %cst_8 = arith.constant dense<0.000000e+00> : vector<32xf32>
    %14 = vector.multi_reduction <add>, %13, %cst_8 [1] : vector<32x128xf32> to vector<32xf32>
    %15 = vector.shape_cast %14 : vector<32xf32> to vector<32x1xf32>
    %cst_9 = arith.constant 1.000000e-18 : f32
    %16 = vector.broadcast %cst_9 : f32 to vector<32x1xf32>
    %17 = arith.addf %15, %16 : vector<32x1xf32>
    %18 = tpu.reciprocal %17 {approx = true} : vector<32x1xf32> -> vector<32x1xf32>
    %19 = arith.mulf %12, %18 : vector<32x1xf32>
    %20 = arith.cmpf olt, %12, %3 : vector<32x1xf32>
    %21 = vector.shape_cast %20 : vector<32x1xi1> to vector<32x1xi1>
    %22 = vector.broadcast %21 : vector<32x1xi1> to vector<32x128xi1>
    %23 = arith.select %22, %8, %2 : vector<32x128xi1>, vector<32x128xf32>
    %c1_i32 = arith.constant 1 : i32
    %24 = arith.addi %c0_i32_5, %c1_i32 : i32
    %25 = vector.broadcast %24 : i32 to vector<32x1xi32>
    %26 = arith.select %20, %25, %4 : vector<32x1xi1>, vector<32x1xi32>
    %27 = arith.minimumf %3, %12 : vector<32x1xf32>
    %28 = arith.minimumf %3, %19 : vector<32x1xf32>
    %c1_i32_10 = arith.constant 1 : i32
    %29 = arith.truncf %8 : vector<32x128xf32> to vector<32x128xbf16>
    %cst_11 = arith.constant dense<0.000000e+00> : vector<32x128xf32>
    %30 = tpu.matmul %29, %0, %cst_11 {dimension_numbers = #tpu.dot_dimension_numbers<[1], [0], [0], [1], [0, 0, 1, 1], [], []>} : vector<32x128xbf16>, vector<128x128xbf16>, vector<32x128xf32> -> vector<32x128xf32>
    %31 = arith.addf %30, %1 : vector<32x128xf32>
    %32 = math.tanh %31 : vector<32x128xf32>
    %33 = arith.subf %32, %8 : vector<32x128xf32>
    %34 = arith.mulf %33, %33 : vector<32x128xf32>
    %cst_12 = arith.constant dense<0.000000e+00> : vector<32xf32>
    %35 = vector.multi_reduction <add>, %34, %cst_12 [1] : vector<32x128xf32> to vector<32xf32>
    %36 = vector.shape_cast %35 : vector<32xf32> to vector<32x1xf32>
    %37 = arith.mulf %32, %32 : vector<32x128xf32>
    %cst_13 = arith.constant dense<0.000000e+00> : vector<32xf32>
    %38 = vector.multi_reduction <add>, %37, %cst_13 [1] : vector<32x128xf32> to vector<32xf32>
    %39 = vector.shape_cast %38 : vector<32xf32> to vector<32x1xf32>
    %cst_14 = arith.constant 1.000000e-18 : f32
    %40 = vector.broadcast %cst_14 : f32 to vector<32x1xf32>
    %41 = arith.addf %39, %40 : vector<32x1xf32>
    %42 = tpu.reciprocal %41 {approx = true} : vector<32x1xf32> -> vector<32x1xf32>
    %43 = arith.mulf %36, %42 : vector<32x1xf32>
    %44 = arith.cmpf olt, %36, %27 : vector<32x1xf32>
    %45 = vector.shape_cast %44 : vector<32x1xi1> to vector<32x1xi1>
    %46 = vector.broadcast %45 : vector<32x1xi1> to vector<32x128xi1>
    %47 = arith.select %46, %32, %23 : vector<32x128xi1>, vector<32x128xf32>
    %c1_i32_15 = arith.constant 1 : i32
    %48 = arith.addi %c1_i32_10, %c1_i32_15 : i32
    %49 = vector.broadcast %48 : i32 to vector<32x1xi32>
    %50 = arith.select %44, %49, %26 : vector<32x1xi1>, vector<32x1xi32>
    %51 = arith.minimumf %27, %36 : vector<32x1xf32>
    %52 = arith.minimumf %28, %43 : vector<32x1xf32>
    %c2_i32 = arith.constant 2 : i32
    %53 = arith.truncf %32 : vector<32x128xf32> to vector<32x128xbf16>
    %cst_16 = arith.constant dense<0.000000e+00> : vector<32x128xf32>
    %54 = tpu.matmul %53, %0, %cst_16 {dimension_numbers = #tpu.dot_dimension_numbers<[1], [0], [0], [1], [0, 0, 1, 1], [], []>} : vector<32x128xbf16>, vector<128x128xbf16>, vector<32x128xf32> -> vector<32x128xf32>
    %55 = arith.addf %54, %1 : vector<32x128xf32>
    %56 = math.tanh %55 : vector<32x128xf32>
    %57 = arith.subf %56, %32 : vector<32x128xf32>
    %58 = arith.mulf %57, %57 : vector<32x128xf32>
    %cst_17 = arith.constant dense<0.000000e+00> : vector<32xf32>
    %59 = vector.multi_reduction <add>, %58, %cst_17 [1] : vector<32x128xf32> to vector<32xf32>
    %60 = vector.shape_cast %59 : vector<32xf32> to vector<32x1xf32>
    %61 = arith.mulf %56, %56 : vector<32x128xf32>
    %cst_18 = arith.constant dense<0.000000e+00> : vector<32xf32>
    %62 = vector.multi_reduction <add>, %61, %cst_18 [1] : vector<32x128xf32> to vector<32xf32>
    %63 = vector.shape_cast %62 : vector<32xf32> to vector<32x1xf32>
    %cst_19 = arith.constant 1.000000e-18 : f32
    %64 = vector.broadcast %cst_19 : f32 to vector<32x1xf32>
    %65 = arith.addf %63, %64 : vector<32x1xf32>
    %66 = tpu.reciprocal %65 {approx = true} : vector<32x1xf32> -> vector<32x1xf32>
    %67 = arith.mulf %60, %66 : vector<32x1xf32>
    %68 = arith.cmpf olt, %60, %51 : vector<32x1xf32>
    %69 = vector.shape_cast %68 : vector<32x1xi1> to vector<32x1xi1>
    %70 = vector.broadcast %69 : vector<32x1xi1> to vector<32x128xi1>
    %71 = arith.select %70, %56, %47 : vector<32x128xi1>, vector<32x128xf32>
    %c1_i32_20 = arith.constant 1 : i32
    %72 = arith.addi %c2_i32, %c1_i32_20 : i32
    %73 = vector.broadcast %72 : i32 to vector<32x1xi32>
    %74 = arith.select %68, %73, %50 : vector<32x1xi1>, vector<32x1xi32>
    %75 = arith.minimumf %51, %60 : vector<32x1xf32>
    %76 = arith.minimumf %52, %67 : vector<32x1xf32>
    %c3_i32 = arith.constant 3 : i32
    %77 = arith.truncf %56 : vector<32x128xf32> to vector<32x128xbf16>
    %cst_21 = arith.constant dense<0.000000e+00> : vector<32x128xf32>
    %78 = tpu.matmul %77, %0, %cst_21 {dimension_numbers = #tpu.dot_dimension_numbers<[1], [0], [0], [1], [0, 0, 1, 1], [], []>} : vector<32x128xbf16>, vector<128x128xbf16>, vector<32x128xf32> -> vector<32x128xf32>
    %79 = arith.addf %78, %1 : vector<32x128xf32>
    %80 = math.tanh %79 : vector<32x128xf32>
    %81 = arith.subf %80, %56 : vector<32x128xf32>
    %82 = arith.mulf %81, %81 : vector<32x128xf32>
    %cst_22 = arith.constant dense<0.000000e+00> : vector<32xf32>
    %83 = vector.multi_reduction <add>, %82, %cst_22 [1] : vector<32x128xf32> to vector<32xf32>
    %84 = vector.shape_cast %83 : vector<32xf32> to vector<32x1xf32>
    %85 = arith.mulf %80, %80 : vector<32x128xf32>
    %cst_23 = arith.constant dense<0.000000e+00> : vector<32xf32>
    %86 = vector.multi_reduction <add>, %85, %cst_23 [1] : vector<32x128xf32> to vector<32xf32>
    %87 = vector.shape_cast %86 : vector<32xf32> to vector<32x1xf32>
    %cst_24 = arith.constant 1.000000e-18 : f32
    %88 = vector.broadcast %cst_24 : f32 to vector<32x1xf32>
    %89 = arith.addf %87, %88 : vector<32x1xf32>
    %90 = tpu.reciprocal %89 {approx = true} : vector<32x1xf32> -> vector<32x1xf32>
    %91 = arith.mulf %84, %90 : vector<32x1xf32>
    %92 = arith.cmpf olt, %84, %75 : vector<32x1xf32>
    %93 = vector.shape_cast %92 : vector<32x1xi1> to vector<32x1xi1>
    %94 = vector.broadcast %93 : vector<32x1xi1> to vector<32x128xi1>
    %95 = arith.select %94, %80, %71 : vector<32x128xi1>, vector<32x128xf32>
    %c1_i32_25 = arith.constant 1 : i32
    %96 = arith.addi %c3_i32, %c1_i32_25 : i32
    %97 = vector.broadcast %96 : i32 to vector<32x1xi32>
    %98 = arith.select %92, %97, %74 : vector<32x1xi1>, vector<32x1xi32>
    %99 = arith.minimumf %75, %84 : vector<32x1xf32>
    %100 = arith.minimumf %76, %91 : vector<32x1xf32>
    %c4_i32 = arith.constant 4 : i32
    %101 = arith.truncf %80 : vector<32x128xf32> to vector<32x128xbf16>
    %cst_26 = arith.constant dense<0.000000e+00> : vector<32x128xf32>
    %102 = tpu.matmul %101, %0, %cst_26 {dimension_numbers = #tpu.dot_dimension_numbers<[1], [0], [0], [1], [0, 0, 1, 1], [], []>} : vector<32x128xbf16>, vector<128x128xbf16>, vector<32x128xf32> -> vector<32x128xf32>
    %103 = arith.addf %102, %1 : vector<32x128xf32>
    %104 = math.tanh %103 : vector<32x128xf32>
    %105 = arith.subf %104, %80 : vector<32x128xf32>
    %106 = arith.mulf %105, %105 : vector<32x128xf32>
    %cst_27 = arith.constant dense<0.000000e+00> : vector<32xf32>
    %107 = vector.multi_reduction <add>, %106, %cst_27 [1] : vector<32x128xf32> to vector<32xf32>
    %108 = vector.shape_cast %107 : vector<32xf32> to vector<32x1xf32>
    %109 = arith.mulf %104, %104 : vector<32x128xf32>
    %cst_28 = arith.constant dense<0.000000e+00> : vector<32xf32>
    %110 = vector.multi_reduction <add>, %109, %cst_28 [1] : vector<32x128xf32> to vector<32xf32>
    %111 = vector.shape_cast %110 : vector<32xf32> to vector<32x1xf32>
    %cst_29 = arith.constant 1.000000e-18 : f32
    %112 = vector.broadcast %cst_29 : f32 to vector<32x1xf32>
    %113 = arith.addf %111, %112 : vector<32x1xf32>
    %114 = tpu.reciprocal %113 {approx = true} : vector<32x1xf32> -> vector<32x1xf32>
    %115 = arith.mulf %108, %114 : vector<32x1xf32>
    %116 = arith.cmpf olt, %108, %99 : vector<32x1xf32>
    %117 = vector.shape_cast %116 : vector<32x1xi1> to vector<32x1xi1>
    %118 = vector.broadcast %117 : vector<32x1xi1> to vector<32x128xi1>
    %119 = arith.select %118, %104, %95 : vector<32x128xi1>, vector<32x128xf32>
    %c1_i32_30 = arith.constant 1 : i32
    %120 = arith.addi %c4_i32, %c1_i32_30 : i32
    %121 = vector.broadcast %120 : i32 to vector<32x1xi32>
    %122 = arith.select %116, %121, %98 : vector<32x1xi1>, vector<32x1xi32>
    %123 = arith.minimumf %99, %108 : vector<32x1xf32>
    %124 = arith.minimumf %100, %115 : vector<32x1xf32>
    %c5_i32 = arith.constant 5 : i32
    %125 = arith.truncf %104 : vector<32x128xf32> to vector<32x128xbf16>
    %cst_31 = arith.constant dense<0.000000e+00> : vector<32x128xf32>
    %126 = tpu.matmul %125, %0, %cst_31 {dimension_numbers = #tpu.dot_dimension_numbers<[1], [0], [0], [1], [0, 0, 1, 1], [], []>} : vector<32x128xbf16>, vector<128x128xbf16>, vector<32x128xf32> -> vector<32x128xf32>
    %127 = arith.addf %126, %1 : vector<32x128xf32>
    %128 = math.tanh %127 : vector<32x128xf32>
    %129 = arith.subf %128, %104 : vector<32x128xf32>
    %130 = arith.mulf %129, %129 : vector<32x128xf32>
    %cst_32 = arith.constant dense<0.000000e+00> : vector<32xf32>
    %131 = vector.multi_reduction <add>, %130, %cst_32 [1] : vector<32x128xf32> to vector<32xf32>
    %132 = vector.shape_cast %131 : vector<32xf32> to vector<32x1xf32>
    %133 = arith.mulf %128, %128 : vector<32x128xf32>
    %cst_33 = arith.constant dense<0.000000e+00> : vector<32xf32>
    %134 = vector.multi_reduction <add>, %133, %cst_33 [1] : vector<32x128xf32> to vector<32xf32>
    %135 = vector.shape_cast %134 : vector<32xf32> to vector<32x1xf32>
    %cst_34 = arith.constant 1.000000e-18 : f32
    %136 = vector.broadcast %cst_34 : f32 to vector<32x1xf32>
    %137 = arith.addf %135, %136 : vector<32x1xf32>
    %138 = tpu.reciprocal %137 {approx = true} : vector<32x1xf32> -> vector<32x1xf32>
    %139 = arith.mulf %132, %138 : vector<32x1xf32>
    %140 = arith.cmpf olt, %132, %123 : vector<32x1xf32>
    %141 = vector.shape_cast %140 : vector<32x1xi1> to vector<32x1xi1>
    %142 = vector.broadcast %141 : vector<32x1xi1> to vector<32x128xi1>
    %143 = arith.select %142, %128, %119 : vector<32x128xi1>, vector<32x128xf32>
    %c1_i32_35 = arith.constant 1 : i32
    %144 = arith.addi %c5_i32, %c1_i32_35 : i32
    %145 = vector.broadcast %144 : i32 to vector<32x1xi32>
    %146 = arith.select %140, %145, %122 : vector<32x1xi1>, vector<32x1xi32>
    %147 = arith.minimumf %123, %132 : vector<32x1xf32>
    %148 = arith.minimumf %124, %139 : vector<32x1xf32>
    %c6_i32 = arith.constant 6 : i32
    %149 = arith.truncf %128 : vector<32x128xf32> to vector<32x128xbf16>
    %cst_36 = arith.constant dense<0.000000e+00> : vector<32x128xf32>
    %150 = tpu.matmul %149, %0, %cst_36 {dimension_numbers = #tpu.dot_dimension_numbers<[1], [0], [0], [1], [0, 0, 1, 1], [], []>} : vector<32x128xbf16>, vector<128x128xbf16>, vector<32x128xf32> -> vector<32x128xf32>
    %151 = arith.addf %150, %1 : vector<32x128xf32>
    %152 = math.tanh %151 : vector<32x128xf32>
    %153 = arith.subf %152, %128 : vector<32x128xf32>
    %154 = arith.mulf %153, %153 : vector<32x128xf32>
    %cst_37 = arith.constant dense<0.000000e+00> : vector<32xf32>
    %155 = vector.multi_reduction <add>, %154, %cst_37 [1] : vector<32x128xf32> to vector<32xf32>
    %156 = vector.shape_cast %155 : vector<32xf32> to vector<32x1xf32>
    %157 = arith.mulf %152, %152 : vector<32x128xf32>
    %cst_38 = arith.constant dense<0.000000e+00> : vector<32xf32>
    %158 = vector.multi_reduction <add>, %157, %cst_38 [1] : vector<32x128xf32> to vector<32xf32>
    %159 = vector.shape_cast %158 : vector<32xf32> to vector<32x1xf32>
    %cst_39 = arith.constant 1.000000e-18 : f32
    %160 = vector.broadcast %cst_39 : f32 to vector<32x1xf32>
    %161 = arith.addf %159, %160 : vector<32x1xf32>
    %162 = tpu.reciprocal %161 {approx = true} : vector<32x1xf32> -> vector<32x1xf32>
    %163 = arith.mulf %156, %162 : vector<32x1xf32>
    %164 = arith.cmpf olt, %156, %147 : vector<32x1xf32>
    %165 = vector.shape_cast %164 : vector<32x1xi1> to vector<32x1xi1>
    %166 = vector.broadcast %165 : vector<32x1xi1> to vector<32x128xi1>
    %167 = arith.select %166, %152, %143 : vector<32x128xi1>, vector<32x128xf32>
    %c1_i32_40 = arith.constant 1 : i32
    %168 = arith.addi %c6_i32, %c1_i32_40 : i32
    %169 = vector.broadcast %168 : i32 to vector<32x1xi32>
    %170 = arith.select %164, %169, %146 : vector<32x1xi1>, vector<32x1xi32>
    %171 = arith.minimumf %147, %156 : vector<32x1xf32>
    %172 = arith.minimumf %148, %163 : vector<32x1xf32>
    %c7_i32 = arith.constant 7 : i32
    %173 = arith.truncf %152 : vector<32x128xf32> to vector<32x128xbf16>
    %cst_41 = arith.constant dense<0.000000e+00> : vector<32x128xf32>
    %174 = tpu.matmul %173, %0, %cst_41 {dimension_numbers = #tpu.dot_dimension_numbers<[1], [0], [0], [1], [0, 0, 1, 1], [], []>} : vector<32x128xbf16>, vector<128x128xbf16>, vector<32x128xf32> -> vector<32x128xf32>
    %175 = arith.addf %174, %1 : vector<32x128xf32>
    %176 = math.tanh %175 : vector<32x128xf32>
    %177 = arith.subf %176, %152 : vector<32x128xf32>
    %178 = arith.mulf %177, %177 : vector<32x128xf32>
    %cst_42 = arith.constant dense<0.000000e+00> : vector<32xf32>
    %179 = vector.multi_reduction <add>, %178, %cst_42 [1] : vector<32x128xf32> to vector<32xf32>
    %180 = vector.shape_cast %179 : vector<32xf32> to vector<32x1xf32>
    %181 = arith.mulf %176, %176 : vector<32x128xf32>
    %cst_43 = arith.constant dense<0.000000e+00> : vector<32xf32>
    %182 = vector.multi_reduction <add>, %181, %cst_43 [1] : vector<32x128xf32> to vector<32xf32>
    %183 = vector.shape_cast %182 : vector<32xf32> to vector<32x1xf32>
    %cst_44 = arith.constant 1.000000e-18 : f32
    %184 = vector.broadcast %cst_44 : f32 to vector<32x1xf32>
    %185 = arith.addf %183, %184 : vector<32x1xf32>
    %186 = tpu.reciprocal %185 {approx = true} : vector<32x1xf32> -> vector<32x1xf32>
    %187 = arith.mulf %180, %186 : vector<32x1xf32>
    %188 = arith.cmpf olt, %180, %171 : vector<32x1xf32>
    %189 = vector.shape_cast %188 : vector<32x1xi1> to vector<32x1xi1>
    %190 = vector.broadcast %189 : vector<32x1xi1> to vector<32x128xi1>
    %191 = arith.select %190, %176, %167 : vector<32x128xi1>, vector<32x128xf32>
    %c1_i32_45 = arith.constant 1 : i32
    %192 = arith.addi %c7_i32, %c1_i32_45 : i32
    %193 = vector.broadcast %192 : i32 to vector<32x1xi32>
    %194 = arith.select %188, %193, %170 : vector<32x1xi1>, vector<32x1xi32>
    %195 = arith.minimumf %171, %180 : vector<32x1xf32>
    %196 = arith.minimumf %172, %187 : vector<32x1xf32>
    %c8_i32 = arith.constant 8 : i32
    %197 = arith.truncf %176 : vector<32x128xf32> to vector<32x128xbf16>
    %cst_46 = arith.constant dense<0.000000e+00> : vector<32x128xf32>
    %198 = tpu.matmul %197, %0, %cst_46 {dimension_numbers = #tpu.dot_dimension_numbers<[1], [0], [0], [1], [0, 0, 1, 1], [], []>} : vector<32x128xbf16>, vector<128x128xbf16>, vector<32x128xf32> -> vector<32x128xf32>
    %199 = arith.addf %198, %1 : vector<32x128xf32>
    %200 = math.tanh %199 : vector<32x128xf32>
    %201 = arith.subf %200, %176 : vector<32x128xf32>
    %202 = arith.mulf %201, %201 : vector<32x128xf32>
    %cst_47 = arith.constant dense<0.000000e+00> : vector<32xf32>
    %203 = vector.multi_reduction <add>, %202, %cst_47 [1] : vector<32x128xf32> to vector<32xf32>
    %204 = vector.shape_cast %203 : vector<32xf32> to vector<32x1xf32>
    %205 = arith.mulf %200, %200 : vector<32x128xf32>
    %cst_48 = arith.constant dense<0.000000e+00> : vector<32xf32>
    %206 = vector.multi_reduction <add>, %205, %cst_48 [1] : vector<32x128xf32> to vector<32xf32>
    %207 = vector.shape_cast %206 : vector<32xf32> to vector<32x1xf32>
    %cst_49 = arith.constant 1.000000e-18 : f32
    %208 = vector.broadcast %cst_49 : f32 to vector<32x1xf32>
    %209 = arith.addf %207, %208 : vector<32x1xf32>
    %210 = tpu.reciprocal %209 {approx = true} : vector<32x1xf32> -> vector<32x1xf32>
    %211 = arith.mulf %204, %210 : vector<32x1xf32>
    %212 = arith.cmpf olt, %204, %195 : vector<32x1xf32>
    %213 = vector.shape_cast %212 : vector<32x1xi1> to vector<32x1xi1>
    %214 = vector.broadcast %213 : vector<32x1xi1> to vector<32x128xi1>
    %215 = arith.select %214, %200, %191 : vector<32x128xi1>, vector<32x128xf32>
    %c1_i32_50 = arith.constant 1 : i32
    %216 = arith.addi %c8_i32, %c1_i32_50 : i32
    %217 = vector.broadcast %216 : i32 to vector<32x1xi32>
    %218 = arith.select %212, %217, %194 : vector<32x1xi1>, vector<32x1xi32>
    %219 = arith.minimumf %195, %204 : vector<32x1xf32>
    %220 = arith.minimumf %196, %211 : vector<32x1xf32>
    %c9_i32 = arith.constant 9 : i32
    %221 = arith.truncf %200 : vector<32x128xf32> to vector<32x128xbf16>
    %cst_51 = arith.constant dense<0.000000e+00> : vector<32x128xf32>
    %222 = tpu.matmul %221, %0, %cst_51 {dimension_numbers = #tpu.dot_dimension_numbers<[1], [0], [0], [1], [0, 0, 1, 1], [], []>} : vector<32x128xbf16>, vector<128x128xbf16>, vector<32x128xf32> -> vector<32x128xf32>
    %223 = arith.addf %222, %1 : vector<32x128xf32>
    %224 = math.tanh %223 : vector<32x128xf32>
    %225 = arith.subf %224, %200 : vector<32x128xf32>
    %226 = arith.mulf %225, %225 : vector<32x128xf32>
    %cst_52 = arith.constant dense<0.000000e+00> : vector<32xf32>
    %227 = vector.multi_reduction <add>, %226, %cst_52 [1] : vector<32x128xf32> to vector<32xf32>
    %228 = vector.shape_cast %227 : vector<32xf32> to vector<32x1xf32>
    %229 = arith.mulf %224, %224 : vector<32x128xf32>
    %cst_53 = arith.constant dense<0.000000e+00> : vector<32xf32>
    %230 = vector.multi_reduction <add>, %229, %cst_53 [1] : vector<32x128xf32> to vector<32xf32>
    %231 = vector.shape_cast %230 : vector<32xf32> to vector<32x1xf32>
    %cst_54 = arith.constant 1.000000e-18 : f32
    %232 = vector.broadcast %cst_54 : f32 to vector<32x1xf32>
    %233 = arith.addf %231, %232 : vector<32x1xf32>
    %234 = tpu.reciprocal %233 {approx = true} : vector<32x1xf32> -> vector<32x1xf32>
    %235 = arith.mulf %228, %234 : vector<32x1xf32>
    %236 = arith.cmpf olt, %228, %219 : vector<32x1xf32>
    %237 = vector.shape_cast %236 : vector<32x1xi1> to vector<32x1xi1>
    %238 = vector.broadcast %237 : vector<32x1xi1> to vector<32x128xi1>
    %239 = arith.select %238, %224, %215 : vector<32x128xi1>, vector<32x128xf32>
    %c1_i32_55 = arith.constant 1 : i32
    %240 = arith.addi %c9_i32, %c1_i32_55 : i32
    %241 = vector.broadcast %240 : i32 to vector<32x1xi32>
    %242 = arith.select %236, %241, %218 : vector<32x1xi1>, vector<32x1xi32>
    %243 = arith.minimumf %219, %228 : vector<32x1xf32>
    %244 = arith.minimumf %220, %235 : vector<32x1xf32>
    %c10_i32 = arith.constant 10 : i32
    %245 = arith.truncf %224 : vector<32x128xf32> to vector<32x128xbf16>
    %cst_56 = arith.constant dense<0.000000e+00> : vector<32x128xf32>
    %246 = tpu.matmul %245, %0, %cst_56 {dimension_numbers = #tpu.dot_dimension_numbers<[1], [0], [0], [1], [0, 0, 1, 1], [], []>} : vector<32x128xbf16>, vector<128x128xbf16>, vector<32x128xf32> -> vector<32x128xf32>
    %247 = arith.addf %246, %1 : vector<32x128xf32>
    %248 = math.tanh %247 : vector<32x128xf32>
    %249 = arith.subf %248, %224 : vector<32x128xf32>
    %250 = arith.mulf %249, %249 : vector<32x128xf32>
    %cst_57 = arith.constant dense<0.000000e+00> : vector<32xf32>
    %251 = vector.multi_reduction <add>, %250, %cst_57 [1] : vector<32x128xf32> to vector<32xf32>
    %252 = vector.shape_cast %251 : vector<32xf32> to vector<32x1xf32>
    %253 = arith.mulf %248, %248 : vector<32x128xf32>
    %cst_58 = arith.constant dense<0.000000e+00> : vector<32xf32>
    %254 = vector.multi_reduction <add>, %253, %cst_58 [1] : vector<32x128xf32> to vector<32xf32>
    %255 = vector.shape_cast %254 : vector<32xf32> to vector<32x1xf32>
    %cst_59 = arith.constant 1.000000e-18 : f32
    %256 = vector.broadcast %cst_59 : f32 to vector<32x1xf32>
    %257 = arith.addf %255, %256 : vector<32x1xf32>
    %258 = tpu.reciprocal %257 {approx = true} : vector<32x1xf32> -> vector<32x1xf32>
    %259 = arith.mulf %252, %258 : vector<32x1xf32>
    %260 = arith.cmpf olt, %252, %243 : vector<32x1xf32>
    %261 = vector.shape_cast %260 : vector<32x1xi1> to vector<32x1xi1>
    %262 = vector.broadcast %261 : vector<32x1xi1> to vector<32x128xi1>
    %263 = arith.select %262, %248, %239 : vector<32x128xi1>, vector<32x128xf32>
    %c1_i32_60 = arith.constant 1 : i32
    %264 = arith.addi %c10_i32, %c1_i32_60 : i32
    %265 = vector.broadcast %264 : i32 to vector<32x1xi32>
    %266 = arith.select %260, %265, %242 : vector<32x1xi1>, vector<32x1xi32>
    %267 = arith.minimumf %243, %252 : vector<32x1xf32>
    %268 = arith.minimumf %244, %259 : vector<32x1xf32>
    %c11_i32 = arith.constant 11 : i32
    %269 = arith.truncf %248 : vector<32x128xf32> to vector<32x128xbf16>
    %cst_61 = arith.constant dense<0.000000e+00> : vector<32x128xf32>
    %270 = tpu.matmul %269, %0, %cst_61 {dimension_numbers = #tpu.dot_dimension_numbers<[1], [0], [0], [1], [0, 0, 1, 1], [], []>} : vector<32x128xbf16>, vector<128x128xbf16>, vector<32x128xf32> -> vector<32x128xf32>
    %271 = arith.addf %270, %1 : vector<32x128xf32>
    %272 = math.tanh %271 : vector<32x128xf32>
    %273 = arith.subf %272, %248 : vector<32x128xf32>
    %274 = arith.mulf %273, %273 : vector<32x128xf32>
    %cst_62 = arith.constant dense<0.000000e+00> : vector<32xf32>
    %275 = vector.multi_reduction <add>, %274, %cst_62 [1] : vector<32x128xf32> to vector<32xf32>
    %276 = vector.shape_cast %275 : vector<32xf32> to vector<32x1xf32>
    %277 = arith.mulf %272, %272 : vector<32x128xf32>
    %cst_63 = arith.constant dense<0.000000e+00> : vector<32xf32>
    %278 = vector.multi_reduction <add>, %277, %cst_63 [1] : vector<32x128xf32> to vector<32xf32>
    %279 = vector.shape_cast %278 : vector<32xf32> to vector<32x1xf32>
    %cst_64 = arith.constant 1.000000e-18 : f32
    %280 = vector.broadcast %cst_64 : f32 to vector<32x1xf32>
    %281 = arith.addf %279, %280 : vector<32x1xf32>
    %282 = tpu.reciprocal %281 {approx = true} : vector<32x1xf32> -> vector<32x1xf32>
    %283 = arith.mulf %276, %282 : vector<32x1xf32>
    %284 = arith.cmpf olt, %276, %267 : vector<32x1xf32>
    %285 = vector.shape_cast %284 : vector<32x1xi1> to vector<32x1xi1>
    %286 = vector.broadcast %285 : vector<32x1xi1> to vector<32x128xi1>
    %287 = arith.select %286, %272, %263 : vector<32x128xi1>, vector<32x128xf32>
    %c1_i32_65 = arith.constant 1 : i32
    %288 = arith.addi %c11_i32, %c1_i32_65 : i32
    %289 = vector.broadcast %288 : i32 to vector<32x1xi32>
    %290 = arith.select %284, %289, %266 : vector<32x1xi1>, vector<32x1xi32>
    %291 = arith.minimumf %267, %276 : vector<32x1xf32>
    %292 = arith.minimumf %268, %283 : vector<32x1xf32>
    %c12_i32 = arith.constant 12 : i32
    %293 = arith.truncf %272 : vector<32x128xf32> to vector<32x128xbf16>
    %cst_66 = arith.constant dense<0.000000e+00> : vector<32x128xf32>
    %294 = tpu.matmul %293, %0, %cst_66 {dimension_numbers = #tpu.dot_dimension_numbers<[1], [0], [0], [1], [0, 0, 1, 1], [], []>} : vector<32x128xbf16>, vector<128x128xbf16>, vector<32x128xf32> -> vector<32x128xf32>
    %295 = arith.addf %294, %1 : vector<32x128xf32>
    %296 = math.tanh %295 : vector<32x128xf32>
    %297 = arith.subf %296, %272 : vector<32x128xf32>
    %298 = arith.mulf %297, %297 : vector<32x128xf32>
    %cst_67 = arith.constant dense<0.000000e+00> : vector<32xf32>
    %299 = vector.multi_reduction <add>, %298, %cst_67 [1] : vector<32x128xf32> to vector<32xf32>
    %300 = vector.shape_cast %299 : vector<32xf32> to vector<32x1xf32>
    %301 = arith.mulf %296, %296 : vector<32x128xf32>
    %cst_68 = arith.constant dense<0.000000e+00> : vector<32xf32>
    %302 = vector.multi_reduction <add>, %301, %cst_68 [1] : vector<32x128xf32> to vector<32xf32>
    %303 = vector.shape_cast %302 : vector<32xf32> to vector<32x1xf32>
    %cst_69 = arith.constant 1.000000e-18 : f32
    %304 = vector.broadcast %cst_69 : f32 to vector<32x1xf32>
    %305 = arith.addf %303, %304 : vector<32x1xf32>
    %306 = tpu.reciprocal %305 {approx = true} : vector<32x1xf32> -> vector<32x1xf32>
    %307 = arith.mulf %300, %306 : vector<32x1xf32>
    %308 = arith.cmpf olt, %300, %291 : vector<32x1xf32>
    %309 = vector.shape_cast %308 : vector<32x1xi1> to vector<32x1xi1>
    %310 = vector.broadcast %309 : vector<32x1xi1> to vector<32x128xi1>
    %311 = arith.select %310, %296, %287 : vector<32x128xi1>, vector<32x128xf32>
    %c1_i32_70 = arith.constant 1 : i32
    %312 = arith.addi %c12_i32, %c1_i32_70 : i32
    %313 = vector.broadcast %312 : i32 to vector<32x1xi32>
    %314 = arith.select %308, %313, %290 : vector<32x1xi1>, vector<32x1xi32>
    %315 = arith.minimumf %291, %300 : vector<32x1xf32>
    %316 = arith.minimumf %292, %307 : vector<32x1xf32>
    %c13_i32 = arith.constant 13 : i32
    %317 = arith.truncf %296 : vector<32x128xf32> to vector<32x128xbf16>
    %cst_71 = arith.constant dense<0.000000e+00> : vector<32x128xf32>
    %318 = tpu.matmul %317, %0, %cst_71 {dimension_numbers = #tpu.dot_dimension_numbers<[1], [0], [0], [1], [0, 0, 1, 1], [], []>} : vector<32x128xbf16>, vector<128x128xbf16>, vector<32x128xf32> -> vector<32x128xf32>
    %319 = arith.addf %318, %1 : vector<32x128xf32>
    %320 = math.tanh %319 : vector<32x128xf32>
    %321 = arith.subf %320, %296 : vector<32x128xf32>
    %322 = arith.mulf %321, %321 : vector<32x128xf32>
    %cst_72 = arith.constant dense<0.000000e+00> : vector<32xf32>
    %323 = vector.multi_reduction <add>, %322, %cst_72 [1] : vector<32x128xf32> to vector<32xf32>
    %324 = vector.shape_cast %323 : vector<32xf32> to vector<32x1xf32>
    %325 = arith.mulf %320, %320 : vector<32x128xf32>
    %cst_73 = arith.constant dense<0.000000e+00> : vector<32xf32>
    %326 = vector.multi_reduction <add>, %325, %cst_73 [1] : vector<32x128xf32> to vector<32xf32>
    %327 = vector.shape_cast %326 : vector<32xf32> to vector<32x1xf32>
    %cst_74 = arith.constant 1.000000e-18 : f32
    %328 = vector.broadcast %cst_74 : f32 to vector<32x1xf32>
    %329 = arith.addf %327, %328 : vector<32x1xf32>
    %330 = tpu.reciprocal %329 {approx = true} : vector<32x1xf32> -> vector<32x1xf32>
    %331 = arith.mulf %324, %330 : vector<32x1xf32>
    %332 = arith.cmpf olt, %324, %315 : vector<32x1xf32>
    %333 = vector.shape_cast %332 : vector<32x1xi1> to vector<32x1xi1>
    %334 = vector.broadcast %333 : vector<32x1xi1> to vector<32x128xi1>
    %335 = arith.select %334, %320, %311 : vector<32x128xi1>, vector<32x128xf32>
    %c1_i32_75 = arith.constant 1 : i32
    %336 = arith.addi %c13_i32, %c1_i32_75 : i32
    %337 = vector.broadcast %336 : i32 to vector<32x1xi32>
    %338 = arith.select %332, %337, %314 : vector<32x1xi1>, vector<32x1xi32>
    %339 = arith.minimumf %315, %324 : vector<32x1xf32>
    %340 = arith.minimumf %316, %331 : vector<32x1xf32>
    %c14_i32 = arith.constant 14 : i32
    %341 = arith.truncf %320 : vector<32x128xf32> to vector<32x128xbf16>
    %cst_76 = arith.constant dense<0.000000e+00> : vector<32x128xf32>
    %342 = tpu.matmul %341, %0, %cst_76 {dimension_numbers = #tpu.dot_dimension_numbers<[1], [0], [0], [1], [0, 0, 1, 1], [], []>} : vector<32x128xbf16>, vector<128x128xbf16>, vector<32x128xf32> -> vector<32x128xf32>
    %343 = arith.addf %342, %1 : vector<32x128xf32>
    %344 = math.tanh %343 : vector<32x128xf32>
    %345 = arith.subf %344, %320 : vector<32x128xf32>
    %346 = arith.mulf %345, %345 : vector<32x128xf32>
    %cst_77 = arith.constant dense<0.000000e+00> : vector<32xf32>
    %347 = vector.multi_reduction <add>, %346, %cst_77 [1] : vector<32x128xf32> to vector<32xf32>
    %348 = vector.shape_cast %347 : vector<32xf32> to vector<32x1xf32>
    %349 = arith.mulf %344, %344 : vector<32x128xf32>
    %cst_78 = arith.constant dense<0.000000e+00> : vector<32xf32>
    %350 = vector.multi_reduction <add>, %349, %cst_78 [1] : vector<32x128xf32> to vector<32xf32>
    %351 = vector.shape_cast %350 : vector<32xf32> to vector<32x1xf32>
    %cst_79 = arith.constant 1.000000e-18 : f32
    %352 = vector.broadcast %cst_79 : f32 to vector<32x1xf32>
    %353 = arith.addf %351, %352 : vector<32x1xf32>
    %354 = tpu.reciprocal %353 {approx = true} : vector<32x1xf32> -> vector<32x1xf32>
    %355 = arith.mulf %348, %354 : vector<32x1xf32>
    %356 = arith.cmpf olt, %348, %339 : vector<32x1xf32>
    %357 = vector.shape_cast %356 : vector<32x1xi1> to vector<32x1xi1>
    %358 = vector.broadcast %357 : vector<32x1xi1> to vector<32x128xi1>
    %359 = arith.select %358, %344, %335 : vector<32x128xi1>, vector<32x128xf32>
    %c1_i32_80 = arith.constant 1 : i32
    %360 = arith.addi %c14_i32, %c1_i32_80 : i32
    %361 = vector.broadcast %360 : i32 to vector<32x1xi32>
    %362 = arith.select %356, %361, %338 : vector<32x1xi1>, vector<32x1xi32>
    %363 = arith.minimumf %339, %348 : vector<32x1xf32>
    %364 = arith.minimumf %340, %355 : vector<32x1xf32>
    %c15_i32 = arith.constant 15 : i32
    %365 = arith.truncf %344 : vector<32x128xf32> to vector<32x128xbf16>
    %cst_81 = arith.constant dense<0.000000e+00> : vector<32x128xf32>
    %366 = tpu.matmul %365, %0, %cst_81 {dimension_numbers = #tpu.dot_dimension_numbers<[1], [0], [0], [1], [0, 0, 1, 1], [], []>} : vector<32x128xbf16>, vector<128x128xbf16>, vector<32x128xf32> -> vector<32x128xf32>
    %367 = arith.addf %366, %1 : vector<32x128xf32>
    %368 = math.tanh %367 : vector<32x128xf32>
    %369 = arith.subf %368, %344 : vector<32x128xf32>
    %370 = arith.mulf %369, %369 : vector<32x128xf32>
    %cst_82 = arith.constant dense<0.000000e+00> : vector<32xf32>
    %371 = vector.multi_reduction <add>, %370, %cst_82 [1] : vector<32x128xf32> to vector<32xf32>
    %372 = vector.shape_cast %371 : vector<32xf32> to vector<32x1xf32>
    %373 = arith.mulf %368, %368 : vector<32x128xf32>
    %cst_83 = arith.constant dense<0.000000e+00> : vector<32xf32>
    %374 = vector.multi_reduction <add>, %373, %cst_83 [1] : vector<32x128xf32> to vector<32xf32>
    %375 = vector.shape_cast %374 : vector<32xf32> to vector<32x1xf32>
    %cst_84 = arith.constant 1.000000e-18 : f32
    %376 = vector.broadcast %cst_84 : f32 to vector<32x1xf32>
    %377 = arith.addf %375, %376 : vector<32x1xf32>
    %378 = tpu.reciprocal %377 {approx = true} : vector<32x1xf32> -> vector<32x1xf32>
    %379 = arith.mulf %372, %378 : vector<32x1xf32>
    %380 = arith.cmpf olt, %372, %363 : vector<32x1xf32>
    %381 = vector.shape_cast %380 : vector<32x1xi1> to vector<32x1xi1>
    %382 = vector.broadcast %381 : vector<32x1xi1> to vector<32x128xi1>
    %383 = arith.select %382, %368, %359 : vector<32x128xi1>, vector<32x128xf32>
    %c1_i32_85 = arith.constant 1 : i32
    %384 = arith.addi %c15_i32, %c1_i32_85 : i32
    %385 = vector.broadcast %384 : i32 to vector<32x1xi32>
    %386 = arith.select %380, %385, %362 : vector<32x1xi1>, vector<32x1xi32>
    %387 = arith.minimumf %363, %372 : vector<32x1xf32>
    %388 = arith.minimumf %364, %379 : vector<32x1xf32>
    %c16_i32 = arith.constant 16 : i32
    %389 = arith.truncf %368 : vector<32x128xf32> to vector<32x128xbf16>
    %cst_86 = arith.constant dense<0.000000e+00> : vector<32x128xf32>
    %390 = tpu.matmul %389, %0, %cst_86 {dimension_numbers = #tpu.dot_dimension_numbers<[1], [0], [0], [1], [0, 0, 1, 1], [], []>} : vector<32x128xbf16>, vector<128x128xbf16>, vector<32x128xf32> -> vector<32x128xf32>
    %391 = arith.addf %390, %1 : vector<32x128xf32>
    %392 = math.tanh %391 : vector<32x128xf32>
    %393 = arith.subf %392, %368 : vector<32x128xf32>
    %394 = arith.mulf %393, %393 : vector<32x128xf32>
    %cst_87 = arith.constant dense<0.000000e+00> : vector<32xf32>
    %395 = vector.multi_reduction <add>, %394, %cst_87 [1] : vector<32x128xf32> to vector<32xf32>
    %396 = vector.shape_cast %395 : vector<32xf32> to vector<32x1xf32>
    %397 = arith.mulf %392, %392 : vector<32x128xf32>
    %cst_88 = arith.constant dense<0.000000e+00> : vector<32xf32>
    %398 = vector.multi_reduction <add>, %397, %cst_88 [1] : vector<32x128xf32> to vector<32xf32>
    %399 = vector.shape_cast %398 : vector<32xf32> to vector<32x1xf32>
    %cst_89 = arith.constant 1.000000e-18 : f32
    %400 = vector.broadcast %cst_89 : f32 to vector<32x1xf32>
    %401 = arith.addf %399, %400 : vector<32x1xf32>
    %402 = tpu.reciprocal %401 {approx = true} : vector<32x1xf32> -> vector<32x1xf32>
    %403 = arith.mulf %396, %402 : vector<32x1xf32>
    %404 = arith.cmpf olt, %396, %387 : vector<32x1xf32>
    %405 = vector.shape_cast %404 : vector<32x1xi1> to vector<32x1xi1>
    %406 = vector.broadcast %405 : vector<32x1xi1> to vector<32x128xi1>
    %407 = arith.select %406, %392, %383 : vector<32x128xi1>, vector<32x128xf32>
    %c1_i32_90 = arith.constant 1 : i32
    %408 = arith.addi %c16_i32, %c1_i32_90 : i32
    %409 = vector.broadcast %408 : i32 to vector<32x1xi32>
    %410 = arith.select %404, %409, %386 : vector<32x1xi1>, vector<32x1xi32>
    %411 = arith.minimumf %387, %396 : vector<32x1xf32>
    %412 = arith.minimumf %388, %403 : vector<32x1xf32>
    %c17_i32 = arith.constant 17 : i32
    %413 = arith.truncf %392 : vector<32x128xf32> to vector<32x128xbf16>
    %cst_91 = arith.constant dense<0.000000e+00> : vector<32x128xf32>
    %414 = tpu.matmul %413, %0, %cst_91 {dimension_numbers = #tpu.dot_dimension_numbers<[1], [0], [0], [1], [0, 0, 1, 1], [], []>} : vector<32x128xbf16>, vector<128x128xbf16>, vector<32x128xf32> -> vector<32x128xf32>
    %415 = arith.addf %414, %1 : vector<32x128xf32>
    %416 = math.tanh %415 : vector<32x128xf32>
    %417 = arith.subf %416, %392 : vector<32x128xf32>
    %418 = arith.mulf %417, %417 : vector<32x128xf32>
    %cst_92 = arith.constant dense<0.000000e+00> : vector<32xf32>
    %419 = vector.multi_reduction <add>, %418, %cst_92 [1] : vector<32x128xf32> to vector<32xf32>
    %420 = vector.shape_cast %419 : vector<32xf32> to vector<32x1xf32>
    %421 = arith.mulf %416, %416 : vector<32x128xf32>
    %cst_93 = arith.constant dense<0.000000e+00> : vector<32xf32>
    %422 = vector.multi_reduction <add>, %421, %cst_93 [1] : vector<32x128xf32> to vector<32xf32>
    %423 = vector.shape_cast %422 : vector<32xf32> to vector<32x1xf32>
    %cst_94 = arith.constant 1.000000e-18 : f32
    %424 = vector.broadcast %cst_94 : f32 to vector<32x1xf32>
    %425 = arith.addf %423, %424 : vector<32x1xf32>
    %426 = tpu.reciprocal %425 {approx = true} : vector<32x1xf32> -> vector<32x1xf32>
    %427 = arith.mulf %420, %426 : vector<32x1xf32>
    %428 = arith.cmpf olt, %420, %411 : vector<32x1xf32>
    %429 = vector.shape_cast %428 : vector<32x1xi1> to vector<32x1xi1>
    %430 = vector.broadcast %429 : vector<32x1xi1> to vector<32x128xi1>
    %431 = arith.select %430, %416, %407 : vector<32x128xi1>, vector<32x128xf32>
    %c1_i32_95 = arith.constant 1 : i32
    %432 = arith.addi %c17_i32, %c1_i32_95 : i32
    %433 = vector.broadcast %432 : i32 to vector<32x1xi32>
    %434 = arith.select %428, %433, %410 : vector<32x1xi1>, vector<32x1xi32>
    %435 = arith.minimumf %411, %420 : vector<32x1xf32>
    %436 = arith.minimumf %412, %427 : vector<32x1xf32>
    %c18_i32 = arith.constant 18 : i32
    %c0_96 = arith.constant 0 : index
    %c0_97 = arith.constant 0 : index
    %c0_98 = arith.constant 0 : index
    %437 = vector.load %arg4[%c0_96, %c0_97, %c0_98] : memref<1x32x128xf32, #tpu.memory_space<vmem>>, vector<1x32x128xf32>
    %438 = vector.shape_cast %437 : vector<1x32x128xf32> to vector<32x128xf32>
    %439 = vector.shape_cast %431 : vector<32x128xf32> to vector<1x32x128xf32>
    tpu.vector_store %arg4[%c0_96, %c0_97, %c0_98], %439 {strides = array<i32>} : memref<1x32x128xf32, #tpu.memory_space<vmem>>, vector<1x32x128xf32>,
    %440 = tpu.iota {dimensions = array<i32: 1>} : vector<32x128xi32>
    %441 = math.sqrt %435 : vector<32x1xf32>
    %442 = math.sqrt %436 : vector<32x1xf32>
    %c0_i32_99 = arith.constant 0 : i32
    %443 = vector.broadcast %c0_i32_99 : i32 to vector<32x128xi32>
    %444 = arith.cmpi eq, %440, %443 : vector<32x128xi32>
    %c1_i32_100 = arith.constant 1 : i32
    %445 = vector.broadcast %c1_i32_100 : i32 to vector<32x128xi32>
    %446 = arith.cmpi eq, %440, %445 : vector<32x128xi32>
    %c2_i32_101 = arith.constant 2 : i32
    %447 = vector.broadcast %c2_i32_101 : i32 to vector<32x128xi32>
    %448 = arith.cmpi eq, %440, %447 : vector<32x128xi32>
    %449 = arith.sitofp %434 : vector<32x1xi32> to vector<32x1xf32>
    %cst_102 = arith.constant 0.000000e+00 : f32
    %450 = vector.shape_cast %449 : vector<32x1xf32> to vector<32x1xf32>
    %451 = vector.broadcast %450 : vector<32x1xf32> to vector<32x128xf32>
    %452 = vector.broadcast %cst_102 : f32 to vector<32x128xf32>
    %453 = arith.select %448, %451, %452 : vector<32x128xi1>, vector<32x128xf32>
    %454 = vector.shape_cast %442 : vector<32x1xf32> to vector<32x1xf32>
    %455 = vector.broadcast %454 : vector<32x1xf32> to vector<32x128xf32>
    %456 = arith.select %446, %455, %453 : vector<32x128xi1>, vector<32x128xf32>
    %457 = vector.shape_cast %441 : vector<32x1xf32> to vector<32x1xf32>
    %458 = vector.broadcast %457 : vector<32x1xf32> to vector<32x128xf32>
    %459 = arith.select %444, %458, %456 : vector<32x128xi1>, vector<32x128xf32>
    %c0_103 = arith.constant 0 : index
    %c0_104 = arith.constant 0 : index
    %460 = vector.load %arg5[%c0_103, %c0_104] : memref<32x128xf32, #tpu.memory_space<vmem>>, vector<32x128xf32>
    tpu.vector_store %arg5[%c0_103, %c0_104], %459 {strides = array<i32>} : memref<32x128xf32, #tpu.memory_space<vmem>>, vector<32x128xf32>,
    return
  }
  func.func @transform_0(%arg0: i32) -> (i32, i32) {
    %c0_i32 = arith.constant 0 : i32
    %c0_i32_0 = arith.constant 0 : i32
    return %arg0, %c0_i32 : i32, i32
  }
  func.func @transform_1(%arg0: i32) -> (i32, i32) {
    %c0_i32 = arith.constant 0 : i32
    %c0_i32_0 = arith.constant 0 : i32
    %c0_i32_1 = arith.constant 0 : i32
    return %c0_i32, %c0_i32_0 : i32, i32
  }
  func.func @transform_2(%arg0: i32) -> (i32, i32) {
    %c0_i32 = arith.constant 0 : i32
    %c0_i32_0 = arith.constant 0 : i32
    return %arg0, %c0_i32 : i32, i32
  }
  func.func @transform_3(%arg0: i32) -> (i32, i32, i32) {
    %c0_i32 = arith.constant 0 : i32
    %c0_i32_0 = arith.constant 0 : i32
    %c0_i32_1 = arith.constant 0 : i32
    return %c0_i32, %arg0, %c0_i32_0 : i32, i32, i32
  }
  func.func @transform_4(%arg0: i32) -> (i32, i32) {
    %c0_i32 = arith.constant 0 : i32
    %c0_i32_0 = arith.constant 0 : i32
    return %arg0, %c0_i32 : i32, i32
  }
}

</mosaic_0001>

<bundles_post_ra>
// kernel: tpu_custom_call.1
= control target key start
LH: loop header
LB: loop body
LE: loop exit
PB: predicated region body
PF: predicated region fallthrough
CT: control target
= control target key end

     0   :  { %10 = vsyncpa [#allocation3], 0  ;;  %s5514_s0 = inlined_call_operand.hbm [shape: f32[32,128], index: 0, kind: input, shape index: {}]   ;;  %s5515_s1 = inlined_call_operand.hbm [shape: bf16[128,128], index: 1, kind: input, shape index: {}]   ;;  %s5516_s2 = inlined_call_operand.hbm [shape: f32[32,128], index: 2, kind: input, shape index: {}]   ;;  %s5517_s3 = inlined_call_operand.hbm [shape: f32[1,32,128], index: 3, kind: output, shape index: {0}]   ;;  %s5518_s4 = inlined_call_operand.hbm [shape: f32[32,128], index: 4, kind: output, shape index: {1}]  }
   0x1   :  { %11 = vsyncpa [#allocation6], 0 }
   0x2   :  { %12 = vsyncpa [#allocation4], 0 }
   0x3   :  { %13 = vsyncpa [#allocation10], 0  ;;  %s3467_s15 = smov [#allocation5]  }
   0x4   :  { %s31_s16 = sshll.u32 %s3467_s15, 4  ;;  %s32_s16 = int_to_ptr.vmem [resolvable:$true] %s31_s16 }
   0x5   :  { %s3367_s17 = scalar_lea.vmem %s32_s16, 1024  ;;  %p3372_p1 = scmp.lt.s32.totalorder %s32_s16, %s32_s16 }
   0x6   :  { %p3368_p0 = scmp.ne.s32.totalorder %s32_s16, %s3367_s17  ;;  %p3373_p2 = scmp.lt.s32.totalorder %s3367_s17, %s3367_s17 }
   0x8   :  { %p3374_p3 = por %p3373_p2, %p3372_p1 }
   0xa   :  { %p3375_p4 = pnand %p3374_p3, %p3368_p0 }
   0xc   :  { %3378 = shalt.err (!%p3375_p4)
}
   0xd   :  { %s3468_s18 = smov 64   ;;  %s3469_s19 = smov 4  }
   0xe   :  { %37 = dma.hbm_to_vmem [thread:$0]  %s5515_s1, 1024, %s32_s16, [#allocation6], %s3468_s18, %s3468_s18, %s3469_s19  }
   0xf   :  { %s3470_s22 = smov [#allocation2]  }
  0x10   :  { %s19_s23 = sshll.u32 %s3470_s22, 4  ;;  %s20_s23 = int_to_ptr.vmem [resolvable:$true] %s19_s23 }
  0x11   :  { %s3387_s24 = scalar_lea.vmem %s20_s23, 512  ;;  %p3392_p6 = scmp.lt.s32.totalorder %s20_s23, %s20_s23 }
  0x12   :  { %p3388_p5 = scmp.ne.s32.totalorder %s20_s23, %s3387_s24  ;;  %p3393_p7 = scmp.lt.s32.totalorder %s3387_s24, %s3387_s24 }
  0x14   :  { %p3394_p8 = por %p3393_p7, %p3392_p6 }
  0x16   :  { %p3395_p9 = pnand %p3394_p8, %p3388_p5 }
  0x18   :  { %3398 = shalt.err (!%p3395_p9)
}
  0x19   :  { %s3471_s25 = smov 128   ;;  %s3472_s26 = smov 8  }
  0x1a   :  { %25 = dma.hbm_to_vmem [thread:$0]  %s5514_s0, 512, %s20_s23, [#allocation3], %s3471_s25, %s3471_s25, %s3472_s26  }
  0x1b   :  { %s3473_s1 = smov [#allocation7]  }
  0x1c   :  { %s43_s29 = sshll.u32 %s3473_s1, 4  ;;  %s44_s29 = int_to_ptr.vmem [resolvable:$true] %s43_s29 }
  0x1d   :  { %s3407_s30 = scalar_lea.vmem %s44_s29, 512  ;;  %p3412_p11 = scmp.lt.s32.totalorder %s44_s29, %s44_s29 }
  0x1e   :  { %p3408_p10 = scmp.ne.s32.totalorder %s44_s29, %s3407_s30  ;;  %p3413_p12 = scmp.lt.s32.totalorder %s3407_s30, %s3407_s30 }
  0x20   :  { %p3414_p13 = por %p3413_p12, %p3412_p11 }
  0x22   :  { %p3415_p0 = pnand %p3414_p13, %p3408_p10 }
  0x24   :  { %3418 = shalt.err (!%p3415_p0)
}
  0x25   :  { %49 = dma.hbm_to_vmem [thread:$0]  %s5516_s2, 512, %s44_s29, [#allocation6], %s3471_s25, %s3471_s25, %s3472_s26  }
  0x26   :  { %3459 = dma.done.wait [#allocation3], 512  }
  0x27   :  { %3460 = vsyncadd [#allocation3], 4294966784 }
  0x28   :  { %3461 = dma.done.wait [#allocation6], 1536  }
  0x29   :  { %3462 = vsyncadd [#allocation6], 4294965760  ;;  %v3517_v0 = vld [vmem:[#allocation5 + $0x38] sm:$0xff]   ;;  %v3519_v1 = vld [vmem:[#allocation5 + $0x30] sm:$0xff]   ;;  %s3475_s0 = smov [#allocation8]  }
  0x2a   :  { %2649 = vmatprep.subr.bf16.mxu0 %v3517_v0  ;;  %2669 = vmatprep.subr.bf16.mxu1 %v3517_v0  ;;  %v3526_v2 = vld [vmem:[#allocation5 + $0x28] sm:$0xff]   ;;  %v3532_v3 = vld [vmem:[#allocation5 + $0x20] sm:$0xff]   ;;  %v3543_v7 = vld [vmem:[#allocation5 + $0x18] sm:$0xff]   ;;  %s2432_s2 = sshll.u32 %s3475_s0, 4  ;;  %s2433_s2 = int_to_ptr.vmem [resolvable:$true] %s2432_s2 }
  0x2b   :  { %2650 = vmatpush3.bf16.msra.mxu0 %v3517_v0  ;;  %2670 = vmatpush3.bf16.msra.mxu1 %v3517_v0  ;;  %v3534_v4 = vld [vmem:[#allocation2] sm:$0xff]  ;;  %v3536_v5 = vld [vmem:[#allocation2 + $0x8] sm:$0xff]  ;;  %v3549_v8 = vld [vmem:[#allocation5 + $0x10] sm:$0xff]   ;;  %s3419_s7 = scalar_lea.vmem %s2433_s2, 512  ;;  %p3424_p2 = scmp.lt.s32.totalorder %s2433_s2, %s2433_s2 }
  0x2c   :  { %2651 = vmatprep.subr.bf16.mxu0 %v3519_v1  ;;  %2671 = vmatprep.subr.bf16.mxu1 %v3519_v1  ;;  %v84_v6 = vpack.c.bf16 %v3536_v5, %v3534_v4  ;;  %v3555_v9 = vld [vmem:[#allocation5 + $0x8] sm:$0xff]   ;;  %v3561_v10 = vld [vmem:[#allocation5] sm:$0xff]   ;;  %v82_v11 = vld [vmem:[#allocation2 + $0x10] sm:$0xff]  ;;  %p3420_p1 = scmp.ne.s32.totalorder %s2433_s2, %s3419_s7  ;;  %p3425_p3 = scmp.lt.s32.totalorder %s3419_s7, %s3419_s7 }
  0x2d   :  { %v83_v12 = vld [vmem:[#allocation2 + $0x18] sm:$0xff]  ;;  %v3589_v14 = vld [vmem:[#allocation7 + $0x10] sm:$0xff]  ;;  %v3591_v16 = vld [vmem:[#allocation7] sm:$0xff] }
  0x2e   :  { %2665 = vmatprep.mubr.bf16.mxu0 %v84_v6  ;;  %v85_v13 = vpack.c.bf16 %v83_v12, %v82_v11  ;;  %v3594_v19 = vld [vmem:[#allocation7 + $0x18] sm:$0xff]  ;;  %v3597_v22 = vld [vmem:[#allocation7 + $0x8] sm:$0xff]  ;;  %p3426_p4 = por %p3425_p3, %p3424_p2 }
  0x2f   :  { %2652 = vmatpush3.bf16.msra.mxu0 %v3519_v1  ;;  %2672 = vmatpush3.bf16.msra.mxu1 %v3519_v1 }
  0x30   :  { %2653 = vmatprep.subr.bf16.mxu0 %v3526_v2  ;;  %2673 = vmatprep.subr.bf16.mxu1 %v3526_v2  ;;  %p3427_p5 = pnand %p3426_p4, %p3420_p1 }
  0x33   :  { %2654 = vmatpush3.bf16.msra.mxu0 %v3526_v2  ;;  %2674 = vmatpush3.bf16.msra.mxu1 %v3526_v2 }
  0x34   :  { %2655 = vmatprep.subr.bf16.mxu0 %v3532_v3  ;;  %2675 = vmatprep.subr.bf16.mxu1 %v3532_v3 }
  0x37   :  { %2656 = vmatpush3.bf16.msra.mxu0 %v3532_v3  ;;  %2676 = vmatpush3.bf16.msra.mxu1 %v3532_v3 }
  0x38   :  { %2657 = vmatprep.subr.bf16.mxu0 %v3543_v7  ;;  %2677 = vmatprep.subr.bf16.mxu1 %v3543_v7 }
  0x3b   :  { %2658 = vmatpush3.bf16.msra.mxu0 %v3543_v7  ;;  %2678 = vmatpush3.bf16.msra.mxu1 %v3543_v7 }
  0x3c   :  { %2659 = vmatprep.subr.bf16.mxu0 %v3549_v8  ;;  %2679 = vmatprep.subr.bf16.mxu1 %v3549_v8 }
  0x3f   :  { %2660 = vmatpush3.bf16.msra.mxu0 %v3549_v8  ;;  %2680 = vmatpush3.bf16.msra.mxu1 %v3549_v8 }
  0x40   :  { %2661 = vmatprep.subr.bf16.mxu0 %v3555_v9  ;;  %2681 = vmatprep.subr.bf16.mxu1 %v3555_v9 }
  0x43   :  { %2662 = vmatpush3.bf16.msra.mxu0 %v3555_v9  ;;  %2682 = vmatpush3.bf16.msra.mxu1 %v3555_v9 }
  0x44   :  { %2663 = vmatprep.subr.bf16.mxu0 %v3561_v10  ;;  %2683 = vmatprep.subr.bf16.mxu1 %v3561_v10 }
  0x47   :  { %2664 = vmatpush3.bf16.msra.mxu0 %v3561_v10  ;;  %2684 = vmatpush3.bf16.msra.mxu1 %v3561_v10 }
  0x48   :  { %2689 = vmatprep.subr.bf16.mxu0 %v3517_v0  ;;  %2709 = vmatprep.subr.bf16.mxu1 %v3517_v0 }
  0x4a   :  { %2666 = vmatmul.mubr.bf16.vlgmr.msra.gmra.mxu0 %v85_v13 }
  0x4b   :  { %2690 = vmatpush3.bf16.msra.mxu0 %v3517_v0 }
  0x4c   :  { %2691 = vmatprep.subr.bf16.mxu0 %v3519_v1 }
  0x4f   :  { %2692 = vmatpush3.bf16.msra.mxu0 %v3519_v1 }
  0x50   :  { %2693 = vmatprep.subr.bf16.mxu0 %v3526_v2 }
  0x53   :  { %2694 = vmatpush3.bf16.msra.mxu0 %v3526_v2 }
  0x54   :  { %2695 = vmatprep.subr.bf16.mxu0 %v3532_v3 }
  0x57   :  { %2696 = vmatpush3.bf16.msra.mxu0 %v3532_v3 }
  0x58   :  { %2697 = vmatprep.subr.bf16.mxu0 %v3543_v7 }
  0x5b   :  { %2698 = vmatpush3.bf16.msra.mxu0 %v3543_v7 }
  0x5c   :  { %2699 = vmatprep.subr.bf16.mxu0 %v3549_v8 }
  0x5f   :  { %2700 = vmatpush3.bf16.msra.mxu0 %v3549_v8 }
  0x60   :  { %2701 = vmatprep.subr.bf16.mxu0 %v3555_v9 }
  0x63   :  { %2702 = vmatpush3.bf16.msra.mxu0 %v3555_v9 }
  0x64   :  { %2703 = vmatprep.subr.bf16.mxu0 %v3561_v10 }
  0x67   :  { %2704 = vmatpush3.bf16.msra.mxu0 %v3561_v10 }
  0x68   :  { %2729 = vmatprep.subr.bf16.mxu0 %v3517_v0 }
 0x10a   :  { %v2667_v15 = vpop.f32.mrf.mxu0 }
 0x10b   :  { %v177_v17 = vadd.f32 %v2667_v15, %v3589_v14 }
 0x10c   :  { %v168_v18 = vpop.f32.mrf.mxu0 }
 0x10d   :  { %3027 = vtanh.f32 %v177_v17  ;;  %v169_v20 = vadd.f32 %v168_v18, %v3591_v16 }
 0x10e   :  { %v2668_v21 = vpop.f32.mrf.mxu0 }
 0x10f   :  { %3029 = vtanh.f32 %v169_v20  ;;  %v180_v23 = vadd.f32 %v2668_v21, %v3594_v19 }
 0x110   :  { %v171_v24 = vpop.f32.mrf.mxu0 }
 0x111   :  { %3031 = vtanh.f32 %v180_v23  ;;  %v172_v25 = vadd.f32 %v171_v24, %v3597_v22 }
 0x113   :  { %3033 = vtanh.f32 %v172_v25 }
 0x11a   :  { %v3601_v26 = vpop.eup %3027 }
 0x11b   :  { %v205_v27 = vmul.f32 %v3601_v26, %v3601_v26  ;;  %v189_v28 = vsub.f32 %v3601_v26, %v82_v11 }
 0x11c   :  { %v3606_v29 = vpop.eup %3029 }
 0x11d   :  { %5603 = vst [vmem:[#allocation15_spill] sm:$0xff] %v3606_v29  ;;  %211 = vadd.xlane.f32.xlu0 %v205_v27  ;;  %v193_v30 = vmul.f32 %v189_v28, %v189_v28  ;;  %v203_v32 = vmul.f32 %v3606_v29, %v3606_v29  ;;  %v187_v33 = vsub.f32 %v3606_v29, %v3534_v4 }
 0x11e   :  { %v3608_v31 = vpop.eup %3031 }
 0x11f   :  { %199 = vadd.xlane.f32.xlu1 %v193_v30  ;;  %v206_v35 = vmul.f32 %v3608_v31, %v3608_v31  ;;  %v190_v37 = vsub.f32 %v3608_v31, %v83_v12  ;;  %v252_v38 = vpack.c.bf16 %v3608_v31, %v3601_v26  ;;  %v191_v39 = vmul.f32 %v187_v33, %v187_v33 }
 0x120   :  { %v3614_v34 = vpop.eup %3033 }
 0x121   :  { %5604 = vst [vmem:[#allocation16_spill] sm:$0xff] %v3614_v34  ;;  %207 = vadd.xlane.f32.xlu0 %v203_v32  ;;  %v251_v36 = vpack.c.bf16 %v3614_v34, %v3606_v29  ;;  %v188_v40 = vsub.f32 %v3614_v34, %v3536_v5  ;;  %v194_v41 = vmul.f32 %v190_v37, %v190_v37 }
 0x122   :  { %v204_v43 = vmul.f32 %v3614_v34, %v3614_v34 }
 0x123   :  { %213 = vadd.xlane.f32.xlu1 %v206_v35  ;;  %2685 = vmatprep.mubr.bf16.mxu1 %v251_v36  ;;  %v192_v42 = vmul.f32 %v188_v40, %v188_v40 }
 0x124   :  { %2686 = vmatmul.mubr.bf16.vlgmr.msra.gmra.mxu1 %v252_v38 }
 0x125   :  { %195 = vadd.xlane.f32.xlu0 %v191_v39  ;;  %2710 = vmatpush3.bf16.msra.mxu1 %v3517_v0 }
 0x126   :  { %2711 = vmatprep.subr.bf16.mxu1 %v3519_v1 }
 0x127   :  { %201 = vadd.xlane.f32.xlu1 %v194_v41 }
 0x129   :  { %197 = vadd.xlane.f32.xlu0 %v192_v42  ;;  %2712 = vmatpush3.bf16.msra.mxu1 %v3519_v1 }
 0x12a   :  { %2713 = vmatprep.subr.bf16.mxu1 %v3526_v2 }
 0x12b   :  { %209 = vadd.xlane.f32.xlu1 %v204_v43 }
 0x12d   :  { %2714 = vmatpush3.bf16.msra.mxu1 %v3526_v2 }
 0x12e   :  { %2715 = vmatprep.subr.bf16.mxu1 %v3532_v3 }
 0x131   :  { %2716 = vmatpush3.bf16.msra.mxu1 %v3532_v3 }
 0x132   :  { %2717 = vmatprep.subr.bf16.mxu1 %v3543_v7 }
 0x135   :  { %2718 = vmatpush3.bf16.msra.mxu1 %v3543_v7 }
 0x136   :  { %2719 = vmatprep.subr.bf16.mxu1 %v3549_v8 }
 0x139   :  { %2720 = vmatpush3.bf16.msra.mxu1 %v3549_v8 }
 0x13a   :  { %2721 = vmatprep.subr.bf16.mxu1 %v3555_v9 }
 0x13d   :  { %2722 = vmatpush3.bf16.msra.mxu1 %v3555_v9 }
 0x13e   :  { %2723 = vmatprep.subr.bf16.mxu1 %v3561_v10 }
 0x141   :  { %2724 = vmatpush3.bf16.msra.mxu1 %v3561_v10 }
 0x142   :  { %2749 = vmatprep.subr.bf16.mxu1 %v3517_v0 }
 0x1e4   :  { %v2687_v44 = vpop.f32.mrf.mxu1 }
 0x1e5   :  { %v296_v45 = vadd.f32 %v2687_v44, %v3589_v14 }
 0x1e6   :  { %v287_v46 = vpop.f32.mrf.mxu1 }
 0x1e7   :  { %3035 = vtanh.f32 %v296_v45  ;;  %v288_v47 = vadd.f32 %v287_v46, %v3591_v16 }
 0x1e8   :  { %v2688_v48 = vpop.f32.mrf.mxu1 }
 0x1e9   :  { %v299_v49 = vadd.f32 %v2688_v48, %v3594_v19 }
 0x1ea   :  { %v290_v50 = vpop.f32.mrf.mxu1 }
 0x1eb   :  { %3037 = vtanh.f32 %v299_v49  ;;  %v291_v51 = vadd.f32 %v290_v50, %v3597_v22 }
 0x1ec   :  { %3039 = vtanh.f32 %v288_v47 }
 0x1ed   :  { %3041 = vtanh.f32 %v291_v51 }
 0x1f4   :  { %v3647_v52 = vpop.eup %3035 }
 0x1f5   :  { %v324_v53 = vmul.f32 %v3647_v52, %v3647_v52  ;;  %v308_v54 = vsub.f32 %v3647_v52, %v3601_v26 }
 0x1f7   :  { %330 = vadd.xlane.f32.xlu0 %v324_v53  ;;  %v312_v58 = vmul.f32 %v308_v54, %v308_v54 }
 0x1f8   :  { %v3653_v55 = vpop.eup %3037 }
 0x1f9   :  { %v3655_v56 = vpop.eup %3039  ;;  %v325_v57 = vmul.f32 %v3653_v55, %v3653_v55  ;;  %v309_v59 = vsub.f32 %v3653_v55, %v3608_v31  ;;  %v375_v62 = vpack.c.bf16 %v3653_v55, %v3647_v52 }
 0x1fa   :  { %5605 = vst [vmem:[#allocation17_spill] sm:$0xff] %v3655_v56  ;;  %v3661_v60 = vpop.eup %3041  ;;  %v322_v4 = vmul.f32 %v3655_v56, %v3655_v56  ;;  %v306_v5 = vsub.f32 %v3655_v56, %v3606_v29 }
 0x1fb   :  { %5606 = vst [vmem:[#allocation18_spill] sm:$0xff] %v3661_v60  ;;  %332 = vadd.xlane.f32.xlu1 %v325_v57  ;;  %318 = vadd.xlane.f32.xlu0 %v312_v58  ;;  %v374_v61 = vpack.c.bf16 %v3661_v60, %v3655_v56  ;;  %v313_v63 = vmul.f32 %v309_v59, %v309_v59 }
 0x1fc   :  { %v323_v6 = vmul.f32 %v3661_v60, %v3661_v60  ;;  %v310_v11 = vmul.f32 %v306_v5, %v306_v5  ;;  %v307_v12 = vsub.f32 %v3661_v60, %v3614_v34 }
 0x1fd   :  { %2705 = vmatprep.mubr.bf16.mxu0 %v374_v61 }
 0x1fe   :  { %2706 = vmatmul.mubr.bf16.vlgmr.msra.gmra.mxu0 %v375_v62  ;;  %v311_v13 = vmul.f32 %v307_v12, %v307_v12 }
 0x1ff   :  { %320 = vadd.xlane.f32.xlu1 %v313_v63  ;;  %326 = vadd.xlane.f32.xlu0 %v322_v4 }
 0x200   :  { %2730 = vmatpush3.bf16.msra.mxu0 %v3517_v0 }
 0x201   :  { %2731 = vmatprep.subr.bf16.mxu0 %v3519_v1 }
 0x203   :  { %328 = vadd.xlane.f32.xlu1 %v323_v6  ;;  %314 = vadd.xlane.f32.xlu0 %v310_v11 }
 0x204   :  { %2732 = vmatpush3.bf16.msra.mxu0 %v3519_v1 }
 0x205   :  { %2733 = vmatprep.subr.bf16.mxu0 %v3526_v2 }
 0x207   :  { %316 = vadd.xlane.f32.xlu1 %v311_v13 }
 0x208   :  { %2734 = vmatpush3.bf16.msra.mxu0 %v3526_v2 }
 0x209   :  { %2735 = vmatprep.subr.bf16.mxu0 %v3532_v3 }
 0x20c   :  { %2736 = vmatpush3.bf16.msra.mxu0 %v3532_v3 }
 0x20d   :  { %2737 = vmatprep.subr.bf16.mxu0 %v3543_v7 }
 0x210   :  { %2738 = vmatpush3.bf16.msra.mxu0 %v3543_v7 }
 0x211   :  { %2739 = vmatprep.subr.bf16.mxu0 %v3549_v8 }
 0x214   :  { %2740 = vmatpush3.bf16.msra.mxu0 %v3549_v8 }
 0x215   :  { %2741 = vmatprep.subr.bf16.mxu0 %v3555_v9 }
 0x218   :  { %2742 = vmatpush3.bf16.msra.mxu0 %v3555_v9 }
 0x219   :  { %2743 = vmatprep.subr.bf16.mxu0 %v3561_v10 }
 0x21c   :  { %2744 = vmatpush3.bf16.msra.mxu0 %v3561_v10 }
 0x21d   :  { %2769 = vmatprep.subr.bf16.mxu0 %v3517_v0 }
 0x2be   :  { %v2707_v15 = vpop.f32.mrf.mxu0 }
 0x2bf   :  { %v419_v17 = vadd.f32 %v2707_v15, %v3589_v14 }
 0x2c0   :  { %v410_v18 = vpop.f32.mrf.mxu0 }
 0x2c1   :  { %3043 = vtanh.f32 %v419_v17  ;;  %v411_v20 = vadd.f32 %v410_v18, %v3591_v16 }
 0x2c2   :  { %v2708_v21 = vpop.f32.mrf.mxu0 }
 0x2c3   :  { %v422_v23 = vadd.f32 %v2708_v21, %v3594_v19 }
 0x2c4   :  { %v413_v24 = vpop.f32.mrf.mxu0 }
 0x2c5   :  { %3045 = vtanh.f32 %v422_v23  ;;  %v414_v25 = vadd.f32 %v413_v24, %v3597_v22 }
 0x2c6   :  { %3047 = vtanh.f32 %v411_v20 }
 0x2c7   :  { %3049 = vtanh.f32 %v414_v25 }
 0x2ce   :  { %v3695_v27 = vpop.eup %3043 }
 0x2cf   :  { %v447_v28 = vmul.f32 %v3695_v27, %v3695_v27  ;;  %v431_v30 = vsub.f32 %v3695_v27, %v3647_v52 }
 0x2d1   :  { %453 = vadd.xlane.f32.xlu0 %v447_v28  ;;  %v435_v36 = vmul.f32 %v431_v30, %v431_v30 }
 0x2d2   :  { %v3701_v32 = vpop.eup %3045 }
 0x2d3   :  { %v3703_v33 = vpop.eup %3047  ;;  %v448_v35 = vmul.f32 %v3701_v32, %v3701_v32  ;;  %v432_v37 = vsub.f32 %v3701_v32, %v3653_v55  ;;  %v498_v40 = vpack.c.bf16 %v3701_v32, %v3695_v27 }
 0x2d4   :  { %5607 = vst [vmem:[#allocation19_spill] sm:$0xff] %v3703_v33  ;;  %v3709_v38 = vpop.eup %3049  ;;  %v445_v42 = vmul.f32 %v3703_v33, %v3703_v33  ;;  %v429_v43 = vsub.f32 %v3703_v33, %v3655_v56 }
 0x2d5   :  { %5608 = vst [vmem:[#allocation20_spill] sm:$0xff] %v3709_v38  ;;  %455 = vadd.xlane.f32.xlu1 %v448_v35  ;;  %441 = vadd.xlane.f32.xlu0 %v435_v36  ;;  %v497_v39 = vpack.c.bf16 %v3709_v38, %v3703_v33  ;;  %v436_v41 = vmul.f32 %v432_v37, %v432_v37 }
 0x2d6   :  { %v446_v44 = vmul.f32 %v3709_v38, %v3709_v38  ;;  %v433_v45 = vmul.f32 %v429_v43, %v429_v43  ;;  %v430_v46 = vsub.f32 %v3709_v38, %v3661_v60 }
 0x2d7   :  { %2725 = vmatprep.mubr.bf16.mxu1 %v497_v39 }
 0x2d8   :  { %2726 = vmatmul.mubr.bf16.vlgmr.msra.gmra.mxu1 %v498_v40  ;;  %v434_v47 = vmul.f32 %v430_v46, %v430_v46 }
 0x2d9   :  { %443 = vadd.xlane.f32.xlu1 %v436_v41  ;;  %449 = vadd.xlane.f32.xlu0 %v445_v42 }
 0x2da   :  { %2750 = vmatpush3.bf16.msra.mxu1 %v3517_v0 }
 0x2db   :  { %2751 = vmatprep.subr.bf16.mxu1 %v3519_v1 }
 0x2dd   :  { %451 = vadd.xlane.f32.xlu1 %v446_v44  ;;  %437 = vadd.xlane.f32.xlu0 %v433_v45 }
 0x2de   :  { %2752 = vmatpush3.bf16.msra.mxu1 %v3519_v1 }
 0x2df   :  { %2753 = vmatprep.subr.bf16.mxu1 %v3526_v2 }
 0x2e1   :  { %439 = vadd.xlane.f32.xlu1 %v434_v47 }
 0x2e2   :  { %2754 = vmatpush3.bf16.msra.mxu1 %v3526_v2 }
 0x2e3   :  { %2755 = vmatprep.subr.bf16.mxu1 %v3532_v3 }
 0x2e6   :  { %2756 = vmatpush3.bf16.msra.mxu1 %v3532_v3 }
 0x2e7   :  { %2757 = vmatprep.subr.bf16.mxu1 %v3543_v7 }
 0x2ea   :  { %2758 = vmatpush3.bf16.msra.mxu1 %v3543_v7 }
 0x2eb   :  { %2759 = vmatprep.subr.bf16.mxu1 %v3549_v8 }
 0x2ee   :  { %2760 = vmatpush3.bf16.msra.mxu1 %v3549_v8 }
 0x2ef   :  { %2761 = vmatprep.subr.bf16.mxu1 %v3555_v9 }
 0x2f2   :  { %2762 = vmatpush3.bf16.msra.mxu1 %v3555_v9 }
 0x2f3   :  { %2763 = vmatprep.subr.bf16.mxu1 %v3561_v10 }
 0x2f6   :  { %2764 = vmatpush3.bf16.msra.mxu1 %v3561_v10 }
 0x2f7   :  { %2789 = vmatprep.subr.bf16.mxu1 %v3517_v0 }
 0x398   :  { %v2727_v48 = vpop.f32.mrf.mxu1 }
 0x399   :  { %v542_v49 = vadd.f32 %v2727_v48, %v3589_v14 }
 0x39a   :  { %v533_v50 = vpop.f32.mrf.mxu1 }
 0x39b   :  { %3051 = vtanh.f32 %v542_v49  ;;  %v534_v51 = vadd.f32 %v533_v50, %v3591_v16 }
 0x39c   :  { %v2728_v53 = vpop.f32.mrf.mxu1 }
 0x39d   :  { %v545_v54 = vadd.f32 %v2728_v53, %v3594_v19 }
 0x39e   :  { %v536_v57 = vpop.f32.mrf.mxu1 }
 0x39f   :  { %3053 = vtanh.f32 %v545_v54  ;;  %v537_v58 = vadd.f32 %v536_v57, %v3597_v22 }
 0x3a0   :  { %3055 = vtanh.f32 %v534_v51 }
 0x3a1   :  { %3057 = vtanh.f32 %v537_v58 }
 0x3a8   :  { %v3743_v59 = vpop.eup %3051 }
 0x3a9   :  { %v570_v61 = vmul.f32 %v3743_v59, %v3743_v59  ;;  %v554_v62 = vsub.f32 %v3743_v59, %v3695_v27 }
 0x3ab   :  { %576 = vadd.xlane.f32.xlu0 %v570_v61  ;;  %v558_v6 = vmul.f32 %v554_v62, %v554_v62 }
 0x3ac   :  { %v3749_v63 = vpop.eup %3053 }
 0x3ad   :  { %v3751_v4 = vpop.eup %3055  ;;  %v571_v5 = vmul.f32 %v3749_v63, %v3749_v63  ;;  %v555_v11 = vsub.f32 %v3749_v63, %v3701_v32  ;;  %v621_v15 = vpack.c.bf16 %v3749_v63, %v3743_v59 }
 0x3ae   :  { %5609 = vst [vmem:[#allocation21_spill] sm:$0xff] %v3751_v4  ;;  %v3757_v12 = vpop.eup %3057  ;;  %v568_v18 = vmul.f32 %v3751_v4, %v3751_v4  ;;  %v552_v20 = vsub.f32 %v3751_v4, %v3703_v33 }
 0x3af   :  { %5610 = vst [vmem:[#allocation22_spill] sm:$0xff] %v3757_v12  ;;  %578 = vadd.xlane.f32.xlu1 %v571_v5  ;;  %564 = vadd.xlane.f32.xlu0 %v558_v6  ;;  %v620_v13 = vpack.c.bf16 %v3757_v12, %v3751_v4  ;;  %v559_v17 = vmul.f32 %v555_v11, %v555_v11 }
 0x3b0   :  { %v569_v21 = vmul.f32 %v3757_v12, %v3757_v12  ;;  %v556_v23 = vmul.f32 %v552_v20, %v552_v20  ;;  %v553_v24 = vsub.f32 %v3757_v12, %v3709_v38 }
 0x3b1   :  { %2745 = vmatprep.mubr.bf16.mxu0 %v620_v13 }
 0x3b2   :  { %2746 = vmatmul.mubr.bf16.vlgmr.msra.gmra.mxu0 %v621_v15  ;;  %v557_v25 = vmul.f32 %v553_v24, %v553_v24 }
 0x3b3   :  { %566 = vadd.xlane.f32.xlu1 %v559_v17  ;;  %572 = vadd.xlane.f32.xlu0 %v568_v18 }
 0x3b4   :  { %2770 = vmatpush3.bf16.msra.mxu0 %v3517_v0 }
 0x3b5   :  { %2771 = vmatprep.subr.bf16.mxu0 %v3519_v1 }
 0x3b7   :  { %574 = vadd.xlane.f32.xlu1 %v569_v21  ;;  %560 = vadd.xlane.f32.xlu0 %v556_v23 }
 0x3b8   :  { %2772 = vmatpush3.bf16.msra.mxu0 %v3519_v1 }
 0x3b9   :  { %2773 = vmatprep.subr.bf16.mxu0 %v3526_v2 }
 0x3bb   :  { %562 = vadd.xlane.f32.xlu1 %v557_v25 }
 0x3bc   :  { %2774 = vmatpush3.bf16.msra.mxu0 %v3526_v2 }
 0x3bd   :  { %2775 = vmatprep.subr.bf16.mxu0 %v3532_v3 }
 0x3c0   :  { %2776 = vmatpush3.bf16.msra.mxu0 %v3532_v3 }
 0x3c1   :  { %2777 = vmatprep.subr.bf16.mxu0 %v3543_v7 }
 0x3c4   :  { %2778 = vmatpush3.bf16.msra.mxu0 %v3543_v7 }
 0x3c5   :  { %2779 = vmatprep.subr.bf16.mxu0 %v3549_v8 }
 0x3c8   :  { %2780 = vmatpush3.bf16.msra.mxu0 %v3549_v8 }
 0x3c9   :  { %2781 = vmatprep.subr.bf16.mxu0 %v3555_v9 }
 0x3cc   :  { %2782 = vmatpush3.bf16.msra.mxu0 %v3555_v9 }
 0x3cd   :  { %2783 = vmatprep.subr.bf16.mxu0 %v3561_v10 }
 0x3d0   :  { %2784 = vmatpush3.bf16.msra.mxu0 %v3561_v10 }
 0x3d1   :  { %2809 = vmatprep.subr.bf16.mxu0 %v3517_v0 }
 0x472   :  { %v2747_v28 = vpop.f32.mrf.mxu0 }
 0x473   :  { %v665_v30 = vadd.f32 %v2747_v28, %v3589_v14 }
 0x474   :  { %v656_v35 = vpop.f32.mrf.mxu0 }
 0x475   :  { %3059 = vtanh.f32 %v665_v30  ;;  %v657_v36 = vadd.f32 %v656_v35, %v3591_v16 }
 0x476   :  { %v2748_v37 = vpop.f32.mrf.mxu0 }
 0x477   :  { %v668_v39 = vadd.f32 %v2748_v37, %v3594_v19 }
 0x478   :  { %v659_v40 = vpop.f32.mrf.mxu0 }
 0x479   :  { %3061 = vtanh.f32 %v668_v39  ;;  %v660_v41 = vadd.f32 %v659_v40, %v3597_v22 }
 0x47a   :  { %3063 = vtanh.f32 %v657_v36 }
 0x47b   :  { %3065 = vtanh.f32 %v660_v41 }
 0x482   :  { %v3791_v42 = vpop.eup %3059 }
 0x483   :  { %v693_v43 = vmul.f32 %v3791_v42, %v3791_v42  ;;  %v677_v44 = vsub.f32 %v3791_v42, %v3743_v59 }
 0x485   :  { %699 = vadd.xlane.f32.xlu0 %v693_v43  ;;  %v681_v48 = vmul.f32 %v677_v44, %v677_v44 }
 0x486   :  { %v3797_v45 = vpop.eup %3061 }
 0x487   :  { %5611 = vst [vmem:[#allocation23_spill] sm:$0xff] %v3797_v45  ;;  %v3799_v46 = vpop.eup %3063  ;;  %v694_v47 = vmul.f32 %v3797_v45, %v3797_v45  ;;  %v678_v49 = vsub.f32 %v3797_v45, %v3749_v63  ;;  %v744_v53 = vpack.c.bf16 %v3797_v45, %v3791_v42 }
 0x488   :  { %5612 = vst [vmem:[#allocation24_spill] sm:$0xff] %v3799_v46  ;;  %v3805_v50 = vpop.eup %3065  ;;  %v691_v57 = vmul.f32 %v3799_v46, %v3799_v46  ;;  %v675_v58 = vsub.f32 %v3799_v46, %v3751_v4 }
 0x489   :  { %5613 = vst [vmem:[#allocation25_spill] sm:$0xff] %v3805_v50  ;;  %701 = vadd.xlane.f32.xlu1 %v694_v47  ;;  %687 = vadd.xlane.f32.xlu0 %v681_v48  ;;  %v743_v51 = vpack.c.bf16 %v3805_v50, %v3799_v46  ;;  %v682_v54 = vmul.f32 %v678_v49, %v678_v49 }
 0x48a   :  { %v692_v61 = vmul.f32 %v3805_v50, %v3805_v50  ;;  %v679_v62 = vmul.f32 %v675_v58, %v675_v58  ;;  %v676_v5 = vsub.f32 %v3805_v50, %v3757_v12 }
 0x48b   :  { %2765 = vmatprep.mubr.bf16.mxu1 %v743_v51 }
 0x48c   :  { %2766 = vmatmul.mubr.bf16.vlgmr.msra.gmra.mxu1 %v744_v53  ;;  %v680_v6 = vmul.f32 %v676_v5, %v676_v5 }
 0x48d   :  { %689 = vadd.xlane.f32.xlu1 %v682_v54  ;;  %695 = vadd.xlane.f32.xlu0 %v691_v57 }
 0x48e   :  { %2790 = vmatpush3.bf16.msra.mxu1 %v3517_v0 }
 0x48f   :  { %2791 = vmatprep.subr.bf16.mxu1 %v3519_v1 }
 0x491   :  { %697 = vadd.xlane.f32.xlu1 %v692_v61  ;;  %683 = vadd.xlane.f32.xlu0 %v679_v62 }
 0x492   :  { %2792 = vmatpush3.bf16.msra.mxu1 %v3519_v1 }
 0x493   :  { %2793 = vmatprep.subr.bf16.mxu1 %v3526_v2 }
 0x495   :  { %685 = vadd.xlane.f32.xlu1 %v680_v6 }
 0x496   :  { %2794 = vmatpush3.bf16.msra.mxu1 %v3526_v2 }
 0x497   :  { %2795 = vmatprep.subr.bf16.mxu1 %v3532_v3 }
 0x49a   :  { %2796 = vmatpush3.bf16.msra.mxu1 %v3532_v3 }
 0x49b   :  { %2797 = vmatprep.subr.bf16.mxu1 %v3543_v7 }
 0x49e   :  { %2798 = vmatpush3.bf16.msra.mxu1 %v3543_v7 }
 0x49f   :  { %2799 = vmatprep.subr.bf16.mxu1 %v3549_v8 }
 0x4a2   :  { %2800 = vmatpush3.bf16.msra.mxu1 %v3549_v8 }
 0x4a3   :  { %2801 = vmatprep.subr.bf16.mxu1 %v3555_v9 }
 0x4a6   :  { %2802 = vmatpush3.bf16.msra.mxu1 %v3555_v9 }
 0x4a7   :  { %2803 = vmatprep.subr.bf16.mxu1 %v3561_v10 }
 0x4aa   :  { %2804 = vmatpush3.bf16.msra.mxu1 %v3561_v10 }
 0x4ab   :  { %2829 = vmatprep.subr.bf16.mxu1 %v3517_v0 }
 0x54c   :  { %v2767_v11 = vpop.f32.mrf.mxu1 }
 0x54d   :  { %v788_v13 = vadd.f32 %v2767_v11, %v3589_v14 }
 0x54e   :  { %v779_v15 = vpop.f32.mrf.mxu1 }
 0x54f   :  { %3067 = vtanh.f32 %v788_v13  ;;  %v780_v17 = vadd.f32 %v779_v15, %v3591_v16 }
 0x550   :  { %v2768_v18 = vpop.f32.mrf.mxu1 }
 0x551   :  { %v791_v20 = vadd.f32 %v2768_v18, %v3594_v19 }
 0x552   :  { %v782_v21 = vpop.f32.mrf.mxu1 }
 0x553   :  { %3069 = vtanh.f32 %v791_v20  ;;  %v783_v23 = vadd.f32 %v782_v21, %v3597_v22 }
 0x554   :  { %3071 = vtanh.f32 %v780_v17 }
 0x555   :  { %3073 = vtanh.f32 %v783_v23 }
 0x55c   :  { %v3839_v24 = vpop.eup %3067 }
 0x55d   :  { %5614 = vst [vmem:[#allocation26_spill] sm:$0xff] %v3839_v24  ;;  %v816_v25 = vmul.f32 %v3839_v24, %v3839_v24  ;;  %v800_v28 = vsub.f32 %v3839_v24, %v3791_v42 }
 0x55f   :  { %822 = vadd.xlane.f32.xlu0 %v816_v25  ;;  %v804_v37 = vmul.f32 %v800_v28, %v800_v28 }
 0x560   :  { %v3845_v30 = vpop.eup %3069 }
 0x561   :  { %5615 = vst [vmem:[#allocation27_spill] sm:$0xff] %v3845_v30  ;;  %v3847_v35 = vpop.eup %3071  ;;  %v817_v36 = vmul.f32 %v3845_v30, %v3845_v30  ;;  %v801_v39 = vsub.f32 %v3845_v30, %v3797_v45  ;;  %v867_v43 = vpack.c.bf16 %v3845_v30, %v3839_v24 }
 0x562   :  { %5616 = vst [vmem:[#allocation28_spill] sm:$0xff] %v3847_v35  ;;  %v3853_v40 = vpop.eup %3073  ;;  %v814_v47 = vmul.f32 %v3847_v35, %v3847_v35  ;;  %v798_v48 = vsub.f32 %v3847_v35, %v3799_v46 }
 0x563   :  { %5617 = vst [vmem:[#allocation29_spill] sm:$0xff] %v3853_v40  ;;  %824 = vadd.xlane.f32.xlu1 %v817_v36  ;;  %810 = vadd.xlane.f32.xlu0 %v804_v37  ;;  %v866_v41 = vpack.c.bf16 %v3853_v40, %v3847_v35  ;;  %v805_v44 = vmul.f32 %v801_v39, %v801_v39  ;;  %v3905_v39 = vpop.xlane.xlu0 %211 }
 0x564   :  { %v815_v49 = vmul.f32 %v3853_v40, %v3853_v40  ;;  %v802_v51 = vmul.f32 %v798_v48, %v798_v48  ;;  %v799_v53 = vsub.f32 %v3853_v40, %v3805_v50  ;;  %v3913_v48 = vpop.xlane.xlu1 %199 }
 0x565   :  { %2785 = vmatprep.mubr.bf16.mxu0 %v866_v41  ;;  %vm229_vm0 = vcmp.lt.f32.partialorder %v3913_v48, 1e+20 }
 0x566   :  { %2786 = vmatmul.mubr.bf16.vlgmr.msra.gmra.mxu0 %v867_v43  ;;  %v803_v54 = vmul.f32 %v799_v53, %v799_v53 }
 0x567   :  { %812 = vadd.xlane.f32.xlu1 %v805_v44  ;;  %818 = vadd.xlane.f32.xlu0 %v814_v47 }
 0x568   :  { %2810 = vmatpush3.bf16.msra.mxu0 %v3517_v0 }
 0x569   :  { %2811 = vmatprep.subr.bf16.mxu0 %v3519_v1 }
 0x56b   :  { %820 = vadd.xlane.f32.xlu1 %v815_v49  ;;  %806 = vadd.xlane.f32.xlu0 %v802_v51 }
 0x56c   :  { %2812 = vmatpush3.bf16.msra.mxu0 %v3519_v1 }
 0x56d   :  { %2813 = vmatprep.subr.bf16.mxu0 %v3526_v2 }
 0x56f   :  { %808 = vadd.xlane.f32.xlu1 %v803_v54  ;;  %v3921_v54 = vpop.xlane.xlu0 %207 }
 0x570   :  { %2814 = vmatpush3.bf16.msra.mxu0 %v3526_v2 }
 0x571   :  { %2815 = vmatprep.subr.bf16.mxu0 %v3532_v3 }
 0x574   :  { %2816 = vmatpush3.bf16.msra.mxu0 %v3532_v3 }
 0x575   :  { %2817 = vmatprep.subr.bf16.mxu0 %v3543_v7 }
 0x578   :  { %2818 = vmatpush3.bf16.msra.mxu0 %v3543_v7 }
 0x579   :  { %2819 = vmatprep.subr.bf16.mxu0 %v3549_v8 }
 0x57c   :  { %2820 = vmatpush3.bf16.msra.mxu0 %v3549_v8 }
 0x57d   :  { %2821 = vmatprep.subr.bf16.mxu0 %v3555_v9 }
 0x580   :  { %2822 = vmatpush3.bf16.msra.mxu0 %v3555_v9 }
 0x581   :  { %2823 = vmatprep.subr.bf16.mxu0 %v3561_v10 }
 0x584   :  { %2824 = vmatpush3.bf16.msra.mxu0 %v3561_v10 }
 0x585   :  { %2849 = vmatprep.subr.bf16.mxu0 %v3517_v0 }
 0x626   :  { %v2787_v57 = vpop.f32.mrf.mxu0 }
 0x627   :  { %v911_v58 = vadd.f32 %v2787_v57, %v3589_v14 }
 0x628   :  { %v902_v61 = vpop.f32.mrf.mxu0 }
 0x629   :  { %3075 = vtanh.f32 %v911_v58  ;;  %v903_v62 = vadd.f32 %v902_v61, %v3591_v16  ;;  %v3925_v58 = vpop.xlane.xlu1 %213  ;;  %v3927_v61 = vpop.xlane.xlu0 %195 }
 0x62a   :  { %v2788_v5 = vpop.f32.mrf.mxu0 }
 0x62b   :  { %v914_v6 = vadd.f32 %v2788_v5, %v3594_v19 }
 0x62c   :  { %v905_v11 = vpop.f32.mrf.mxu0 }
 0x62d   :  { %3077 = vtanh.f32 %v914_v6  ;;  %v906_v13 = vadd.f32 %v905_v11, %v3597_v22  ;;  %v3935_v5 = vpop.xlane.xlu0 %197 }
 0x62e   :  { %3079 = vtanh.f32 %v903_v62  ;;  %v3931_v62 = vpop.xlane.xlu1 %201  ;;  %5620 = vst [vmem:[#allocation32_spill] sm:$0xff] %v3935_v5 }
 0x62f   :  { %3081 = vtanh.f32 %v906_v13  ;;  %vm230_vm1 = vcmp.lt.f32.partialorder %v3931_v62, 1e+20 }
 0x631   :  { %v3941_v6 = vpop.xlane.xlu0 %330 }
 0x635   :  { %v3947_v11 = vpop.xlane.xlu0 %318 }
 0x636   :  { %v3887_v15 = vpop.eup %3075 }
 0x637   :  { %v939_v17 = vmul.f32 %v3887_v15, %v3887_v15  ;;  %v923_v18 = vsub.f32 %v3887_v15, %v3839_v24 }
 0x639   :  { %945 = vadd.xlane.f32.xlu0 %v939_v17  ;;  %v927_v25 = vmul.f32 %v923_v18, %v923_v18 }
 0x63a   :  { %v3893_v20 = vpop.eup %3077 }
 0x63b   :  { %v3895_v21 = vpop.eup %3079  ;;  %v940_v23 = vmul.f32 %v3893_v20, %v3893_v20  ;;  %v924_v28 = vsub.f32 %v3893_v20, %v3845_v30  ;;  %v990_v41 = vpack.c.bf16 %v3893_v20, %v3887_v15 }
 0x63c   :  { %5618 = vst [vmem:[#allocation30_spill] sm:$0xff] %v3895_v21  ;;  %v3901_v36 = vpop.eup %3081  ;;  %v937_v44 = vmul.f32 %v3895_v21, %v3895_v21  ;;  %v921_v47 = vsub.f32 %v3895_v21, %v3847_v35 }
 0x63d   :  { %5619 = vst [vmem:[#allocation31_spill] sm:$0xff] %v3901_v36  ;;  %947 = vadd.xlane.f32.xlu1 %v940_v23  ;;  %933 = vadd.xlane.f32.xlu0 %v927_v25  ;;  %v989_v37 = vpack.c.bf16 %v3901_v36, %v3895_v21  ;;  %v928_v43 = vmul.f32 %v924_v28, %v924_v28 }
 0x63e   :  { %v938_v49 = vmul.f32 %v3901_v36, %v3901_v36  ;;  %v925_v51 = vmul.f32 %v921_v47, %v921_v47  ;;  %v922_v53 = vsub.f32 %v3901_v36, %v3853_v40 }
 0x63f   :  { %2805 = vmatprep.mubr.bf16.mxu1 %v989_v37 }
 0x640   :  { %2806 = vmatmul.mubr.bf16.vlgmr.msra.gmra.mxu1 %v990_v41  ;;  %v926_v57 = vmul.f32 %v922_v53, %v922_v53 }
 0x641   :  { %935 = vadd.xlane.f32.xlu1 %v928_v43  ;;  %941 = vadd.xlane.f32.xlu0 %v937_v44 }
 0x642   :  { %2830 = vmatpush3.bf16.msra.mxu1 %v3517_v0 }
 0x643   :  { %2831 = vmatprep.subr.bf16.mxu1 %v3519_v1 }
 0x645   :  { %943 = vadd.xlane.f32.xlu1 %v938_v49  ;;  %929 = vadd.xlane.f32.xlu0 %v925_v51 }
 0x646   :  { %2832 = vmatpush3.bf16.msra.mxu1 %v3519_v1  ;;  %v3939_v1 = vpop.xlane.xlu1 %209 }
 0x647   :  { %2833 = vmatprep.subr.bf16.mxu1 %v3526_v2 }
 0x649   :  { %931 = vadd.xlane.f32.xlu1 %v926_v57 }
 0x64a   :  { %2834 = vmatpush3.bf16.msra.mxu1 %v3526_v2  ;;  %v3945_v2 = vpop.xlane.xlu1 %332 }
 0x64b   :  { %2835 = vmatprep.subr.bf16.mxu1 %v3532_v3 }
 0x64e   :  { %2836 = vmatpush3.bf16.msra.mxu1 %v3532_v3  ;;  %v3951_v3 = vpop.xlane.xlu1 %320 }
 0x64f   :  { %2837 = vmatprep.subr.bf16.mxu1 %v3543_v7 }
 0x652   :  { %2838 = vmatpush3.bf16.msra.mxu1 %v3543_v7  ;;  %v3955_v7 = vpop.xlane.xlu0 %326  ;;  %v3957_v13 = vpop.xlane.xlu1 %328 }
 0x653   :  { %2839 = vmatprep.subr.bf16.mxu1 %v3549_v8 }
 0x656   :  { %2840 = vmatpush3.bf16.msra.mxu1 %v3549_v8  ;;  %v3959_v8 = vpop.xlane.xlu0 %314  ;;  %v3961_v17 = vpop.xlane.xlu1 %316 }
 0x657   :  { %2841 = vmatprep.subr.bf16.mxu1 %v3555_v9  ;;  %5621 = vst [vmem:[#allocation33_spill] sm:$0xff] %v3959_v8  ;;  %5622 = vst [vmem:[#allocation34_spill] sm:$0xff] %v3961_v17 }
 0x65a   :  { %2842 = vmatpush3.bf16.msra.mxu1 %v3555_v9  ;;  %v3963_v18 = vpop.xlane.xlu0 %453  ;;  %v3965_v23 = vpop.xlane.xlu1 %455 }
 0x65b   :  { %2843 = vmatprep.subr.bf16.mxu1 %v3561_v10 }
 0x65e   :  { %2844 = vmatpush3.bf16.msra.mxu1 %v3561_v10  ;;  %v3967_v9 = vpop.xlane.xlu0 %441  ;;  %v3969_v25 = vpop.xlane.xlu1 %443 }
 0x65f   :  { %2869 = vmatprep.subr.bf16.mxu1 %v3517_v0 }
 0x662   :  { %v3971_v28 = vpop.xlane.xlu0 %449  ;;  %v3973_v10 = vpop.xlane.xlu1 %451 }
 0x666   :  { %v3975_v0 = vpop.xlane.xlu0 %437  ;;  %v3977_v37 = vpop.xlane.xlu1 %439 }
 0x667   :  { %5623 = vst [vmem:[#allocation35_spill] sm:$0xff] %v3975_v0  ;;  %5624 = vst [vmem:[#allocation36_spill] sm:$0xff] %v3977_v37 }
 0x66a   :  { %v3979_v41 = vpop.xlane.xlu0 %576  ;;  %v3981_v43 = vpop.xlane.xlu1 %578 }
 0x66e   :  { %v3983_v44 = vpop.xlane.xlu0 %564  ;;  %v3985_v47 = vpop.xlane.xlu1 %566 }
 0x672   :  { %v3987_v49 = vpop.xlane.xlu0 %572  ;;  %v3989_v51 = vpop.xlane.xlu1 %574 }
 0x676   :  { %v3991_v53 = vpop.xlane.xlu0 %560  ;;  %v3993_v57 = vpop.xlane.xlu1 %562 }
 0x677   :  { %5625 = vst [vmem:[#allocation37_spill] sm:$0xff] %v3991_v53  ;;  %5626 = vst [vmem:[#allocation38_spill] sm:$0xff] %v3993_v57 }
 0x67a   :  { %v3995_v40 = vpop.xlane.xlu0 %699  ;;  %v3997_v50 = vpop.xlane.xlu1 %701 }
 0x67e   :  { %v3999_v35 = vpop.xlane.xlu0 %687  ;;  %v4001_v46 = vpop.xlane.xlu1 %689 }
 0x682   :  { %v4003_v12 = vpop.xlane.xlu0 %695  ;;  %v4005_v4 = vpop.xlane.xlu1 %697 }
 0x686   :  { %v4007_v38 = vpop.xlane.xlu0 %683  ;;  %v4009_v33 = vpop.xlane.xlu1 %685 }
 0x687   :  { %5627 = vst [vmem:[#allocation39_spill] sm:$0xff] %v4007_v38  ;;  %5628 = vst [vmem:[#allocation40_spill] sm:$0xff] %v4009_v33 }
 0x68a   :  { %v4011_v60 = vpop.xlane.xlu0 %822  ;;  %v4013_v56 = vpop.xlane.xlu1 %824 }
 0x68e   :  { %v4015_v34 = vpop.xlane.xlu0 %810  ;;  %v4017_v29 = vpop.xlane.xlu1 %812 }
 0x68f   :  { %5629 = vst [vmem:[#allocation41_spill] sm:$0xff] %v4015_v34  ;;  %5630 = vst [vmem:[#allocation42_spill] sm:$0xff] %v4017_v29 }
 0x692   :  { %v4019_v57 = vpop.xlane.xlu0 %818  ;;  %v4021_v37 = vpop.xlane.xlu1 %820 }
 0x693   :  { %5631 = vst [vmem:[#allocation43_spill] sm:$0xff] %v4021_v37 }
 0x696   :  { %v4023_v53 = vpop.xlane.xlu0 %806  ;;  %v4025_v17 = vpop.xlane.xlu1 %808 }
 0x697   :  { %5632 = vst [vmem:[#allocation44_spill] sm:$0xff] %v4023_v53  ;;  %5633 = vst [vmem:[#allocation45_spill] sm:$0xff] %v4025_v17 }
 0x6c2   :  { %v946_v0 = vpop.xlane.xlu0 %945 }
 0x6c3   :  { %v951_v38 = vadd.f32 1e-18, %v946_v0 }
 0x6c5   :  { %3083 = vrcp.f32 %v951_v38 }
 0x6c6   :  { %v948_v33 = vpop.xlane.xlu1 %947  ;;  %v4027_v30 = vpop.xlane.xlu0 %933 }
 0x6c7   :  { %v952_v5 = vadd.f32 1e-18, %v948_v33 }
 0x6c9   :  { %3085 = vrcp.f32 %v952_v5 }
 0x6ca   :  { %v4032_v45 = vpop.xlane.xlu1 %935 }
 0x6d2   :  { %v3084_v8 = vpop.eup %3083 }
 0x6d3   :  { %v4030_v24 = vmul.f32 %v3084_v8, %v4027_v30 }
 0x6d5   :  { %5634 = vst [vmem:[#allocation46_spill] sm:$0xff] %v4030_v24 }
 0x6d6   :  { %v3086_v29 = vpop.eup %3085 }
 0x6d7   :  { %v4035_v37 = vmul.f32 %v3086_v29, %v4032_v45 }
 0x700   :  { %v2807_v53 = vpop.f32.mrf.mxu1 }
 0x701   :  { %v1034_v17 = vadd.f32 %v2807_v53, %v3589_v14 }
 0x702   :  { %v1025_v0 = vpop.f32.mrf.mxu1 }
 0x703   :  { %3087 = vtanh.f32 %v1034_v17  ;;  %v1026_v33 = vadd.f32 %v1025_v0, %v3591_v16 }
 0x704   :  { %v2808_v38 = vpop.f32.mrf.mxu1 }
 0x705   :  { %v1037_v5 = vadd.f32 %v2808_v38, %v3594_v19 }
 0x706   :  { %v1028_v34 = vpop.f32.mrf.mxu1 }
 0x707   :  { %3089 = vtanh.f32 %v1037_v5  ;;  %v1029_v8 = vadd.f32 %v1028_v34, %v3597_v22 }
 0x708   :  { %3091 = vtanh.f32 %v1026_v33 }
 0x709   :  { %3093 = vtanh.f32 %v1029_v8 }
 0x710   :  { %v4041_v24 = vpop.eup %3087 }
 0x711   :  { %v1062_v29 = vmul.f32 %v4041_v24, %v4041_v24  ;;  %v1046_v14 = vsub.f32 %v4041_v24, %v3887_v15 }
 0x713   :  { %1068 = vadd.xlane.f32.xlu0 %v1062_v29  ;;  %v1050_v53 = vmul.f32 %v1046_v14, %v1046_v14  ;;  %v4065_v29 = vld [vmem:[#allocation5 + $0x38] sm:$0xff]  }
 0x714   :  { %v4047_v17 = vpop.eup %3089 }
 0x715   :  { %v4049_v16 = vpop.eup %3091  ;;  %v1063_v19 = vmul.f32 %v4047_v17, %v4047_v17  ;;  %v1047_v22 = vsub.f32 %v4047_v17, %v3893_v20  ;;  %v1113_v33 = vpack.c.bf16 %v4047_v17, %v4041_v24 }
 0x716   :  { %v4055_v34 = vpop.eup %3093  ;;  %v1060_v5 = vmul.f32 %v4049_v16, %v4049_v16  ;;  %v1044_v8 = vsub.f32 %v4049_v16, %v3895_v21  ;;  %v215_v21 = vadd.f32 1e-18, %v3921_v54 }
 0x717   :  { %1070 = vadd.xlane.f32.xlu1 %v1063_v19  ;;  %1056 = vadd.xlane.f32.xlu0 %v1050_v53  ;;  %v1112_v0 = vpack.c.bf16 %v4055_v34, %v4049_v16  ;;  %v1051_v38 = vmul.f32 %v1047_v22, %v1047_v22  ;;  %v1061_v14 = vmul.f32 %v4055_v34, %v4055_v34  ;;  %v4072_v22 = vld [vmem:[#allocation5 + $0x30] sm:$0xff]  }
 0x718   :  { %v1048_v19 = vmul.f32 %v1044_v8, %v1044_v8  ;;  %v1045_v53 = vsub.f32 %v4055_v34, %v3901_v36  ;;  %5635 = vst [vmem:[#allocation47_spill] sm:$0xff] %v4072_v22  ;;  %v4088_v8 = vld [vmem:[#allocation5 + $0x10] sm:$0xff]   ;;  %v336_v36 = vadd.f32 1e-18, %v3941_v6  ;;  %v245_v6 = vmin.f32 %v3913_v48, 1e+20 }
 0x719   :  { %2825 = vmatprep.mubr.bf16.mxu0 %v1112_v0  ;;  %5639 = vst [vmem:[#allocation51_spill] sm:$0xff] %v4088_v8 }
 0x71a   :  { %2826 = vmatmul.mubr.bf16.vlgmr.msra.gmra.mxu0 %v1113_v33  ;;  %v1049_v0 = vmul.f32 %v1045_v53, %v1045_v53  ;;  %v4076_v33 = vld [vmem:[#allocation5 + $0x28] sm:$0xff]   ;;  %v217_v53 = vadd.f32 1e-18, %v3905_v39  ;;  %v582_v39 = vadd.f32 1e-18, %v3979_v41  ;;  %vm4120_vm2 = vcmp.lt.f32.partialorder %v3947_v11, %v245_v6 }
 0x71b   :  { %1058 = vadd.xlane.f32.xlu1 %v1051_v38  ;;  %1064 = vadd.xlane.f32.xlu0 %v1060_v5  ;;  %5636 = vst [vmem:[#allocation48_spill] sm:$0xff] %v4076_v33  ;;  %v4080_v38 = vld [vmem:[#allocation5 + $0x20] sm:$0xff]   ;;  %v4084_v5 = vld [vmem:[#allocation5 + $0x18] sm:$0xff]  }
 0x71c   :  { %2850 = vmatpush3.bf16.msra.mxu0 %v4065_v29  ;;  %5637 = vst [vmem:[#allocation49_spill] sm:$0xff] %v4080_v38  ;;  %5638 = vst [vmem:[#allocation50_spill] sm:$0xff] %v4084_v5  ;;  %3095 = vrcp.f32 %v217_v53 }
 0x71d   :  { %2851 = vmatprep.subr.bf16.mxu0 %v4072_v22 }
 0x71f   :  { %1066 = vadd.xlane.f32.xlu1 %v1061_v14  ;;  %1052 = vadd.xlane.f32.xlu0 %v1048_v19  ;;  %v4092_v14 = vld [vmem:[#allocation5 + $0x8] sm:$0xff]   ;;  %v4096_v19 = vld [vmem:[#allocation5] sm:$0xff]  }
 0x720   :  { %2852 = vmatpush3.bf16.msra.mxu0 %v4072_v22  ;;  %5640 = vst [vmem:[#allocation52_spill] sm:$0xff] %v4092_v14  ;;  %5641 = vst [vmem:[#allocation53_spill] sm:$0xff] %v4096_v19 }
 0x721   :  { %2853 = vmatprep.subr.bf16.mxu0 %v4076_v33 }
 0x723   :  { %1054 = vadd.xlane.f32.xlu1 %v1049_v0  ;;  %v218_v0 = vadd.f32 1e-18, %v3925_v58 }
 0x724   :  { %2854 = vmatpush3.bf16.msra.mxu0 %v4076_v33 }
 0x725   :  { %2855 = vmatprep.subr.bf16.mxu0 %v4080_v38  ;;  %3097 = vrcp.f32 %v218_v0  ;;  %v334_v0 = vadd.f32 1e-18, %v3955_v7 }
 0x726   :  { %3099 = vrcp.f32 %v336_v36  ;;  %v216_v36 = vadd.f32 1e-18, %v3939_v1 }
 0x727   :  { %3101 = vrcp.f32 %v215_v21 }
 0x728   :  { %2856 = vmatpush3.bf16.msra.mxu0 %v4080_v38 }
 0x729   :  { %2857 = vmatprep.subr.bf16.mxu0 %v4084_v5 }
 0x72c   :  { %2858 = vmatpush3.bf16.msra.mxu0 %v4084_v5 }
 0x72d   :  { %2859 = vmatprep.subr.bf16.mxu0 %v4088_v8 }
 0x730   :  { %2860 = vmatpush3.bf16.msra.mxu0 %v4088_v8  ;;  %v459_v8 = vadd.f32 1e-18, %v3963_v18 }
 0x731   :  { %2861 = vmatprep.subr.bf16.mxu0 %v4092_v14 }
 0x734   :  { %2862 = vmatpush3.bf16.msra.mxu0 %v4092_v14  ;;  %v337_v14 = vadd.f32 1e-18, %v3945_v2  ;;  %v246_v2 = vmin.f32 %v3931_v62, 1e+20 }
 0x735   :  { %2863 = vmatprep.subr.bf16.mxu0 %v4096_v19 }
 0x736   :  { %3103 = vrcp.f32 %v337_v14  ;;  %v3339_v14 = vld [vmem:[#allocation2 + $0x10] sm:$0xff]  ;;  %vm4127_vm3 = vcmp.lt.f32.partialorder %v3951_v3, %v246_v2 }
 0x737   :  { %3105 = vrcp.f32 %v459_v8  ;;  %v5561_v8 = vmov 0   ;;  %v241_v53 = vsel %vm229_vm0, %v3601_v26, %v3339_v14  ;;  %v335_v14 = vadd.f32 1e-18, %v3957_v13 }
 0x738   :  { %2864 = vmatpush3.bf16.msra.mxu0 %v4096_v19  ;;  %v3096_v19 = vpop.eup %3095  ;;  %v233_v41 = vsel %vm229_vm0, 1, %v5561_v8  ;;  %3107 = vrcp.f32 %v582_v39  ;;  %v234_v1 = vsel %vm230_vm1, 1, %v5561_v8 }
 0x739   :  { %2889 = vmatprep.subr.bf16.mxu0 %v4065_v29  ;;  %v3098_v5 = vpop.eup %3097  ;;  %v225_v58 = vmul.f32 %v3096_v19, %v3913_v48  ;;  %v3340_v19 = vld [vmem:[#allocation2 + $0x18] sm:$0xff]  ;;  %3109 = vrcp.f32 %v216_v36  ;;  %v364_v7 = vsel %vm4120_vm2, 2, %v233_v41  ;;  %v460_v36 = vadd.f32 1e-18, %v3965_v23  ;;  %v944_v48 = vpop.xlane.xlu1 %943 }
 0x73a   :  { %v3100_v54 = vpop.eup %3099  ;;  %v4114_v21 = vmul.f32 %v3098_v5, %v3931_v62  ;;  %v242_v5 = vsel %vm230_vm1, %v3608_v31, %v3340_v19  ;;  %v360_v31 = vsel %vm4120_vm2, %v3647_v52, %v241_v53  ;;  %v368_v19 = vmin.f32 %v245_v6, %v3947_v11 }
 0x73b   :  { %v3102_v18 = vpop.eup %3101  ;;  %v249_v38 = vmin.f32 %v225_v58, 1e+20  ;;  %v344_v26 = vmul.f32 %v3100_v54, %v3947_v11  ;;  %v361_v13 = vsel %vm4127_vm3, %v3653_v55, %v242_v5  ;;  %v369_v58 = vmin.f32 %v246_v2, %v3951_v3 }
 0x73c   :  { %v4135_v39 = vmul.f32 %v3102_v18, %v3927_v61  ;;  %v250_v8 = vmin.f32 %v4114_v21, 1e+20  ;;  %v365_v54 = vsel %vm4127_vm3, 2, %v234_v1  ;;  %3111 = vrcp.f32 %v334_v0 }
 0x73d   :  { %vm471_vm4 = vcmp.lt.f32.partialorder %v3967_v9, %v368_v19  ;;  %v457_v52 = vadd.f32 1e-18, %v3971_v28  ;;  %v4153_v11 = vmin.f32 %v249_v38, %v344_v26  ;;  %3113 = vrcp.f32 %v335_v14 }
 0x73e   :  { %v705_v55 = vadd.f32 1e-18, %v3995_v40  ;;  %v491_v23 = vmin.f32 %v368_v19, %v3967_v9  ;;  %vm472_vm5 = vcmp.lt.f32.partialorder %v3969_v25, %v369_v58  ;;  %v458_v18 = vadd.f32 1e-18, %v3973_v10  ;;  %v5646_v19 = vld [vmem:[#allocation41_spill] sm:$0xff] }
 0x73f   :  { %3115 = vrcp.f32 %v460_v36  ;;  %v483_v28 = vsel %vm471_vm4, %v3695_v27, %v360_v31  ;;  %v487_v38 = vsel %vm471_vm4, 3, %v364_v7  ;;  %v583_v41 = vadd.f32 1e-18, %v3981_v43  ;;  %v4211_v36 = vpop.xlane.xlu1 %931 }
 0x740   :  { %3117 = vrcp.f32 %v457_v52  ;;  %vm594_vm6 = vcmp.lt.f32.partialorder %v3983_v44, %v491_v23  ;;  %v828_v40 = vadd.f32 1e-18, %v4011_v60  ;;  %v580_v53 = vadd.f32 1e-18, %v3987_v49  ;;  %v5647_v52 = vld [vmem:[#allocation23_spill] sm:$0xff] }
 0x741   :  { %3119 = vrcp.f32 %v705_v55  ;;  %v706_v10 = vadd.f32 1e-18, %v3997_v50  ;;  %v606_v43 = vsel %vm594_vm6, %v3743_v59, %v483_v28  ;;  %v614_v60 = vmin.f32 %v491_v23, %v3983_v44  ;;  %v5648_v23 = vld [vmem:[#allocation43_spill] sm:$0xff]  ;;  %v5649_v28 = vld [vmem:[#allocation26_spill] sm:$0xff] }
 0x742   :  { %3121 = vrcp.f32 %v458_v18  ;;  %v610_v1 = vsel %vm594_vm6, 4, %v487_v38  ;;  %v829_v62 = vadd.f32 1e-18, %v4013_v56  ;;  %v703_v59 = vadd.f32 1e-18, %v4003_v12 }
 0x743   :  { %v3104_v33 = vpop.eup %3103  ;;  %3123 = vrcp.f32 %v583_v41  ;;  %vm717_vm8 = vcmp.lt.f32.partialorder %v3999_v35, %v614_v60  ;;  %v737_v14 = vmin.f32 %v614_v60, %v3999_v35  ;;  %v704_v56 = vadd.f32 1e-18, %v4005_v4  ;;  %v5650_v41 = vld [vmem:[#allocation42_spill] sm:$0xff] }
 0x744   :  { %v3106_v22 = vpop.eup %3105  ;;  %v4156_v6 = vmul.f32 %v3104_v33, %v3951_v3  ;;  %v942_v3 = vpop.xlane.xlu0 %941  ;;  %v492_v33 = vmin.f32 %v369_v58, %v3969_v25  ;;  %3125 = vrcp.f32 %v828_v40  ;;  %v729_v12 = vsel %vm717_vm8, %v3791_v42, %v606_v43 }
 0x745   :  { %v4160_v2 = vmul.f32 %v3106_v22, %v3967_v9  ;;  %v484_v9 = vsel %vm472_vm5, %v3701_v32, %v361_v13  ;;  %v488_v22 = vsel %vm472_vm5, 3, %v365_v54  ;;  %v581_v32 = vadd.f32 1e-18, %v3989_v51  ;;  %v3108_v49 = vpop.eup %3107 }
 0x746   :  { %vm595_vm7 = vcmp.lt.f32.partialorder %v3985_v47, %v492_v33  ;;  %v615_v5 = vmin.f32 %v492_v33, %v3985_v47  ;;  %3127 = vrcp.f32 %v580_v53  ;;  %v4192_v0 = vpop.eup %3109  ;;  %v4199_v31 = vmul.f32 %v3108_v49, %v3983_v44 }
 0x747   :  { %v495_v27 = vmin.f32 %v4153_v11, %v4160_v2  ;;  %v607_v50 = vsel %vm595_vm7, %v3749_v63, %v484_v9  ;;  %v611_v26 = vsel %vm595_vm7, 4, %v488_v22  ;;  %3129 = vrcp.f32 %v706_v10 }
 0x748   :  { %v4190_v51 = vpop.xlane.xlu0 %929  ;;  %3131 = vrcp.f32 %v581_v32  ;;  %vm718_vm9 = vcmp.lt.f32.partialorder %v4001_v46, %v615_v5  ;;  %v826_v63 = vadd.f32 1e-18, %v4019_v57  ;;  %vm840_vm10 = vcmp.lt.f32.partialorder %v5646_v19, %v737_v14 }
 0x749   :  { %3133 = vrcp.f32 %v829_v62  ;;  %v860_v7 = vmin.f32 %v737_v14, %v5646_v19  ;;  %v3112_v13 = vpop.eup %3111  ;;  %v738_v4 = vmin.f32 %v615_v5, %v4001_v46  ;;  %v733_v44 = vsel %vm717_vm8, 5, %v610_v1 }
 0x74a   :  { %3135 = vrcp.f32 %v703_v59  ;;  %v949_v58 = vadd.f32 1e-18, %v942_v3  ;;  %v4213_v54 = vpop.eup %3113  ;;  %v730_v42 = vsel %vm718_vm9, %v5647_v52, %v607_v50  ;;  %v827_v18 = vadd.f32 1e-18, %v5648_v23 }
 0x74b   :  { %3137 = vrcp.f32 %v704_v56  ;;  %vm963_vm11 = vcmp.lt.f32.partialorder %v4027_v30, %v860_v7  ;;  %v852_v38 = vsel %vm840_vm10, %v5649_v28, %v729_v12  ;;  %v861_v3 = vmin.f32 %v738_v4, %v5650_v41  ;;  %v5651_v56 = vld [vmem:[#allocation27_spill] sm:$0xff] }
 0x74c   :  { %3139 = vrcp.f32 %v826_v63  ;;  %v3116_v33 = vpop.eup %3115  ;;  %vm841_vm12 = vcmp.lt.f32.partialorder %v5650_v41, %v738_v4  ;;  %v856_v40 = vsel %vm840_vm10, 6, %v733_v44  ;;  %v983_v9 = vmin.f32 %v860_v7, %v4027_v30 }
 0x74d   :  { %v3118_v22 = vpop.eup %3117  ;;  %v975_v53 = vsel %vm963_vm11, %v3887_v15, %v852_v38  ;;  %v979_v10 = vsel %vm963_vm11, 7, %v856_v40  ;;  %vm964_vm13 = vcmp.lt.f32.partialorder %v4032_v45, %v861_v3  ;;  %v950_v49 = vadd.f32 1e-18, %v944_v48  ;;  %v5654_v40 = vld [vmem:[#allocation35_spill] sm:$0xff] }
 0x74e   :  { %v3120_v32 = vpop.eup %3119  ;;  %v734_v15 = vsel %vm718_vm9, 5, %v611_v26  ;;  %v853_v48 = vsel %vm841_vm12, %v5651_v56, %v730_v42  ;;  %v984_v12 = vmin.f32 %v861_v3, %v4032_v45  ;;  %v468_v5 = vmul.f32 %v3116_v33, %v3969_v25  ;;  %v5652_v25 = vld [vmem:[#allocation33_spill] sm:$0xff] }
 0x74f   :  { %v3122_v30 = vpop.eup %3121  ;;  %v857_v63 = vsel %vm841_vm12, 6, %v734_v15  ;;  %v713_v26 = vmul.f32 %v3120_v32, %v3999_v35  ;;  %v976_v44 = vsel %vm964_vm13, %v3893_v20, %v853_v48  ;;  %v373_v35 = vmin.f32 %v250_v8, %v4156_v6  ;;  %v5653_v6 = vld [vmem:[#allocation32_spill] sm:$0xff] }
 0x750   :  { %v3124_v14 = vpop.eup %3123  ;;  %v618_v38 = vmin.f32 %v495_v27, %v4199_v31  ;;  %v247_v8 = vmin.f32 %v4135_v39, 1e+20  ;;  %v5655_v31 = vld [vmem:[#allocation34_spill] sm:$0xff] }
 0x751   :  { %v3126_v7 = vpop.eup %3125  ;;  %v591_v3 = vmul.f32 %v3124_v14, %v3985_v47 }
 0x752   :  { %v836_v33 = vmul.f32 %v3126_v7, %v5646_v19  ;;  %v741_v32 = vmin.f32 %v618_v38, %v713_v26  ;;  %v343_v19 = vmul.f32 %v4213_v54, %v5655_v31 }
 0x753   :  { %v3128_v42 = vpop.eup %3127 }
 0x754   :  { %v3130_v23 = vpop.eup %3129  ;;  %v864_v14 = vmin.f32 %v741_v32, %v836_v33 }
 0x755   :  { %v3132_v28 = vpop.eup %3131  ;;  %v714_v11 = vmul.f32 %v3130_v23, %v4001_v46  ;;  %v5658_v46 = vld [vmem:[#allocation39_spill] sm:$0xff]  ;;  %v5660_v23 = vld [vmem:[#allocation38_spill] sm:$0xff] }
 0x756   :  { %v3134_v21 = vpop.eup %3133 }
 0x79c   :  { %v1069_v57 = vpop.xlane.xlu0 %1068 }
 0x79d   :  { %v1074_v55 = vadd.f32 1e-18, %v1069_v57 }
 0x79f   :  { %3141 = vrcp.f32 %v1074_v55 }
 0x7a0   :  { %3143 = vrcp.f32 %v949_v58  ;;  %v1071_v43 = vpop.xlane.xlu1 %1070  ;;  %v4230_v60 = vpop.xlane.xlu0 %1056  ;;  %v980_v58 = vsel %vm964_vm13, 7, %v857_v63  ;;  %v5657_v63 = vld [vmem:[#allocation36_spill] sm:$0xff] }
 0x7a1   :  { %v1075_v1 = vadd.f32 1e-18, %v1071_v43  ;;  %vm1086_vm14 = vcmp.lt.f32.partialorder %v4230_v60, %v983_v9  ;;  %v4234_v62 = vmin.f32 %v983_v9, %v4230_v60  ;;  %3145 = vrcp.f32 %v827_v18 }
 0x7a2   :  { %v4239_v50 = vsel %vm1086_vm14, %v4041_v24, %v975_v53  ;;  %v4241_v59 = vsel %vm1086_vm14, 8, %v979_v10  ;;  %v342_v18 = vmul.f32 %v3112_v13, %v5652_v25  ;;  %v224_v13 = vmul.f32 %v4192_v0, %v5653_v6  ;;  %v3136_v10 = vpop.eup %3135 }
 0x7a3   :  { %3147 = vrcp.f32 %v1075_v1  ;;  %v465_v9 = vmul.f32 %v3118_v22, %v5654_v40  ;;  %v496_v43 = vmin.f32 %v373_v35, %v468_v5  ;;  %v3138_v27 = vpop.eup %3137  ;;  %v837_v0 = vmul.f32 %v3134_v21, %v5650_v41 }
 0x7a4   :  { %v1059_v57 = vpop.xlane.xlu1 %1058  ;;  %v1065_v52 = vpop.xlane.xlu0 %1064  ;;  %3149 = vrcp.f32 %v950_v49  ;;  %v370_v47 = vmin.f32 %v247_v8, %v342_v18  ;;  %v5656_v49 = vld [vmem:[#allocation37_spill] sm:$0xff]  ;;  %v248_v56 = vmin.f32 %v224_v13, 1e+20  ;;  %v711_v7 = vmul.f32 %v3136_v10, %v5658_v46  ;;  %v5661_v18 = vld [vmem:[#allocation44_spill] sm:$0xff] }
 0x7a5   :  { %vm1087_vm15 = vcmp.lt.f32.partialorder %v1059_v57, %v984_v12  ;;  %v4256_v4 = vmin.f32 %v984_v12, %v1059_v57  ;;  %v1072_v55 = vadd.f32 1e-18, %v1065_v52  ;;  %v588_v1 = vmul.f32 %v3128_v42, %v5656_v49  ;;  %v3140_v39 = vpop.eup %3139  ;;  %v5662_v8 = vld [vmem:[#allocation40_spill] sm:$0xff] }
 0x7a6   :  { %v4263_v20 = vsel %vm1087_vm15, %v4047_v17, %v976_v44  ;;  %v4265_v45 = vsel %vm1087_vm15, 8, %v980_v58  ;;  %v619_v15 = vmin.f32 %v496_v43, %v591_v3  ;;  %v493_v48 = vmin.f32 %v370_v47, %v465_v9  ;;  %v5659_v44 = vld [vmem:[#allocation46_spill] sm:$0xff] }
 0x7a7   :  { %3151 = vrcp.f32 %v1072_v55  ;;  %v466_v12 = vmul.f32 %v3122_v30, %v5657_v63  ;;  %v987_v58 = vmin.f32 %v864_v14, %v5659_v44  ;;  %v371_v52 = vmin.f32 %v248_v56, %v343_v19  ;;  %v4310_v44 = vld [vmem:[#allocation7] sm:$0xff] }
 0x7a8   :  { %v1067_v53 = vpop.xlane.xlu1 %1066  ;;  %v742_v26 = vmin.f32 %v619_v15, %v714_v11  ;;  %v616_v42 = vmin.f32 %v493_v48, %v588_v1  ;;  %v589_v35 = vmul.f32 %v3132_v28, %v5660_v23  ;;  %v834_v38 = vmul.f32 %v3140_v39, %v5661_v18  ;;  %v5663_v11 = vld [vmem:[#allocation45_spill] sm:$0xff]  ;;  %v4296_v19 = vpop.xlane.xlu0 %1052 }
 0x7a9   :  { %v1073_v2 = vadd.f32 1e-18, %v1067_v53  ;;  %v494_v30 = vmin.f32 %v371_v52, %v466_v12  ;;  %v712_v13 = vmul.f32 %v3138_v27, %v5662_v8  ;;  %v4313_v52 = vld [vmem:[#allocation7 + $0x18] sm:$0xff] }
 0x7aa   :  { %v865_v41 = vmin.f32 %v742_v26, %v837_v0  ;;  %v739_v21 = vmin.f32 %v616_v42, %v711_v7  ;;  %v4307_v7 = vld [vmem:[#allocation7 + $0x10] sm:$0xff] }
 0x7ab   :  { %3153 = vrcp.f32 %v1073_v2  ;;  %v617_v43 = vmin.f32 %v494_v30, %v589_v35  ;;  %v4316_v35 = vld [vmem:[#allocation7 + $0x8] sm:$0xff] }
 0x7ac   :  { %v3142_v22 = vpop.eup %3141  ;;  %v988_v9 = vmin.f32 %v865_v41, %v4035_v37  ;;  %v862_v32 = vmin.f32 %v739_v21, %v834_v38  ;;  %v4302_v0 = vpop.xlane.xlu1 %1054 }
 0x7ad   :  { %v3144_v5 = vpop.eup %3143  ;;  %v1082_v54 = vmul.f32 %v3142_v22, %v4230_v60  ;;  %v740_v1 = vmin.f32 %v617_v43, %v712_v13 }
 0x7ae   :  { %v3146_v55 = vpop.eup %3145  ;;  %v957_v53 = vmul.f32 %v3144_v5, %v4190_v51 }
 0x7af   :  { %v4288_v3 = vmin.f32 %v987_v58, %v1082_v54  ;;  %v835_v28 = vmul.f32 %v3146_v55, %v5663_v11 }
 0x7b0   :  { %v3148_v33 = vpop.eup %3147  ;;  %v985_v39 = vmin.f32 %v862_v32, %v957_v53 }
 0x7b1   :  { %v1083_v60 = vmul.f32 %v3148_v33, %v1059_v57  ;;  %v3150_v10 = vpop.eup %3149  ;;  %v863_v37 = vmin.f32 %v740_v1, %v835_v28 }
 0x7b2   :  { %v958_v15 = vmul.f32 %v3150_v10, %v4211_v36 }
 0x7b3   :  { %v4294_v2 = vmin.f32 %v988_v9, %v1083_v60 }
 0x7b4   :  { %v3152_v47 = vpop.eup %3151  ;;  %v986_v22 = vmin.f32 %v863_v37, %v958_v15  ;;  %v5666_v15 = vld [vmem:[#allocation47_spill] sm:$0xff]  ;;  %v5667_v37 = vld [vmem:[#allocation48_spill] sm:$0xff] }
 0x7b5   :  { %v1080_v27 = vmul.f32 %v3152_v47, %v4296_v19 }
 0x7b7   :  { %v4300_v14 = vmin.f32 %v985_v39, %v1080_v27 }
 0x7b8   :  { %v3154_v57 = vpop.eup %3153 }
 0x7b9   :  { %v1081_v56 = vmul.f32 %v3154_v57, %v4302_v0  ;;  %v5668_v57 = vld [vmem:[#allocation49_spill] sm:$0xff] }
 0x7bb   :  { %v4305_v48 = vmin.f32 %v986_v22, %v1081_v56  ;;  %v5669_v22 = vld [vmem:[#allocation50_spill] sm:$0xff]  ;;  %v5670_v56 = vld [vmem:[#allocation51_spill] sm:$0xff] }
 0x7da   :  { %v2827_v12 = vpop.f32.mrf.mxu0 }
 0x7db   :  { %v1157_v5 = vadd.f32 %v4307_v7, %v2827_v12  ;;  %v5671_v12 = vld [vmem:[#allocation52_spill] sm:$0xff] }
 0x7dc   :  { %v1148_v26 = vpop.f32.mrf.mxu0 }
 0x7dd   :  { %3155 = vtanh.f32 %v1157_v5  ;;  %v1149_v58 = vadd.f32 %v4310_v44, %v1148_v26  ;;  %v5672_v5 = vld [vmem:[#allocation53_spill] sm:$0xff] }
 0x7de   :  { %v2828_v54 = vpop.f32.mrf.mxu0 }
 0x7df   :  { %v1160_v42 = vadd.f32 %v4313_v52, %v2828_v54 }
 0x7e0   :  { %v1151_v55 = vpop.f32.mrf.mxu0 }
 0x7e1   :  { %3157 = vtanh.f32 %v1160_v42  ;;  %v1152_v41 = vadd.f32 %v4316_v35, %v1151_v55 }
 0x7e2   :  { %3159 = vtanh.f32 %v1149_v58 }
 0x7e3   :  { %3161 = vtanh.f32 %v1152_v41 }
 0x7ea   :  { %v4319_v38 = vpop.eup %3155 }
 0x7eb   :  { %v1185_v33 = vmul.f32 %v4319_v38, %v4319_v38  ;;  %v1169_v30 = vsub.f32 %v4319_v38, %v4041_v24 }
 0x7ed   :  { %1191 = vadd.xlane.f32.xlu0 %v1185_v33  ;;  %v1173_v53 = vmul.f32 %v1169_v30, %v1169_v30 }
 0x7ee   :  { %v4325_v21 = vpop.eup %3157 }
 0x7ef   :  { %v4327_v13 = vpop.eup %3159  ;;  %v1186_v9 = vmul.f32 %v4325_v21, %v4325_v21  ;;  %v1170_v60 = vsub.f32 %v4325_v21, %v4047_v17  ;;  %v1236_v24 = vpack.c.bf16 %v4325_v21, %v4319_v38 }
 0x7f0   :  { %5664 = vst [vmem:[#allocation41_spill] sm:$0xff] %v4327_v13  ;;  %v4333_v10 = vpop.eup %3161  ;;  %v1183_v28 = vmul.f32 %v4327_v13, %v4327_v13  ;;  %v1167_v47 = vsub.f32 %v4327_v13, %v4049_v16 }
 0x7f1   :  { %5665 = vst [vmem:[#allocation23_spill] sm:$0xff] %v4333_v10  ;;  %1193 = vadd.xlane.f32.xlu1 %v1186_v9  ;;  %1179 = vadd.xlane.f32.xlu0 %v1173_v53  ;;  %v1235_v43 = vpack.c.bf16 %v4333_v10, %v4327_v13  ;;  %v1174_v32 = vmul.f32 %v1170_v60, %v1170_v60 }
 0x7f2   :  { %v1184_v17 = vmul.f32 %v4333_v10, %v4333_v10  ;;  %v1171_v1 = vmul.f32 %v1167_v47, %v1167_v47  ;;  %v1168_v39 = vsub.f32 %v4333_v10, %v4055_v34 }
 0x7f3   :  { %2845 = vmatprep.mubr.bf16.mxu1 %v1235_v43 }
 0x7f4   :  { %2846 = vmatmul.mubr.bf16.vlgmr.msra.gmra.mxu1 %v1236_v24  ;;  %v1172_v27 = vmul.f32 %v1168_v39, %v1168_v39 }
 0x7f5   :  { %1181 = vadd.xlane.f32.xlu1 %v1174_v32  ;;  %1187 = vadd.xlane.f32.xlu0 %v1183_v28 }
 0x7f6   :  { %2870 = vmatpush3.bf16.msra.mxu1 %v4065_v29 }
 0x7f7   :  { %2871 = vmatprep.subr.bf16.mxu1 %v5666_v15 }
 0x7f9   :  { %1189 = vadd.xlane.f32.xlu1 %v1184_v17  ;;  %1175 = vadd.xlane.f32.xlu0 %v1171_v1 }
 0x7fa   :  { %2872 = vmatpush3.bf16.msra.mxu1 %v5666_v15 }
 0x7fb   :  { %2873 = vmatprep.subr.bf16.mxu1 %v5667_v37 }
 0x7fd   :  { %1177 = vadd.xlane.f32.xlu1 %v1172_v27 }
 0x7fe   :  { %2874 = vmatpush3.bf16.msra.mxu1 %v5667_v37 }
 0x7ff   :  { %2875 = vmatprep.subr.bf16.mxu1 %v5668_v57 }
 0x802   :  { %2876 = vmatpush3.bf16.msra.mxu1 %v5668_v57 }
 0x803   :  { %2877 = vmatprep.subr.bf16.mxu1 %v5669_v22 }
 0x806   :  { %2878 = vmatpush3.bf16.msra.mxu1 %v5669_v22 }
 0x807   :  { %2879 = vmatprep.subr.bf16.mxu1 %v5670_v56 }
 0x80a   :  { %2880 = vmatpush3.bf16.msra.mxu1 %v5670_v56 }
 0x80b   :  { %2881 = vmatprep.subr.bf16.mxu1 %v5671_v12 }
 0x80e   :  { %2882 = vmatpush3.bf16.msra.mxu1 %v5671_v12 }
 0x80f   :  { %2883 = vmatprep.subr.bf16.mxu1 %v5672_v5 }
 0x812   :  { %2884 = vmatpush3.bf16.msra.mxu1 %v5672_v5 }
 0x813   :  { %2909 = vmatprep.subr.bf16.mxu1 %v4065_v29 }
 0x876   :  { %v1192_v26 = vpop.xlane.xlu0 %1191 }
 0x877   :  { %v1197_v58 = vadd.f32 1e-18, %v1192_v26 }
 0x879   :  { %3163 = vrcp.f32 %v1197_v58 }
 0x87a   :  { %v1194_v54 = vpop.xlane.xlu1 %1193  ;;  %v1180_v42 = vpop.xlane.xlu0 %1179 }
 0x87b   :  { %v1198_v55 = vadd.f32 1e-18, %v1194_v54  ;;  %vm1209_vm0 = vcmp.lt.f32.partialorder %v1180_v42, %v4234_v62  ;;  %v4365_v41 = vmin.f32 %v4234_v62, %v1180_v42 }
 0x87c   :  { %v4369_v33 = vsel %vm1209_vm0, %v4319_v38, %v4239_v50  ;;  %v4372_v30 = vsel %vm1209_vm0, 9, %v4241_v59  ;;  %vm227_vm0 = vcmp.lt.f32.partialorder %v3927_v61, 1e+20 }
 0x87d   :  { %3165 = vrcp.f32 %v1198_v55 }
 0x87e   :  { %v1182_v9 = vpop.xlane.xlu1 %1181  ;;  %v1188_v53 = vpop.xlane.xlu0 %1187 }
 0x87f   :  { %vm1210_vm1 = vcmp.lt.f32.partialorder %v1182_v9, %v4256_v4  ;;  %v4376_v60 = vmin.f32 %v4256_v4, %v1182_v9  ;;  %v1195_v43 = vadd.f32 1e-18, %v1188_v53 }
 0x880   :  { %v4380_v62 = vsel %vm1210_vm1, %v4325_v21, %v4263_v20  ;;  %v4383_v24 = vsel %vm1210_vm1, 9, %v4265_v45  ;;  %vm228_vm1 = vcmp.lt.f32.partialorder %v5653_v6, 1e+20 }
 0x881   :  { %3167 = vrcp.f32 %v1195_v43 }
 0x882   :  { %v1190_v50 = vpop.xlane.xlu1 %1189  ;;  %v4393_v39 = vpop.xlane.xlu0 %1175 }
 0x883   :  { %v1196_v59 = vadd.f32 1e-18, %v1190_v50 }
 0x885   :  { %3169 = vrcp.f32 %v1196_v59 }
 0x886   :  { %v3164_v32 = vpop.eup %3163  ;;  %v4400_v58 = vpop.xlane.xlu1 %1177 }
 0x887   :  { %v4385_v28 = vmul.f32 %v3164_v32, %v1180_v42  ;;  %5673 = vst [vmem:[#allocation43_spill] sm:$0xff] %v4400_v58 }
 0x889   :  { %v1233_v47 = vmin.f32 %v4288_v3, %v4385_v28 }
 0x88a   :  { %v3166_v4 = vpop.eup %3165 }
 0x88b   :  { %v4389_v17 = vmul.f32 %v3166_v4, %v1182_v9 }
 0x88e   :  { %v3168_v1 = vpop.eup %3167 }
 0x88f   :  { %v4396_v45 = vmul.f32 %v3168_v1, %v4393_v39 }
 0x892   :  { %v3170_v26 = vpop.eup %3169 }
 0x893   :  { %v4403_v54 = vmul.f32 %v3170_v26, %v4400_v58 }
 0x8b4   :  { %v2847_v55 = vpop.f32.mrf.mxu1 }
 0x8b5   :  { %v1280_v9 = vadd.f32 %v4307_v7, %v2847_v55 }
 0x8b6   :  { %v1271_v53 = vpop.f32.mrf.mxu1 }
 0x8b7   :  { %3171 = vtanh.f32 %v1280_v9  ;;  %v1272_v43 = vadd.f32 %v4310_v44, %v1271_v53 }
 0x8b8   :  { %v2848_v50 = vpop.f32.mrf.mxu1 }
 0x8b9   :  { %v1283_v59 = vadd.f32 %v4313_v52, %v2848_v50 }
 0x8ba   :  { %v1274_v32 = vpop.f32.mrf.mxu1 }
 0x8bb   :  { %3173 = vtanh.f32 %v1283_v59  ;;  %v1275_v4 = vadd.f32 %v4316_v35, %v1274_v32 }
 0x8bc   :  { %3175 = vtanh.f32 %v1272_v43 }
 0x8bd   :  { %3177 = vtanh.f32 %v1275_v4 }
 0x8c4   :  { %v4411_v1 = vpop.eup %3171 }
 0x8c5   :  { %v1308_v26 = vmul.f32 %v4411_v1, %v4411_v1  ;;  %v1292_v55 = vsub.f32 %v4411_v1, %v4319_v38 }
 0x8c7   :  { %1314 = vadd.xlane.f32.xlu0 %v1308_v26  ;;  %v1296_v59 = vmul.f32 %v1292_v55, %v1292_v55 }
 0x8c8   :  { %v4417_v9 = vpop.eup %3173 }
 0x8c9   :  { %v4419_v53 = vpop.eup %3175  ;;  %v1309_v50 = vmul.f32 %v4417_v9, %v4417_v9  ;;  %v1293_v43 = vsub.f32 %v4417_v9, %v4325_v21  ;;  %v1359_v38 = vpack.c.bf16 %v4417_v9, %v4411_v1 }
 0x8ca   :  { %5674 = vst [vmem:[#allocation26_spill] sm:$0xff] %v4419_v53  ;;  %v4425_v32 = vpop.eup %3177  ;;  %v1306_v42 = vmul.f32 %v4419_v53, %v4419_v53  ;;  %v1290_v55 = vsub.f32 %v4419_v53, %v4327_v13 }
 0x8cb   :  { %5675 = vst [vmem:[#allocation42_spill] sm:$0xff] %v4425_v32  ;;  %1316 = vadd.xlane.f32.xlu1 %v1309_v50  ;;  %1302 = vadd.xlane.f32.xlu0 %v1296_v59  ;;  %v1358_v4 = vpack.c.bf16 %v4425_v32, %v4419_v53  ;;  %v1297_v26 = vmul.f32 %v1293_v43, %v1293_v43 }
 0x8cc   :  { %v1307_v21 = vmul.f32 %v4425_v32, %v4425_v32  ;;  %v1294_v50 = vmul.f32 %v1290_v55, %v1290_v55  ;;  %v1291_v59 = vsub.f32 %v4425_v32, %v4333_v10 }
 0x8cd   :  { %2865 = vmatprep.mubr.bf16.mxu0 %v1358_v4 }
 0x8ce   :  { %2866 = vmatmul.mubr.bf16.vlgmr.msra.gmra.mxu0 %v1359_v38  ;;  %v1295_v43 = vmul.f32 %v1291_v59, %v1291_v59 }
 0x8cf   :  { %1304 = vadd.xlane.f32.xlu1 %v1297_v26  ;;  %1310 = vadd.xlane.f32.xlu0 %v1306_v42 }
 0x8d0   :  { %2890 = vmatpush3.bf16.msra.mxu0 %v4065_v29 }
 0x8d1   :  { %2891 = vmatprep.subr.bf16.mxu0 %v5666_v15 }
 0x8d3   :  { %1312 = vadd.xlane.f32.xlu1 %v1307_v21  ;;  %1298 = vadd.xlane.f32.xlu0 %v1294_v50 }
 0x8d4   :  { %2892 = vmatpush3.bf16.msra.mxu0 %v5666_v15 }
 0x8d5   :  { %2893 = vmatprep.subr.bf16.mxu0 %v5667_v37 }
 0x8d7   :  { %1300 = vadd.xlane.f32.xlu1 %v1295_v43 }
 0x8d8   :  { %2894 = vmatpush3.bf16.msra.mxu0 %v5667_v37 }
 0x8d9   :  { %2895 = vmatprep.subr.bf16.mxu0 %v5668_v57 }
 0x8dc   :  { %2896 = vmatpush3.bf16.msra.mxu0 %v5668_v57 }
 0x8dd   :  { %2897 = vmatprep.subr.bf16.mxu0 %v5669_v22 }
 0x8e0   :  { %2898 = vmatpush3.bf16.msra.mxu0 %v5669_v22 }
 0x8e1   :  { %2899 = vmatprep.subr.bf16.mxu0 %v5670_v56 }
 0x8e4   :  { %2900 = vmatpush3.bf16.msra.mxu0 %v5670_v56 }
 0x8e5   :  { %2901 = vmatprep.subr.bf16.mxu0 %v5671_v12 }
 0x8e8   :  { %2902 = vmatpush3.bf16.msra.mxu0 %v5671_v12 }
 0x8e9   :  { %2903 = vmatprep.subr.bf16.mxu0 %v5672_v5 }
 0x8ec   :  { %2904 = vmatpush3.bf16.msra.mxu0 %v5672_v5 }
 0x8ed   :  { %2929 = vmatprep.subr.bf16.mxu0 %v4065_v29 }
 0x950   :  { %v1315_v42 = vpop.xlane.xlu0 %1314 }
 0x951   :  { %v1320_v4 = vadd.f32 1e-18, %v1315_v42 }
 0x953   :  { %3179 = vrcp.f32 %v1320_v4 }
 0x954   :  { %v1317_v38 = vpop.xlane.xlu1 %1316  ;;  %v1303_v26 = vpop.xlane.xlu0 %1302 }
 0x955   :  { %v1321_v55 = vadd.f32 1e-18, %v1317_v38  ;;  %vm1332_vm2 = vcmp.lt.f32.partialorder %v1303_v26, %v4365_v41  ;;  %v4457_v21 = vmin.f32 %v4365_v41, %v1303_v26 }
 0x956   :  { %v4461_v50 = vsel %vm1332_vm2, %v4411_v1, %v4369_v33  ;;  %v4464_v59 = vsel %vm1332_vm2, 10, %v4372_v30 }
 0x957   :  { %3181 = vrcp.f32 %v1321_v55 }
 0x958   :  { %v1305_v43 = vpop.xlane.xlu1 %1304  ;;  %v1311_v27 = vpop.xlane.xlu0 %1310 }
 0x959   :  { %vm1333_vm3 = vcmp.lt.f32.partialorder %v1305_v43, %v4376_v60  ;;  %v4468_v42 = vmin.f32 %v4376_v60, %v1305_v43  ;;  %v1318_v4 = vadd.f32 1e-18, %v1311_v27 }
 0x95a   :  { %v4472_v41 = vsel %vm1333_vm3, %v4417_v9, %v4380_v62  ;;  %v4475_v38 = vsel %vm1333_vm3, 10, %v4383_v24  ;;  %v5676_v62 = vmin.f32 %v4294_v2, %v4389_v17  ;;  %v5679_v2 = vmin.f32 %v4305_v48, %v4403_v54 }
 0x95b   :  { %3183 = vrcp.f32 %v1318_v4 }
 0x95c   :  { %v1313_v33 = vpop.xlane.xlu1 %1312  ;;  %v4487_v58 = vpop.xlane.xlu0 %1298 }
 0x95d   :  { %v1319_v30 = vadd.f32 1e-18, %v1313_v33 }
 0x95f   :  { %3185 = vrcp.f32 %v1319_v30 }
 0x960   :  { %v3180_v55 = vpop.eup %3179  ;;  %v4495_v28 = vpop.xlane.xlu1 %1300 }
 0x961   :  { %v1328_v20 = vmul.f32 %v3180_v55, %v1303_v26  ;;  %v5677_v26 = vmin.f32 %v4300_v14, %v4396_v45  ;;  %5678 = vst [vmem:[#allocation27_spill] sm:$0xff] %v4495_v28 }
 0x963   :  { %v4480_v10 = vmin.f32 %v1233_v47, %v1328_v20 }
 0x964   :  { %v3182_v60 = vpop.eup %3181 }
 0x965   :  { %v1329_v27 = vmul.f32 %v3182_v60, %v1305_v43 }
 0x967   :  { %v4485_v13 = vmin.f32 %v5676_v62, %v1329_v27 }
 0x968   :  { %v3184_v24 = vpop.eup %3183 }
 0x969   :  { %v1326_v4 = vmul.f32 %v3184_v24, %v4487_v58 }
 0x96b   :  { %v4493_v33 = vmin.f32 %v5677_v26, %v1326_v4 }
 0x96c   :  { %v3186_v3 = vpop.eup %3185 }
 0x96d   :  { %v1327_v47 = vmul.f32 %v3186_v3, %v4495_v28 }
 0x96f   :  { %v4501_v17 = vmin.f32 %v5679_v2, %v1327_v47 }
 0x98e   :  { %v2867_v20 = vpop.f32.mrf.mxu0 }
 0x98f   :  { %v1403_v43 = vadd.f32 %v4307_v7, %v2867_v20 }
 0x990   :  { %v1394_v30 = vpop.f32.mrf.mxu0 }
 0x991   :  { %3187 = vtanh.f32 %v1403_v43  ;;  %v1395_v55 = vadd.f32 %v4310_v44, %v1394_v30 }
 0x992   :  { %v2868_v14 = vpop.f32.mrf.mxu0 }
 0x993   :  { %3189 = vtanh.f32 %v1395_v55  ;;  %v1406_v45 = vadd.f32 %v4313_v52, %v2868_v14 }
 0x994   :  { %v1397_v60 = vpop.f32.mrf.mxu0 }
 0x995   :  { %3191 = vtanh.f32 %v1406_v45  ;;  %v1398_v27 = vadd.f32 %v4316_v35, %v1397_v60 }
 0x997   :  { %3193 = vtanh.f32 %v1398_v27 }
 0x99e   :  { %v4507_v62 = vpop.eup %3187 }
 0x99f   :  { %v1431_v48 = vmul.f32 %v4507_v62, %v4507_v62  ;;  %v1415_v3 = vsub.f32 %v4507_v62, %v4411_v1 }
 0x9a0   :  { %v4511_v54 = vpop.eup %3189 }
 0x9a1   :  { %5680 = vst [vmem:[#allocation33_spill] sm:$0xff] %v4511_v54  ;;  %1437 = vadd.xlane.f32.xlu0 %v1431_v48  ;;  %v1429_v26 = vmul.f32 %v4511_v54, %v4511_v54  ;;  %v1419_v30 = vmul.f32 %v1415_v3, %v1415_v3  ;;  %v1413_v1 = vsub.f32 %v4511_v54, %v4419_v53 }
 0x9a2   :  { %v4513_v24 = vpop.eup %3191 }
 0x9a3   :  { %v1432_v4 = vmul.f32 %v4513_v24, %v4513_v24  ;;  %v1482_v20 = vpack.c.bf16 %v4513_v24, %v4507_v62  ;;  %v1416_v55 = vsub.f32 %v4513_v24, %v4417_v9  ;;  %v1417_v45 = vmul.f32 %v1413_v1, %v1413_v1 }
 0x9a4   :  { %v4521_v47 = vpop.eup %3193 }
 0x9a5   :  { %5681 = vst [vmem:[#allocation32_spill] sm:$0xff] %v4521_v47  ;;  %1439 = vadd.xlane.f32.xlu1 %v1432_v4  ;;  %1433 = vadd.xlane.f32.xlu0 %v1429_v26  ;;  %v1481_v2 = vpack.c.bf16 %v4521_v47, %v4511_v54  ;;  %v1430_v43 = vmul.f32 %v4521_v47, %v4521_v47 }
 0x9a6   :  { %v1420_v14 = vmul.f32 %v1416_v55, %v1416_v55  ;;  %v1414_v60 = vsub.f32 %v4521_v47, %v4425_v32 }
 0x9a7   :  { %2885 = vmatprep.mubr.bf16.mxu1 %v1481_v2 }
 0x9a8   :  { %2886 = vmatmul.mubr.bf16.vlgmr.msra.gmra.mxu1 %v1482_v20  ;;  %v1418_v9 = vmul.f32 %v1414_v60, %v1414_v60 }
 0x9a9   :  { %1435 = vadd.xlane.f32.xlu1 %v1430_v43  ;;  %1425 = vadd.xlane.f32.xlu0 %v1419_v30 }
 0x9aa   :  { %2910 = vmatpush3.bf16.msra.mxu1 %v4065_v29 }
 0x9ab   :  { %2911 = vmatprep.subr.bf16.mxu1 %v5666_v15 }
 0x9ad   :  { %1427 = vadd.xlane.f32.xlu1 %v1420_v14  ;;  %1421 = vadd.xlane.f32.xlu0 %v1417_v45 }
 0x9ae   :  { %2912 = vmatpush3.bf16.msra.mxu1 %v5666_v15 }
 0x9af   :  { %2913 = vmatprep.subr.bf16.mxu1 %v5667_v37 }
 0x9b1   :  { %1423 = vadd.xlane.f32.xlu1 %v1418_v9 }
 0x9b2   :  { %2914 = vmatpush3.bf16.msra.mxu1 %v5667_v37 }
 0x9b3   :  { %2915 = vmatprep.subr.bf16.mxu1 %v5668_v57 }
 0x9b6   :  { %2916 = vmatpush3.bf16.msra.mxu1 %v5668_v57 }
 0x9b7   :  { %2917 = vmatprep.subr.bf16.mxu1 %v5669_v22 }
 0x9ba   :  { %2918 = vmatpush3.bf16.msra.mxu1 %v5669_v22 }
 0x9bb   :  { %2919 = vmatprep.subr.bf16.mxu1 %v5670_v56 }
 0x9be   :  { %2920 = vmatpush3.bf16.msra.mxu1 %v5670_v56 }
 0x9bf   :  { %2921 = vmatprep.subr.bf16.mxu1 %v5671_v12 }
 0x9c2   :  { %2922 = vmatpush3.bf16.msra.mxu1 %v5671_v12 }
 0x9c3   :  { %2923 = vmatprep.subr.bf16.mxu1 %v5672_v5 }
 0x9c6   :  { %2924 = vmatpush3.bf16.msra.mxu1 %v5672_v5 }
 0x9c7   :  { %2949 = vmatprep.subr.bf16.mxu1 %v4065_v29 }
 0xa2a   :  { %v1438_v15 = vpop.xlane.xlu0 %1437 }
 0xa2b   :  { %v1443_v37 = vadd.f32 1e-18, %v1438_v15  ;;  %v4630_v15 = vld [vmem:[#allocation5 + $0x30] sm:$0xff]  }
 0xa2d   :  { %3195 = vrcp.f32 %v1443_v37 }
 0xa2e   :  { %v1440_v57 = vpop.xlane.xlu1 %1439  ;;  %v1434_v27 = vpop.xlane.xlu0 %1433 }
 0xa2f   :  { %v1444_v22 = vadd.f32 1e-18, %v1440_v57  ;;  %v1441_v48 = vadd.f32 1e-18, %v1434_v27 }
 0xa31   :  { %3197 = vrcp.f32 %v1444_v22 }
 0xa32   :  { %3199 = vrcp.f32 %v1441_v48  ;;  %v1436_v56 = vpop.xlane.xlu1 %1435  ;;  %v1426_v4 = vpop.xlane.xlu0 %1425 }
 0xa33   :  { %v1442_v26 = vadd.f32 1e-18, %v1436_v56  ;;  %vm1455_vm4 = vcmp.lt.f32.partialorder %v1426_v4, %v4457_v21  ;;  %v4553_v12 = vmin.f32 %v4457_v21, %v1426_v4 }
 0xa34   :  { %v4557_v29 = vsel %vm1455_vm4, %v4507_v62, %v4461_v50  ;;  %v4560_v5 = vsel %vm1455_vm4, 11, %v4464_v59 }
 0xa35   :  { %3201 = vrcp.f32 %v1442_v26 }
 0xa36   :  { %v1428_v3 = vpop.xlane.xlu1 %1427  ;;  %v4579_v14 = vpop.xlane.xlu0 %1421 }
 0xa37   :  { %vm1456_vm5 = vcmp.lt.f32.partialorder %v1428_v3, %v4468_v42  ;;  %v4564_v2 = vmin.f32 %v4468_v42, %v1428_v3  ;;  %5682 = vst [vmem:[#allocation35_spill] sm:$0xff] %v4579_v14 }
 0xa38   :  { %v4568_v20 = vsel %vm1456_vm5, %v4513_v24, %v4472_v41  ;;  %v4571_v21 = vsel %vm1456_vm5, 11, %v4475_v38 }
 0xa3a   :  { %v3196_v43 = vpop.eup %3195  ;;  %v4588_v60 = vpop.xlane.xlu1 %1423 }
 0xa3b   :  { %v4573_v50 = vmul.f32 %v3196_v43, %v1426_v4  ;;  %5683 = vst [vmem:[#allocation34_spill] sm:$0xff] %v4588_v60 }
 0xa3e   :  { %v3198_v30 = vpop.eup %3197 }
 0xa3f   :  { %v3200_v55 = vpop.eup %3199  ;;  %v4577_v1 = vmul.f32 %v3198_v30, %v1428_v3 }
 0xa40   :  { %v4582_v42 = vmul.f32 %v3200_v55, %v4579_v14 }
 0xa42   :  { %v3202_v38 = vpop.eup %3201 }
 0xa43   :  { %v4591_v9 = vmul.f32 %v3202_v38, %v4588_v60 }
 0xa68   :  { %v2887_v37 = vpop.f32.mrf.mxu1 }
 0xa69   :  { %v1526_v57 = vadd.f32 %v4307_v7, %v2887_v37 }
 0xa6a   :  { %v1517_v27 = vpop.f32.mrf.mxu1 }
 0xa6b   :  { %3203 = vtanh.f32 %v1526_v57  ;;  %v1518_v22 = vadd.f32 %v4310_v44, %v1517_v27 }
 0xa6c   :  { %v2888_v48 = vpop.f32.mrf.mxu1 }
 0xa6d   :  { %3205 = vtanh.f32 %v1518_v22  ;;  %v1529_v56 = vadd.f32 %v4313_v52, %v2888_v48 }
 0xa6e   :  { %v1520_v4 = vpop.f32.mrf.mxu1 }
 0xa6f   :  { %3207 = vtanh.f32 %v1529_v56  ;;  %v1521_v26 = vadd.f32 %v4316_v35, %v1520_v4 }
 0xa71   :  { %3209 = vtanh.f32 %v1521_v26 }
 0xa78   :  { %v4599_v3 = vpop.eup %3203 }
 0xa79   :  { %v1554_v43 = vmul.f32 %v4599_v3, %v4599_v3  ;;  %v1538_v57 = vsub.f32 %v4599_v3, %v4507_v62 }
 0xa7a   :  { %v4603_v30 = vpop.eup %3205 }
 0xa7b   :  { %1560 = vadd.xlane.f32.xlu0 %v1554_v43  ;;  %v1552_v37 = vmul.f32 %v4603_v30, %v4603_v30  ;;  %v1542_v4 = vmul.f32 %v1538_v57, %v1538_v57  ;;  %v1536_v62 = vsub.f32 %v4603_v30, %v4511_v54  ;;  %v4625_v43 = vld [vmem:[#allocation5 + $0x38] sm:$0xff]   ;;  %v4634_v57 = vld [vmem:[#allocation5 + $0x28] sm:$0xff]  }
 0xa7c   :  { %v4605_v55 = vpop.eup %3207 }
 0xa7d   :  { %v1555_v38 = vmul.f32 %v4605_v55, %v4605_v55  ;;  %v1605_v48 = vpack.c.bf16 %v4605_v55, %v4599_v3  ;;  %v1539_v26 = vsub.f32 %v4605_v55, %v4513_v24 }
 0xa7e   :  { %v4613_v27 = vpop.eup %3209 }
 0xa7f   :  { %5684 = vst [vmem:[#allocation37_spill] sm:$0xff] %v4613_v27  ;;  %1562 = vadd.xlane.f32.xlu1 %v1555_v38  ;;  %1556 = vadd.xlane.f32.xlu0 %v1552_v37  ;;  %v1604_v22 = vpack.c.bf16 %v4613_v27, %v4603_v30  ;;  %v1553_v56 = vmul.f32 %v4613_v27, %v4613_v27 }
 0xa80   :  { %v1543_v38 = vmul.f32 %v1539_v26, %v1539_v26  ;;  %v1540_v37 = vmul.f32 %v1536_v62, %v1536_v62  ;;  %v4650_v26 = vld [vmem:[#allocation5 + $0x8] sm:$0xff]   ;;  %v4654_v62 = vld [vmem:[#allocation5] sm:$0xff]  }
 0xa81   :  { %2905 = vmatprep.mubr.bf16.mxu0 %v1604_v22  ;;  %v1537_v22 = vsub.f32 %v4613_v27, %v4521_v47 }
 0xa82   :  { %2906 = vmatmul.mubr.bf16.vlgmr.msra.gmra.mxu0 %v1605_v48  ;;  %v4638_v48 = vld [vmem:[#allocation5 + $0x20] sm:$0xff]  }
 0xa83   :  { %1558 = vadd.xlane.f32.xlu1 %v1553_v56  ;;  %1548 = vadd.xlane.f32.xlu0 %v1542_v4  ;;  %v1541_v24 = vmul.f32 %v1537_v22, %v1537_v22  ;;  %v4642_v56 = vld [vmem:[#allocation5 + $0x18] sm:$0xff]   ;;  %v4646_v4 = vld [vmem:[#allocation5 + $0x10] sm:$0xff]  }
 0xa84   :  { %2930 = vmatpush3.bf16.msra.mxu0 %v4625_v43 }
 0xa85   :  { %2931 = vmatprep.subr.bf16.mxu0 %v4630_v15 }
 0xa87   :  { %1550 = vadd.xlane.f32.xlu1 %v1543_v38  ;;  %1544 = vadd.xlane.f32.xlu0 %v1540_v37 }
 0xa88   :  { %2932 = vmatpush3.bf16.msra.mxu0 %v4630_v15 }
 0xa89   :  { %2933 = vmatprep.subr.bf16.mxu0 %v4634_v57 }
 0xa8b   :  { %1546 = vadd.xlane.f32.xlu1 %v1541_v24 }
 0xa8c   :  { %2934 = vmatpush3.bf16.msra.mxu0 %v4634_v57 }
 0xa8d   :  { %2935 = vmatprep.subr.bf16.mxu0 %v4638_v48 }
 0xa90   :  { %2936 = vmatpush3.bf16.msra.mxu0 %v4638_v48 }
 0xa91   :  { %2937 = vmatprep.subr.bf16.mxu0 %v4642_v56 }
 0xa94   :  { %2938 = vmatpush3.bf16.msra.mxu0 %v4642_v56 }
 0xa95   :  { %2939 = vmatprep.subr.bf16.mxu0 %v4646_v4 }
 0xa98   :  { %2940 = vmatpush3.bf16.msra.mxu0 %v4646_v4 }
 0xa99   :  { %2941 = vmatprep.subr.bf16.mxu0 %v4650_v26 }
 0xa9c   :  { %2942 = vmatpush3.bf16.msra.mxu0 %v4650_v26 }
 0xa9d   :  { %2943 = vmatprep.subr.bf16.mxu0 %v4654_v62 }
 0xaa0   :  { %2944 = vmatpush3.bf16.msra.mxu0 %v4654_v62 }
 0xaa1   :  { %2969 = vmatprep.subr.bf16.mxu0 %v4625_v43 }
 0xb04   :  { %v1561_v38 = vpop.xlane.xlu0 %1560 }
 0xb05   :  { %v1566_v37 = vadd.f32 1e-18, %v1561_v38 }
 0xb07   :  { %3211 = vrcp.f32 %v1566_v37 }
 0xb08   :  { %v1563_v22 = vpop.xlane.xlu1 %1562  ;;  %v1557_v24 = vpop.xlane.xlu0 %1556 }
 0xb09   :  { %v1567_v45 = vadd.f32 1e-18, %v1563_v22  ;;  %v1564_v41 = vadd.f32 1e-18, %v1557_v24 }
 0xb0b   :  { %3213 = vrcp.f32 %v1567_v45 }
 0xb0c   :  { %3215 = vrcp.f32 %v1564_v41  ;;  %v1559_v59 = vpop.xlane.xlu1 %1558  ;;  %v1549_v47 = vpop.xlane.xlu0 %1548 }
 0xb0d   :  { %v1565_v54 = vadd.f32 1e-18, %v1559_v59  ;;  %vm1578_vm6 = vcmp.lt.f32.partialorder %v1549_v47, %v4553_v12  ;;  %v4661_v32 = vmin.f32 %v4553_v12, %v1549_v47 }
 0xb0e   :  { %v4665_v60 = vsel %vm1578_vm6, %v4599_v3, %v4557_v29  ;;  %v4668_v38 = vsel %vm1578_vm6, 12, %v4560_v5  ;;  %v5685_v5 = vmin.f32 %v4480_v10, %v4573_v50 }
 0xb0f   :  { %3217 = vrcp.f32 %v1565_v54 }
 0xb10   :  { %v1551_v37 = vpop.xlane.xlu1 %1550  ;;  %v4686_v53 = vpop.xlane.xlu0 %1544 }
 0xb11   :  { %vm1579_vm7 = vcmp.lt.f32.partialorder %v1551_v37, %v4564_v2  ;;  %v4672_v41 = vmin.f32 %v4564_v2, %v1551_v37 }
 0xb12   :  { %v4676_v59 = vsel %vm1579_vm7, %v4605_v55, %v4568_v20  ;;  %v4679_v12 = vsel %vm1579_vm7, 12, %v4571_v21  ;;  %v5687_v20 = vmin.f32 %v4485_v13, %v4577_v1 }
 0xb14   :  { %v3212_v45 = vpop.eup %3211  ;;  %v4699_v10 = vpop.xlane.xlu1 %1546 }
 0xb15   :  { %v1574_v29 = vmul.f32 %v3212_v45, %v1549_v47  ;;  %v5689_v47 = vmin.f32 %v4493_v33, %v4582_v42 }
 0xb17   :  { %v4684_v22 = vmin.f32 %v5685_v5, %v1574_v29 }
 0xb18   :  { %v3214_v54 = vpop.eup %3213 }
 0xb19   :  { %5686 = vst [vmem:[#allocation36_spill] sm:$0xff] %v4684_v22  ;;  %v3216_v24 = vpop.eup %3215  ;;  %v1575_v14 = vmul.f32 %v3214_v54, %v1551_v37  ;;  %v5691_v37 = vmin.f32 %v4501_v17, %v4591_v9 }
 0xb1a   :  { %v1572_v2 = vmul.f32 %v3216_v24, %v4686_v53 }
 0xb1b   :  { %v4692_v28 = vmin.f32 %v5687_v20, %v1575_v14 }
 0xb1c   :  { %v3218_v21 = vpop.eup %3217  ;;  %v4697_v45 = vmin.f32 %v5689_v47, %v1572_v2 }
 0xb1d   :  { %5688 = vst [vmem:[#allocation39_spill] sm:$0xff] %v4692_v28  ;;  %v1573_v50 = vmul.f32 %v3218_v21, %v4699_v10 }
 0xb1e   :  { %5690 = vst [vmem:[#allocation46_spill] sm:$0xff] %v4697_v45 }
 0xb1f   :  { %v4705_v29 = vmin.f32 %v5691_v37, %v1573_v50 }
 0xb21   :  { %5692 = vst [vmem:[#allocation38_spill] sm:$0xff] %v4705_v29 }
 0xb42   :  { %v2907_v5 = vpop.f32.mrf.mxu0 }
 0xb43   :  { %v1649_v13 = vadd.f32 %v4307_v7, %v2907_v5 }
 0xb44   :  { %v1640_v1 = vpop.f32.mrf.mxu0 }
 0xb45   :  { %3219 = vtanh.f32 %v1649_v13  ;;  %v1641_v14 = vadd.f32 %v4310_v44, %v1640_v1 }
 0xb46   :  { %v2908_v54 = vpop.f32.mrf.mxu0 }
 0xb47   :  { %3221 = vtanh.f32 %v1641_v14  ;;  %v1652_v33 = vadd.f32 %v4313_v52, %v2908_v54 }
 0xb48   :  { %v1643_v42 = vpop.f32.mrf.mxu0 }
 0xb49   :  { %3223 = vtanh.f32 %v1652_v33  ;;  %v1644_v24 = vadd.f32 %v4316_v35, %v1643_v42 }
 0xb4b   :  { %3225 = vtanh.f32 %v1644_v24 }
 0xb52   :  { %v4711_v2 = vpop.eup %3219 }
 0xb53   :  { %v1677_v17 = vmul.f32 %v4711_v2, %v4711_v2  ;;  %v1661_v50 = vsub.f32 %v4711_v2, %v4599_v3 }
 0xb54   :  { %v4715_v9 = vpop.eup %3221 }
 0xb55   :  { %5693 = vst [vmem:[#allocation44_spill] sm:$0xff] %v4715_v9  ;;  %1683 = vadd.xlane.f32.xlu0 %v1677_v17  ;;  %v1675_v47 = vmul.f32 %v4715_v9, %v4715_v9  ;;  %v1665_v14 = vmul.f32 %v1661_v50, %v1661_v50  ;;  %v1659_v3 = vsub.f32 %v4715_v9, %v4603_v30 }
 0xb56   :  { %v4717_v20 = vpop.eup %3223 }
 0xb57   :  { %v1678_v21 = vmul.f32 %v4717_v20, %v4717_v20  ;;  %v1728_v13 = vpack.c.bf16 %v4717_v20, %v4711_v2  ;;  %v1662_v54 = vsub.f32 %v4717_v20, %v4605_v55  ;;  %v1663_v42 = vmul.f32 %v1659_v3, %v1659_v3 }
 0xb58   :  { %v4725_v37 = vpop.eup %3225 }
 0xb59   :  { %5694 = vst [vmem:[#allocation40_spill] sm:$0xff] %v4725_v37  ;;  %1685 = vadd.xlane.f32.xlu1 %v1678_v21  ;;  %1679 = vadd.xlane.f32.xlu0 %v1675_v47  ;;  %v1727_v5 = vpack.c.bf16 %v4725_v37, %v4715_v9  ;;  %v1676_v1 = vmul.f32 %v4725_v37, %v4725_v37 }
 0xb5a   :  { %v1666_v33 = vmul.f32 %v1662_v54, %v1662_v54  ;;  %v1660_v24 = vsub.f32 %v4725_v37, %v4613_v27 }
 0xb5b   :  { %2925 = vmatprep.mubr.bf16.mxu1 %v1727_v5 }
 0xb5c   :  { %2926 = vmatmul.mubr.bf16.vlgmr.msra.gmra.mxu1 %v1728_v13  ;;  %v1664_v55 = vmul.f32 %v1660_v24, %v1660_v24 }
 0xb5d   :  { %1681 = vadd.xlane.f32.xlu1 %v1676_v1  ;;  %1671 = vadd.xlane.f32.xlu0 %v1665_v14 }
 0xb5e   :  { %2950 = vmatpush3.bf16.msra.mxu1 %v4625_v43 }
 0xb5f   :  { %2951 = vmatprep.subr.bf16.mxu1 %v4630_v15 }
 0xb61   :  { %1673 = vadd.xlane.f32.xlu1 %v1666_v33  ;;  %1667 = vadd.xlane.f32.xlu0 %v1663_v42 }
 0xb62   :  { %2952 = vmatpush3.bf16.msra.mxu1 %v4630_v15 }
 0xb63   :  { %2953 = vmatprep.subr.bf16.mxu1 %v4634_v57 }
 0xb65   :  { %1669 = vadd.xlane.f32.xlu1 %v1664_v55 }
 0xb66   :  { %2954 = vmatpush3.bf16.msra.mxu1 %v4634_v57 }
 0xb67   :  { %2955 = vmatprep.subr.bf16.mxu1 %v4638_v48 }
 0xb6a   :  { %2956 = vmatpush3.bf16.msra.mxu1 %v4638_v48 }
 0xb6b   :  { %2957 = vmatprep.subr.bf16.mxu1 %v4642_v56 }
 0xb6e   :  { %2958 = vmatpush3.bf16.msra.mxu1 %v4642_v56 }
 0xb6f   :  { %2959 = vmatprep.subr.bf16.mxu1 %v4646_v4 }
 0xb72   :  { %2960 = vmatpush3.bf16.msra.mxu1 %v4646_v4 }
 0xb73   :  { %2961 = vmatprep.subr.bf16.mxu1 %v4650_v26 }
 0xb76   :  { %2962 = vmatpush3.bf16.msra.mxu1 %v4650_v26 }
 0xb77   :  { %2963 = vmatprep.subr.bf16.mxu1 %v4654_v62 }
 0xb7a   :  { %2964 = vmatpush3.bf16.msra.mxu1 %v4654_v62 }
 0xb7b   :  { %2989 = vmatprep.subr.bf16.mxu1 %v4625_v43 }
 0xbde   :  { %v1684_v17 = vpop.xlane.xlu0 %1683 }
 0xbdf   :  { %v1689_v21 = vadd.f32 1e-18, %v1684_v17 }
 0xbe1   :  { %3227 = vrcp.f32 %v1689_v21 }
 0xbe2   :  { %v1686_v47 = vpop.xlane.xlu1 %1685  ;;  %v4755_v50 = vpop.xlane.xlu0 %1679 }
 0xbe3   :  { %v1690_v5 = vadd.f32 1e-18, %v1686_v47 }
 0xbe5   :  { %3229 = vrcp.f32 %v1690_v5 }
 0xbe6   :  { %v4757_v13 = vpop.xlane.xlu1 %1681  ;;  %v1672_v1 = vpop.xlane.xlu0 %1671 }
 0xbe7   :  { %vm1701_vm8 = vcmp.lt.f32.partialorder %v1672_v1, %v4661_v32  ;;  %v4761_v14 = vmin.f32 %v4661_v32, %v1672_v1 }
 0xbe8   :  { %v4765_v54 = vsel %vm1701_vm8, %v4711_v2, %v4665_v60  ;;  %v4768_v3 = vsel %vm1701_vm8, 13, %v4668_v38 }
 0xbea   :  { %v1674_v33 = vpop.xlane.xlu1 %1673 }
 0xbeb   :  { %vm1702_vm9 = vcmp.lt.f32.partialorder %v1674_v33, %v4672_v41  ;;  %v4772_v42 = vmin.f32 %v4672_v41, %v1674_v33 }
 0xbec   :  { %v4776_v24 = vsel %vm1702_vm9, %v4717_v20, %v4676_v59  ;;  %v4779_v32 = vsel %vm1702_vm9, 13, %v4679_v12 }
 0xbee   :  { %v3228_v55 = vpop.eup %3227 }
 0xbef   :  { %v4781_v17 = vmul.f32 %v3228_v55, %v1672_v1 }
 0xbf1   :  { %5695 = vst [vmem:[#allocation45_spill] sm:$0xff] %v4781_v17  ;;  %v4877_v17 = vld [vmem:[#allocation7] sm:$0xff] }
 0xbf2   :  { %v3230_v38 = vpop.eup %3229 }
 0xbf3   :  { %v4785_v21 = vmul.f32 %v3230_v38, %v1674_v33 }
 0xbf5   :  { %5696 = vst [vmem:[#allocation47_spill] sm:$0xff] %v4785_v21  ;;  %v4874_v21 = vld [vmem:[#allocation7 + $0x10] sm:$0xff] }
 0xc1c   :  { %v2927_v47 = vpop.f32.mrf.mxu1 }
 0xc1d   :  { %v1772_v5 = vadd.f32 %v4307_v7, %v2927_v47 }
 0xc1e   :  { %v1763_v59 = vpop.f32.mrf.mxu1 }
 0xc1f   :  { %3231 = vtanh.f32 %v1772_v5  ;;  %v1764_v12 = vadd.f32 %v4310_v44, %v1763_v59 }
 0xc20   :  { %v2928_v29 = vpop.f32.mrf.mxu1 }
 0xc21   :  { %3233 = vtanh.f32 %v1764_v12  ;;  %v1775_v1 = vadd.f32 %v4313_v52, %v2928_v29 }
 0xc22   :  { %v1766_v55 = vpop.f32.mrf.mxu1 }
 0xc23   :  { %3235 = vtanh.f32 %v1775_v1  ;;  %v1767_v60 = vadd.f32 %v4316_v35, %v1766_v55 }
 0xc25   :  { %3237 = vtanh.f32 %v1767_v60 }
 0xc2c   :  { %v4793_v33 = vpop.eup %3231 }
 0xc2d   :  { %v1800_v38 = vmul.f32 %v4793_v33, %v4793_v33  ;;  %v1784_v35 = vsub.f32 %v4793_v33, %v4711_v2 }
 0xc2e   :  { %v4797_v41 = vpop.eup %3233 }
 0xc2f   :  { %5697 = vst [vmem:[#allocation48_spill] sm:$0xff] %v4797_v41  ;;  %1806 = vadd.xlane.f32.xlu0 %v1800_v38  ;;  %v1798_v52 = vmul.f32 %v4797_v41, %v4797_v41  ;;  %v1788_v59 = vmul.f32 %v1784_v35, %v1784_v35  ;;  %v1782_v2 = vsub.f32 %v4797_v41, %v4715_v9 }
 0xc30   :  { %v4799_v7 = vpop.eup %3235 }
 0xc31   :  { %v1801_v44 = vmul.f32 %v4799_v7, %v4799_v7  ;;  %v1851_v47 = vpack.c.bf16 %v4799_v7, %v4793_v33  ;;  %v1785_v12 = vsub.f32 %v4799_v7, %v4717_v20  ;;  %v1786_v55 = vmul.f32 %v1782_v2, %v1782_v2 }
 0xc32   :  { %v4807_v29 = vpop.eup %3237 }
 0xc33   :  { %5698 = vst [vmem:[#allocation49_spill] sm:$0xff] %v4807_v29  ;;  %1808 = vadd.xlane.f32.xlu1 %v1801_v44  ;;  %1802 = vadd.xlane.f32.xlu0 %v1798_v52  ;;  %v1850_v60 = vpack.c.bf16 %v4807_v29, %v4797_v41  ;;  %v1799_v5 = vmul.f32 %v4807_v29, %v4807_v29  ;;  %v4836_v44 = vpop.xlane.xlu0 %1667  ;;  %v4838_v52 = vpop.xlane.xlu1 %1669 }
 0xc34   :  { %v1789_v1 = vmul.f32 %v1785_v12, %v1785_v12  ;;  %v1783_v38 = vsub.f32 %v4807_v29, %v4725_v37  ;;  %5699 = vst [vmem:[#allocation50_spill] sm:$0xff] %v4836_v44  ;;  %5700 = vst [vmem:[#allocation51_spill] sm:$0xff] %v4838_v52 }
 0xc35   :  { %2945 = vmatprep.mubr.bf16.mxu0 %v1850_v60 }
 0xc36   :  { %2946 = vmatmul.mubr.bf16.vlgmr.msra.gmra.mxu0 %v1851_v47  ;;  %v1787_v20 = vmul.f32 %v1783_v38, %v1783_v38 }
 0xc37   :  { %1804 = vadd.xlane.f32.xlu1 %v1799_v5  ;;  %1794 = vadd.xlane.f32.xlu0 %v1788_v59 }
 0xc38   :  { %2970 = vmatpush3.bf16.msra.mxu0 %v4625_v43 }
 0xc39   :  { %2971 = vmatprep.subr.bf16.mxu0 %v4630_v15 }
 0xc3b   :  { %1796 = vadd.xlane.f32.xlu1 %v1789_v1  ;;  %1790 = vadd.xlane.f32.xlu0 %v1786_v55 }
 0xc3c   :  { %2972 = vmatpush3.bf16.msra.mxu0 %v4630_v15 }
 0xc3d   :  { %2973 = vmatprep.subr.bf16.mxu0 %v4634_v57 }
 0xc3f   :  { %1792 = vadd.xlane.f32.xlu1 %v1787_v20 }
 0xc40   :  { %2974 = vmatpush3.bf16.msra.mxu0 %v4634_v57 }
 0xc41   :  { %2975 = vmatprep.subr.bf16.mxu0 %v4638_v48 }
 0xc44   :  { %2976 = vmatpush3.bf16.msra.mxu0 %v4638_v48 }
 0xc45   :  { %2977 = vmatprep.subr.bf16.mxu0 %v4642_v56 }
 0xc48   :  { %2978 = vmatpush3.bf16.msra.mxu0 %v4642_v56 }
 0xc49   :  { %2979 = vmatprep.subr.bf16.mxu0 %v4646_v4 }
 0xc4c   :  { %2980 = vmatpush3.bf16.msra.mxu0 %v4646_v4 }
 0xc4d   :  { %2981 = vmatprep.subr.bf16.mxu0 %v4650_v26 }
 0xc50   :  { %2982 = vmatpush3.bf16.msra.mxu0 %v4650_v26 }
 0xc51   :  { %2983 = vmatprep.subr.bf16.mxu0 %v4654_v62 }
 0xc54   :  { %2984 = vmatpush3.bf16.msra.mxu0 %v4654_v62 }
 0xcb8   :  { %v4840_v35 = vpop.xlane.xlu0 %1806 }
 0xcbc   :  { %v4842_v60 = vpop.xlane.xlu1 %1808  ;;  %v4844_v47 = vpop.xlane.xlu0 %1802 }
 0xcc0   :  { %v4846_v5 = vpop.xlane.xlu1 %1804  ;;  %v4848_v59 = vpop.xlane.xlu0 %1794 }
 0xcc1   :  { %5701 = vst [vmem:[#allocation52_spill] sm:$0xff] %v4848_v59  ;;  %vm1824_vm10 = vcmp.lt.f32.partialorder %v4848_v59, %v4761_v14 }
 0xcc2   :  { %v4854_v12 = vsel %vm1824_vm10, %v4793_v33, %v4765_v54  ;;  %v4857_v2 = vsel %vm1824_vm10, 14, %v4768_v3 }
 0xcc4   :  { %v4859_v1 = vpop.xlane.xlu1 %1796 }
 0xcc5   :  { %5702 = vst [vmem:[#allocation53_spill] sm:$0xff] %v4859_v1  ;;  %vm1825_vm11 = vcmp.lt.f32.partialorder %v4859_v1, %v4772_v42  ;;  %v4865_v55 = vmin.f32 %v4772_v42, %v4859_v1  ;;  %v4880_v1 = vld [vmem:[#allocation7 + $0x18] sm:$0xff] }
 0xcc6   :  { %v4869_v38 = vsel %vm1825_vm11, %v4799_v7, %v4776_v24  ;;  %v4872_v20 = vsel %vm1825_vm11, 14, %v4779_v32  ;;  %v4883_v32 = vld [vmem:[#allocation7 + $0x8] sm:$0xff] }
 0xcf6   :  { %v2947_v54 = vpop.f32.mrf.mxu0 }
 0xcf7   :  { %v1895_v3 = vadd.f32 %v4874_v21, %v2947_v54 }
 0xcf8   :  { %v1886_v28 = vpop.f32.mrf.mxu0 }
 0xcf9   :  { %3239 = vtanh.f32 %v1895_v3  ;;  %v1887_v22 = vadd.f32 %v4877_v17, %v1886_v28 }
 0xcfa   :  { %v2948_v42 = vpop.f32.mrf.mxu0 }
 0xcfb   :  { %3241 = vtanh.f32 %v1887_v22  ;;  %v1898_v24 = vadd.f32 %v4880_v1, %v2948_v42 }
 0xcfc   :  { %v1889_v45 = vpop.f32.mrf.mxu0 }
 0xcfd   :  { %3243 = vtanh.f32 %v1898_v24  ;;  %v1890_v37 = vadd.f32 %v4883_v32, %v1889_v45 }
 0xcff   :  { %3245 = vtanh.f32 %v1890_v37 }
 0xd06   :  { %v4886_v54 = vpop.eup %3239 }
 0xd07   :  { %v1923_v3 = vmul.f32 %v4886_v54, %v4886_v54  ;;  %v1907_v45 = vsub.f32 %v4886_v54, %v4793_v33 }
 0xd08   :  { %v4890_v9 = vpop.eup %3241 }
 0xd09   :  { %5703 = vst [vmem:[#allocation54_spill] sm:$0xff] %v4890_v9  ;;  %1929 = vadd.xlane.f32.xlu0 %v1923_v3  ;;  %v1921_v42 = vmul.f32 %v4890_v9, %v4890_v9  ;;  %v1911_v52 = vmul.f32 %v1907_v45, %v1907_v45  ;;  %v1905_v33 = vsub.f32 %v4890_v9, %v4797_v41 }
 0xd0a   :  { %v4892_v28 = vpop.eup %3243 }
 0xd0b   :  { %v1924_v22 = vmul.f32 %v4892_v28, %v4892_v28  ;;  %v1974_v3 = vpack.c.bf16 %v4892_v28, %v4886_v54  ;;  %v1908_v44 = vsub.f32 %v4892_v28, %v4799_v7 }
 0xd0c   :  { %v4900_v37 = vpop.eup %3245 }
 0xd0d   :  { %5704 = vst [vmem:[#allocation55_spill] sm:$0xff] %v4900_v37  ;;  %1931 = vadd.xlane.f32.xlu1 %v1924_v22  ;;  %1925 = vadd.xlane.f32.xlu0 %v1921_v42  ;;  %v1973_v24 = vpack.c.bf16 %v4900_v37, %v4890_v9  ;;  %v1922_v27 = vmul.f32 %v4900_v37, %v4900_v37 }
 0xd0e   :  { %v1912_v22 = vmul.f32 %v1908_v44, %v1908_v44  ;;  %v1909_v42 = vmul.f32 %v1905_v33, %v1905_v33 }
 0xd0f   :  { %2965 = vmatprep.mubr.bf16.mxu1 %v1973_v24  ;;  %v1906_v24 = vsub.f32 %v4900_v37, %v4807_v29 }
 0xd10   :  { %2966 = vmatmul.mubr.bf16.vlgmr.msra.gmra.mxu1 %v1974_v3 }
 0xd11   :  { %1927 = vadd.xlane.f32.xlu1 %v1922_v27  ;;  %1917 = vadd.xlane.f32.xlu0 %v1911_v52  ;;  %v1910_v7 = vmul.f32 %v1906_v24, %v1906_v24  ;;  %v4931_v27 = vpop.xlane.xlu1 %1792 }
 0xd12   :  { %2990 = vmatpush3.bf16.msra.mxu1 %v4625_v43  ;;  %5706 = vst [vmem:[#allocation57_spill] sm:$0xff] %v4931_v27 }
 0xd13   :  { %2991 = vmatprep.subr.bf16.mxu1 %v4630_v15 }
 0xd15   :  { %1919 = vadd.xlane.f32.xlu1 %v1912_v22  ;;  %1913 = vadd.xlane.f32.xlu0 %v1909_v42 }
 0xd16   :  { %2992 = vmatpush3.bf16.msra.mxu1 %v4630_v15  ;;  %v4929_v15 = vpop.xlane.xlu0 %1790 }
 0xd17   :  { %2993 = vmatprep.subr.bf16.mxu1 %v4634_v57  ;;  %5705 = vst [vmem:[#allocation56_spill] sm:$0xff] %v4929_v15 }
 0xd19   :  { %1915 = vadd.xlane.f32.xlu1 %v1910_v7 }
 0xd1a   :  { %2994 = vmatpush3.bf16.msra.mxu1 %v4634_v57 }
 0xd1b   :  { %2995 = vmatprep.subr.bf16.mxu1 %v4638_v48 }
 0xd1e   :  { %2996 = vmatpush3.bf16.msra.mxu1 %v4638_v48 }
 0xd1f   :  { %2997 = vmatprep.subr.bf16.mxu1 %v4642_v56 }
 0xd22   :  { %2998 = vmatpush3.bf16.msra.mxu1 %v4642_v56  ;;  %v1844_v56 = vmin.f32 %v4761_v14, %v4848_v59 }
 0xd23   :  { %2999 = vmatprep.subr.bf16.mxu1 %v4646_v4 }
 0xd26   :  { %3000 = vmatpush3.bf16.msra.mxu1 %v4646_v4 }
 0xd27   :  { %3001 = vmatprep.subr.bf16.mxu1 %v4650_v26 }
 0xd2a   :  { %3002 = vmatpush3.bf16.msra.mxu1 %v4650_v26 }
 0xd2b   :  { %3003 = vmatprep.subr.bf16.mxu1 %v4654_v62 }
 0xd2e   :  { %3004 = vmatpush3.bf16.msra.mxu1 %v4654_v62 }
 0xd92   :  { %v4933_v43 = vpop.xlane.xlu0 %1929 }
 0xd96   :  { %v4935_v57 = vpop.xlane.xlu1 %1931  ;;  %v4937_v48 = vpop.xlane.xlu0 %1925 }
 0xd9a   :  { %v4941_v4 = vpop.xlane.xlu1 %1927  ;;  %v4943_v26 = vpop.xlane.xlu0 %1917 }
 0xd9b   :  { %vm1947_vm12 = vcmp.lt.f32.partialorder %v4943_v26, %v1844_v56 }
 0xd9c   :  { %v1959_v62 = vsel %vm1947_vm12, %v4886_v54, %v4854_v12  ;;  %v1963_v44 = vsel %vm1947_vm12, 15, %v4857_v2 }
 0xd9e   :  { %v4949_v52 = vpop.xlane.xlu1 %1919  ;;  %v4988_v59 = vpop.xlane.xlu0 %1913 }
 0xd9f   :  { %vm1948_vm13 = vcmp.lt.f32.partialorder %v4949_v52, %v4865_v55 }
 0xda0   :  { %v1960_v45 = vsel %vm1948_vm13, %v4892_v28, %v4869_v38  ;;  %v1964_v14 = vsel %vm1948_vm13, 15, %v4872_v20 }
 0xdd0   :  { %v2967_v3 = vpop.f32.mrf.mxu1 }
 0xdd1   :  { %v2018_v33 = vadd.f32 %v4874_v21, %v2967_v3 }
 0xdd2   :  { %v2009_v22 = vpop.f32.mrf.mxu1 }
 0xdd3   :  { %3247 = vtanh.f32 %v2018_v33  ;;  %v2010_v42 = vadd.f32 %v4877_v17, %v2009_v22 }
 0xdd4   :  { %v2968_v12 = vpop.f32.mrf.mxu1 }
 0xdd5   :  { %3249 = vtanh.f32 %v2010_v42  ;;  %v2021_v2 = vadd.f32 %v4880_v1, %v2968_v12 }
 0xdd6   :  { %v2012_v24 = vpop.f32.mrf.mxu1 }
 0xdd7   :  { %3251 = vtanh.f32 %v2021_v2  ;;  %v2013_v7 = vadd.f32 %v4883_v32, %v2012_v24 }
 0xdd9   :  { %3253 = vtanh.f32 %v2013_v7 }
 0xde0   :  { %v4960_v29 = vpop.eup %3247 }
 0xde1   :  { %v2046_v38 = vmul.f32 %v4960_v29, %v4960_v29  ;;  %v2030_v42 = vsub.f32 %v4960_v29, %v4886_v54 }
 0xde2   :  { %v4964_v20 = vpop.eup %3249 }
 0xde3   :  { %2052 = vadd.xlane.f32.xlu0 %v2046_v38  ;;  %v2044_v22 = vmul.f32 %v4964_v20, %v4964_v20  ;;  %v2034_v38 = vmul.f32 %v2030_v42, %v2030_v42  ;;  %v2028_v54 = vsub.f32 %v4964_v20, %v4890_v9  ;;  %v4990_v42 = vpop.xlane.xlu1 %1915 }
 0xde4   :  { %v4966_v3 = vpop.eup %3251 }
 0xde5   :  { %v2047_v33 = vmul.f32 %v4966_v3, %v4966_v3  ;;  %v2097_v24 = vpack.c.bf16 %v4966_v3, %v4960_v29  ;;  %v2031_v27 = vsub.f32 %v4966_v3, %v4892_v28 }
 0xde6   :  { %v4974_v12 = vpop.eup %3253 }
 0xde7   :  { %2054 = vadd.xlane.f32.xlu1 %v2047_v33  ;;  %2048 = vadd.xlane.f32.xlu0 %v2044_v22  ;;  %v2096_v2 = vpack.c.bf16 %v4974_v12, %v4964_v20  ;;  %v2045_v7 = vmul.f32 %v4974_v12, %v4974_v12  ;;  %v2035_v33 = vmul.f32 %v2031_v27, %v2031_v27 }
 0xde8   :  { %v2032_v22 = vmul.f32 %v2028_v54, %v2028_v54  ;;  %v2029_v41 = vsub.f32 %v4974_v12, %v4900_v37  ;;  %v4999_v27 = vmin.f32 %v1844_v56, %v4943_v26 }
 0xde9   :  { %2985 = vmatprep.mubr.bf16.mxu0 %v2096_v2 }
 0xdea   :  { %2986 = vmatmul.mubr.bf16.vlgmr.msra.gmra.mxu0 %v2097_v24  ;;  %v2033_v2 = vmul.f32 %v2029_v41, %v2029_v41  ;;  %5707 = vst [vmem:[#allocation58_spill] sm:$0xff] %v4999_v27 }
 0xdeb   :  { %2050 = vadd.xlane.f32.xlu1 %v2045_v7  ;;  %2040 = vadd.xlane.f32.xlu0 %v2034_v38 }
 0xdef   :  { %2042 = vadd.xlane.f32.xlu1 %v2035_v33  ;;  %2036 = vadd.xlane.f32.xlu0 %v2032_v22  ;;  %v5014_v33 = vmin.f32 %v4865_v55, %v4949_v52 }
 0xdf1   :  { %5711 = vst [vmem:[#allocation62_spill] sm:$0xff] %v5014_v33 }
 0xdf3   :  { %2038 = vadd.xlane.f32.xlu1 %v2033_v2 }
 0xe6c   :  { %v4992_v28 = vpop.xlane.xlu0 %2052 }
 0xe70   :  { %v4994_v15 = vpop.xlane.xlu1 %2054  ;;  %v4996_v24 = vpop.xlane.xlu0 %2048 }
 0xe74   :  { %v5001_v7 = vpop.xlane.xlu1 %2050  ;;  %v5003_v38 = vpop.xlane.xlu0 %2040 }
 0xe75   :  { %5708 = vst [vmem:[#allocation59_spill] sm:$0xff] %v5003_v38  ;;  %vm2070_vm14 = vcmp.lt.f32.partialorder %v5003_v38, %v4999_v27 }
 0xe76   :  { %v5008_v41 = vsel %vm2070_vm14, %v4960_v29, %v1959_v62  ;;  %v5010_v54 = vsel %vm2070_vm14, 16, %v1963_v44 }
 0xe77   :  { %5709 = vst [vmem:[#allocation60_spill] sm:$0xff] %v5008_v41  ;;  %5710 = vst [vmem:[#allocation61_spill] sm:$0xff] %v5010_v54 }
 0xe78   :  { %v5016_v22 = vpop.xlane.xlu1 %2042 }
 0xe79   :  { %5712 = vst [vmem:[#allocation63_spill] sm:$0xff] %v5016_v22  ;;  %vm2071_vm15 = vcmp.lt.f32.partialorder %v5016_v22, %v5014_v33 }
 0xe7a   :  { %v5021_v56 = vsel %vm2071_vm15, %v4966_v3, %v1960_v45  ;;  %v5023_v2 = vsel %vm2071_vm15, 16, %v1964_v14 }
 0xe7b   :  { %5713 = vst [vmem:[#allocation64_spill] sm:$0xff] %v5021_v56  ;;  %5714 = vst [vmem:[#allocation65_spill] sm:$0xff] %v5023_v2 }
 0xeaa   :  { %v2987_v27 = vpop.f32.mrf.mxu0 }
 0xeab   :  { %v2141_v62 = vadd.f32 %v4874_v21, %v2987_v27 }
 0xeac   :  { %v2132_v41 = vpop.f32.mrf.mxu0 }
 0xead   :  { %3255 = vtanh.f32 %v2141_v62  ;;  %v2133_v44 = vadd.f32 %v4877_v17, %v2132_v41 }
 0xeae   :  { %v2988_v54 = vpop.f32.mrf.mxu0 }
 0xeaf   :  { %3257 = vtanh.f32 %v2133_v44  ;;  %v2144_v55 = vadd.f32 %v4880_v1, %v2988_v54 }
 0xeb0   :  { %v2135_v38 = vpop.f32.mrf.mxu0 }
 0xeb1   :  { %3259 = vtanh.f32 %v2144_v55  ;;  %v2136_v33 = vadd.f32 %v4883_v32, %v2135_v38 }
 0xeb3   :  { %3261 = vtanh.f32 %v2136_v33 }
 0xeba   :  { %v5029_v45 = vpop.eup %3255 }
 0xebb   :  { %v2169_v14 = vmul.f32 %v5029_v45, %v5029_v45 }
 0xebc   :  { %v5033_v2 = vpop.eup %3257 }
 0xebd   :  { %2175 = vadd.xlane.f32.xlu0 %v2169_v14  ;;  %v2167_v54 = vmul.f32 %v5033_v2, %v5033_v2 }
 0xebe   :  { %v5035_v27 = vpop.eup %3259 }
 0xebf   :  { %v2170_v41 = vmul.f32 %v5035_v27, %v5035_v27  ;;  %v2220_v33 = vpack.c.bf16 %v5035_v27, %v5029_v45 }
 0xec0   :  { %v5041_v62 = vpop.eup %3261 }
 0xec1   :  { %2177 = vadd.xlane.f32.xlu1 %v2170_v41  ;;  %2171 = vadd.xlane.f32.xlu0 %v2167_v54  ;;  %v2219_v38 = vpack.c.bf16 %v5041_v62, %v5033_v2  ;;  %v2168_v44 = vmul.f32 %v5041_v62, %v5041_v62 }
 0xec3   :  { %3005 = vmatprep.mubr.bf16.mxu1 %v2219_v38 }
 0xec4   :  { %3006 = vmatmul.mubr.bf16.vlgmr.msra.gmra.mxu1 %v2220_v33 }
 0xec5   :  { %2173 = vadd.xlane.f32.xlu1 %v2168_v44 }
 0xf84   :  { %v3007_v55 = vpop.f32.mrf.mxu1 }
 0xf85   :  { %v2264_v14 = vadd.f32 %v4874_v21, %v3007_v55  ;;  %v2152_v55 = vsub.f32 %v5041_v62, %v4974_v12 }
 0xf86   :  { %v2255_v56 = vpop.f32.mrf.mxu1 }
 0xf87   :  { %3263 = vtanh.f32 %v2264_v14  ;;  %v2256_v41 = vadd.f32 %v4877_v17, %v2255_v56  ;;  %v2153_v14 = vsub.f32 %v5029_v45, %v4960_v29 }
 0xf88   :  { %v3008_v54 = vpop.f32.mrf.mxu1 }
 0xf89   :  { %3265 = vtanh.f32 %v2256_v41  ;;  %v2267_v22 = vadd.f32 %v4880_v1, %v3008_v54  ;;  %v2156_v41 = vmul.f32 %v2152_v55, %v2152_v55  ;;  %v2157_v54 = vmul.f32 %v2153_v14, %v2153_v14 }
 0xf8a   :  { %v2258_v37 = vpop.f32.mrf.mxu1  ;;  %v243_v14 = vmin.f32 %v3927_v61, 1e+20  ;;  %v5727_v61 = vld [vmem:[#allocation21_spill] sm:$0xff] }
 0xf8b   :  { %3267 = vtanh.f32 %v2267_v22  ;;  %v2259_v38 = vadd.f32 %v4883_v32, %v2258_v37  ;;  %v2151_v32 = vsub.f32 %v5033_v2, %v4964_v20 }
 0xf8c   :  { %vm5091_vm2 = vcmp.lt.f32.partialorder %v5652_v25, %v243_v14 }
 0xf8d   :  { %3269 = vtanh.f32 %v2259_v38  ;;  %v2155_v56 = vmul.f32 %v2151_v32, %v2151_v32  ;;  %v2154_v38 = vsub.f32 %v5035_v27, %v4966_v3 }
 0xf94   :  { %v5053_v9 = vpop.eup %3263 }
 0xf95   :  { %v2292_v33 = vmul.f32 %v5053_v9, %v5053_v9  ;;  %v2276_v29 = vsub.f32 %v5053_v9, %v5029_v45 }
 0xf96   :  { %v5057_v44 = vpop.eup %3265 }
 0xf97   :  { %2298 = vadd.xlane.f32.xlu0 %v2292_v33  ;;  %v2290_v1 = vmul.f32 %v5057_v44, %v5057_v44  ;;  %v2274_v33 = vsub.f32 %v5057_v44, %v5033_v2 }
 0xf98   :  { %v5059_v21 = vpop.eup %3267 }
 0xf99   :  { %5715 = vst [vmem:[#allocation66_spill] sm:$0xff] %v5059_v21  ;;  %v2293_v17 = vmul.f32 %v5059_v21, %v5059_v21  ;;  %v2277_v3 = vsub.f32 %v5059_v21, %v5035_v27  ;;  %v5723_v21 = vld [vmem:[#allocation17_spill] sm:$0xff] }
 0xf9a   :  { %v5067_v37 = vpop.eup %3269 }
 0xf9b   :  { %2300 = vadd.xlane.f32.xlu1 %v2293_v17  ;;  %2294 = vadd.xlane.f32.xlu0 %v2290_v1  ;;  %v2291_v22 = vmul.f32 %v5067_v37, %v5067_v37  ;;  %v2158_v17 = vmul.f32 %v2154_v38, %v2154_v38  ;;  %v2278_v1 = vmul.f32 %v2274_v33, %v2274_v33  ;;  %v5726_v38 = vld [vmem:[#allocation20_spill] sm:$0xff] }
 0xf9c   :  { %v2275_v32 = vsub.f32 %v5067_v37, %v5041_v62  ;;  %v2281_v55 = vmul.f32 %v2277_v3, %v2277_v3  ;;  %v5722_v3 = vld [vmem:[#allocation16_spill] sm:$0xff] }
 0xf9f   :  { %2296 = vadd.xlane.f32.xlu1 %v2291_v22  ;;  %2159 = vadd.xlane.f32.xlu0 %v2155_v56  ;;  %v2279_v22 = vmul.f32 %v2275_v32, %v2275_v32  ;;  %v2280_v56 = vmul.f32 %v2276_v29, %v2276_v29  ;;  %v3357_v32 = vld [vmem:[#allocation2] sm:$0xff] }
 0xfa0   :  { %v5719_v29 = vld [vmem:[#allocation15_spill] sm:$0xff] }
 0xfa3   :  { %2161 = vadd.xlane.f32.xlu1 %v2156_v41  ;;  %2163 = vadd.xlane.f32.xlu0 %v2157_v54  ;;  %v244_v41 = vmin.f32 %v5653_v6, 1e+20  ;;  %v366_v54 = vmin.f32 %v243_v14, %v5652_v25  ;;  %v3358_v25 = vld [vmem:[#allocation2 + $0x8] sm:$0xff] }
 0xfa5   :  { %v367_v33 = vmin.f32 %v244_v41, %v5655_v31  ;;  %vm5099_vm3 = vcmp.lt.f32.partialorder %v5655_v31, %v244_v41  ;;  %v489_v6 = vmin.f32 %v366_v54, %v5654_v40  ;;  %vm469_vm4 = vcmp.lt.f32.partialorder %v5654_v40, %v366_v54 }
 0xfa7   :  { %2165 = vadd.xlane.f32.xlu1 %v2158_v17  ;;  %2282 = vadd.xlane.f32.xlu0 %v2278_v1  ;;  %v5718_v17 = vmov 0   ;;  %v490_v14 = vmin.f32 %v367_v33, %v5657_v63  ;;  %vm470_vm5 = vcmp.lt.f32.partialorder %v5657_v63, %v367_v33  ;;  %v612_v41 = vmin.f32 %v489_v6, %v5656_v49 }
 0xfa8   :  { %v231_v1 = vsel %vm227_vm0, 1, %v5718_v17  ;;  %vm592_vm6 = vcmp.lt.f32.partialorder %v5656_v49, %v489_v6  ;;  %v5728_v6 = vld [vmem:[#allocation22_spill] sm:$0xff] }
 0xfa9   :  { %v362_v31 = vsel %vm5091_vm2, 2, %v231_v1  ;;  %v613_v54 = vmin.f32 %v490_v14, %v5660_v23  ;;  %vm593_vm7 = vcmp.lt.f32.partialorder %v5660_v23, %v490_v14  ;;  %v735_v63 = vmin.f32 %v612_v41, %v5658_v46  ;;  %v5729_v14 = vld [vmem:[#allocation24_spill] sm:$0xff] }
 0xfaa   :  { %vm715_vm8 = vcmp.lt.f32.partialorder %v5658_v46, %v612_v41  ;;  %v1687_v23 = vadd.f32 1e-18, %v4755_v50  ;;  %v1688_v41 = vadd.f32 1e-18, %v4757_v13  ;;  %v1812_v13 = vadd.f32 1e-18, %v4840_v35 }
 0xfab   :  { %2284 = vadd.xlane.f32.xlu1 %v2279_v22  ;;  %2286 = vadd.xlane.f32.xlu0 %v2280_v56  ;;  %v239_v22 = vsel %vm227_vm0, %v5719_v29, %v3357_v32  ;;  %v232_v56 = vsel %vm228_vm1, 1, %v5718_v17  ;;  %v5724_v29 = vld [vmem:[#allocation18_spill] sm:$0xff]  ;;  %vm716_vm9 = vcmp.lt.f32.partialorder %v5662_v8, %v613_v54  ;;  %vm838_vm10 = vcmp.lt.f32.partialorder %v5661_v18, %v735_v63 }
 0xfac   :  { %v358_v32 = vsel %vm5091_vm2, %v5723_v21, %v239_v22  ;;  %v363_v40 = vsel %vm5099_vm3, 2, %v232_v56  ;;  %v485_v22 = vsel %vm469_vm4, 3, %v362_v31  ;;  %v858_v46 = vmin.f32 %v735_v63, %v5661_v18 }
 0xfad   :  { %v486_v1 = vsel %vm470_vm5, 3, %v363_v40  ;;  %v608_v49 = vsel %vm592_vm6, 4, %v485_v22  ;;  %3271 = vrcp.f32 %v1687_v23 }
 0xfae   :  { %vm961_vm12 = vcmp.lt.f32.partialorder %v4190_v51, %v858_v46  ;;  %v981_v50 = vmin.f32 %v858_v46, %v4190_v51  ;;  %3273 = vrcp.f32 %v1688_v41  ;;  %v1810_v51 = vadd.f32 1e-18, %v4844_v47 }
 0xfaf   :  { %2288 = vadd.xlane.f32.xlu1 %v2281_v55  ;;  %v240_v55 = vsel %vm228_vm1, %v5722_v3, %v3358_v25  ;;  %v5725_v25 = vld [vmem:[#allocation19_spill] sm:$0xff]  ;;  %v736_v3 = vmin.f32 %v613_v54, %v5662_v8  ;;  %v5731_v8 = vld [vmem:[#allocation25_spill] sm:$0xff]  ;;  %3275 = vrcp.f32 %v1812_v13  ;;  %v1933_v41 = vadd.f32 1e-18, %v4937_v48  ;;  %v5185_v48 = vpop.xlane.xlu1 %2038 }
 0xfb0   :  { %v359_v17 = vsel %vm5099_vm3, %v5724_v29, %v240_v55  ;;  %v481_v21 = vsel %vm469_vm4, %v5725_v25, %v358_v32  ;;  %v609_v32 = vsel %vm593_vm7, 4, %v486_v1  ;;  %v731_v29 = vsel %vm715_vm8, 5, %v608_v49 }
 0xfb1   :  { %v482_v33 = vsel %vm470_vm5, %v5726_v38, %v359_v17  ;;  %v604_v56 = vsel %vm592_vm6, %v5727_v61, %v481_v21  ;;  %vm839_vm11 = vcmp.lt.f32.partialorder %v5663_v11, %v736_v3  ;;  %v5730_v17 = vld [vmem:[#allocation28_spill] sm:$0xff]  ;;  %v732_v25 = vsel %vm716_vm9, 5, %v609_v32  ;;  %v5732_v38 = vld [vmem:[#allocation29_spill] sm:$0xff]  ;;  %v5733_v61 = vld [vmem:[#allocation30_spill] sm:$0xff] }
 0xfb2   :  { %v605_v55 = vsel %vm593_vm7, %v5728_v6, %v482_v33  ;;  %v727_v31 = vsel %vm715_vm8, %v5729_v14, %v604_v56  ;;  %v859_v21 = vmin.f32 %v736_v3, %v5663_v11  ;;  %v854_v22 = vsel %vm838_vm10, 6, %v731_v29  ;;  %v5734_v6 = vld [vmem:[#allocation31_spill] sm:$0xff] }
 0xfb3   :  { %v850_v40 = vsel %vm838_vm10, %v5730_v17, %v727_v31  ;;  %v728_v54 = vsel %vm716_vm9, %v5731_v8, %v605_v55  ;;  %v855_v63 = vsel %vm839_vm11, 6, %v732_v25  ;;  %vm1084_vm14 = vcmp.lt.f32.partialorder %v4296_v19, %v981_v50  ;;  %v5735_v31 = vld [vmem:[#allocation43_spill] sm:$0xff]  ;;  %v5739_v25 = vld [vmem:[#allocation26_spill] sm:$0xff] }
 0xfb4   :  { %v851_v33 = vsel %vm839_vm11, %v5732_v38, %v728_v54  ;;  %vm962_vm13 = vcmp.lt.f32.partialorder %v4211_v36, %v859_v21  ;;  %v982_v18 = vmin.f32 %v859_v21, %v4211_v36  ;;  %v1813_v1 = vadd.f32 1e-18, %v4842_v60  ;;  %v5737_v17 = vld [vmem:[#allocation23_spill] sm:$0xff] }
 0xfb5   :  { %v973_v56 = vsel %vm961_vm12, %v5733_v61, %v850_v40  ;;  %v977_v49 = vsel %vm961_vm12, 7, %v854_v22  ;;  %v974_v36 = vsel %vm962_vm13, %v5734_v6, %v851_v33  ;;  %v978_v55 = vsel %vm962_vm13, 7, %v855_v63  ;;  %v5738_v40 = vld [vmem:[#allocation27_spill] sm:$0xff] }
 0xfb6   :  { %vm1085_vm15 = vcmp.lt.f32.partialorder %v4302_v0, %v982_v18  ;;  %v1104_v35 = vmin.f32 %v981_v50, %v4296_v19  ;;  %v1811_v11 = vadd.f32 1e-18, %v4846_v5  ;;  %v1096_v3 = vsel %vm1084_vm14, %v4049_v16, %v973_v56  ;;  %v5740_v22 = vld [vmem:[#allocation35_spill] sm:$0xff]  ;;  %v5741_v50 = vld [vmem:[#allocation34_spill] sm:$0xff] }
 0xfb7   :  { %v1100_v32 = vsel %vm1084_vm14, 8, %v977_v49  ;;  %v1105_v23 = vmin.f32 %v982_v18, %v4302_v0  ;;  %v1097_v60 = vsel %vm1085_vm15, %v4055_v34, %v974_v36  ;;  %3277 = vrcp.f32 %v1813_v1  ;;  %v5168_v0 = vpop.xlane.xlu0 %2036  ;;  %v5736_v34 = vld [vmem:[#allocation41_spill] sm:$0xff]  ;;  %v5742_v18 = vld [vmem:[#allocation42_spill] sm:$0xff] }
 0xfb8   :  { %vm1207_vm0 = vcmp.lt.f32.partialorder %v4393_v39, %v1104_v35  ;;  %v1227_v14 = vmin.f32 %v1104_v35, %v4393_v39  ;;  %v1101_v47 = vsel %vm1085_vm15, 8, %v978_v55  ;;  %3279 = vrcp.f32 %v1810_v51  ;;  %v5743_v51 = vld [vmem:[#allocation33_spill] sm:$0xff]  ;;  %v5744_v55 = vld [vmem:[#allocation32_spill] sm:$0xff] }
 0xfb9   :  { %vm1208_vm1 = vcmp.lt.f32.partialorder %v5735_v31, %v1105_v23  ;;  %v1935_v19 = vadd.f32 1e-18, %v4933_v43  ;;  %v1228_v5 = vmin.f32 %v1105_v23, %v5735_v31  ;;  %3281 = vrcp.f32 %v1811_v11 }
 0xfba   :  { %vm1330_vm2 = vcmp.lt.f32.partialorder %v4487_v58, %v1227_v14  ;;  %v1936_v16 = vadd.f32 1e-18, %v4935_v57  ;;  %v1219_v29 = vsel %vm1207_vm0, %v5736_v34, %v1096_v3  ;;  %v1223_v46 = vsel %vm1207_vm0, 9, %v1100_v32  ;;  %v3272_v1 = vpop.eup %3271  ;;  %v2178_v3 = vpop.xlane.xlu1 %2177 }
 0xfbb   :  { %v1350_v39 = vmin.f32 %v1227_v14, %v4487_v58  ;;  %v1220_v43 = vsel %vm1208_vm1, %v5737_v17, %v1097_v60  ;;  %vm1331_vm3 = vcmp.lt.f32.partialorder %v5738_v40, %v1228_v5  ;;  %v1351_v8 = vmin.f32 %v1228_v5, %v5738_v40  ;;  %v3274_v49 = vpop.eup %3273  ;;  %v5749_v40 = vld [vmem:[#allocation40_spill] sm:$0xff] }
 0xfbc   :  { %v1934_v54 = vadd.f32 1e-18, %v4941_v4  ;;  %v1224_v57 = vsel %vm1208_vm1, 9, %v1101_v47  ;;  %v1342_v21 = vsel %vm1330_vm2, %v5739_v25, %v1219_v29  ;;  %3283 = vrcp.f32 %v1935_v19  ;;  %v2176_v4 = vpop.xlane.xlu0 %2175  ;;  %v5746_v47 = vld [vmem:[#allocation51_spill] sm:$0xff]  ;;  %v3276_v19 = vpop.eup %3275  ;;  %v5747_v29 = vld [vmem:[#allocation37_spill] sm:$0xff] }
 0xfbd   :  { %v1473_v38 = vmin.f32 %v1350_v39, %v5740_v22  ;;  %v1346_v33 = vsel %vm1330_vm2, 10, %v1223_v46  ;;  %vm1453_vm4 = vcmp.lt.f32.partialorder %v5740_v22, %v1350_v39  ;;  %vm1454_vm5 = vcmp.lt.f32.partialorder %v5741_v50, %v1351_v8  ;;  %v5748_v39 = vld [vmem:[#allocation44_spill] sm:$0xff] }
 0xfbe   :  { %3285 = vrcp.f32 %v1936_v16  ;;  %v1343_v13 = vsel %vm1331_vm3, %v5742_v18, %v1220_v43  ;;  %v1474_v63 = vmin.f32 %v1351_v8, %v5741_v50  ;;  %v1347_v58 = vsel %vm1331_vm3, 10, %v1224_v57  ;;  %v5752_v50 = vld [vmem:[#allocation38_spill] sm:$0xff] }
 0xfbf   :  { %vm1576_vm6 = vcmp.lt.f32.partialorder %v4686_v53, %v1473_v38  ;;  %3287 = vrcp.f32 %v1933_v41  ;;  %v1596_v61 = vmin.f32 %v1473_v38, %v4686_v53  ;;  %v2058_v56 = vadd.f32 1e-18, %v4992_v28  ;;  %v5745_v28 = vld [vmem:[#allocation50_spill] sm:$0xff] }
 0xfc0   :  { %3289 = vrcp.f32 %v1934_v54  ;;  %v1465_v6 = vsel %vm1453_vm4, %v5743_v51, %v1342_v21  ;;  %v1469_v36 = vsel %vm1453_vm4, 11, %v1346_v33  ;;  %v1466_v35 = vsel %vm1454_vm5, %v5744_v55, %v1343_v13  ;;  %v5750_v54 = vld [vmem:[#allocation56_spill] sm:$0xff]  ;;  %v2174_v33 = vpop.xlane.xlu1 %2173 }
 0xfc1   :  { %v1597_v11 = vmin.f32 %v1474_v63, %v4699_v10  ;;  %v1470_v32 = vsel %vm1454_vm5, 11, %v1347_v58  ;;  %v1588_v23 = vsel %vm1576_vm6, %v4603_v30, %v1465_v6  ;;  %vm1577_vm7 = vcmp.lt.f32.partialorder %v4699_v10, %v1474_v63  ;;  %v2172_v10 = vpop.xlane.xlu0 %2171  ;;  %v5753_v13 = vld [vmem:[#allocation52_spill] sm:$0xff]  ;;  %v5756_v6 = vld [vmem:[#allocation57_spill] sm:$0xff] }
 0xfc2   :  { %vm1699_vm8 = vcmp.lt.f32.partialorder %v5745_v28, %v1596_v61  ;;  %v1592_v60 = vsel %vm1576_vm6, 12, %v1469_v36  ;;  %v1695_v14 = vmul.f32 %v3272_v1, %v5745_v28  ;;  %v2056_v31 = vadd.f32 1e-18, %v4996_v24 }
 0xfc3   :  { %vm1700_vm9 = vcmp.lt.f32.partialorder %v5746_v47, %v1597_v11  ;;  %v1719_v5 = vmin.f32 %v1596_v61, %v5745_v28  ;;  %v1696_v16 = vmul.f32 %v3274_v49, %v5746_v47  ;;  %3291 = vrcp.f32 %v2058_v56  ;;  %v5754_v61 = vld [vmem:[#allocation53_spill] sm:$0xff] }
 0xfc4   :  { %v2059_v30 = vadd.f32 1e-18, %v4994_v15  ;;  %v3278_v34 = vpop.eup %3277  ;;  %v1589_v46 = vsel %vm1577_vm7, %v5747_v29, %v1466_v35  ;;  %v1593_v53 = vsel %vm1577_vm7, 12, %v1470_v32  ;;  %v1711_v41 = vsel %vm1699_vm8, %v5748_v39, %v1588_v23  ;;  %v5751_v15 = vld [vmem:[#allocation46_spill] sm:$0xff]  ;;  %v5762_v39 = vld [vmem:[#allocation47_spill] sm:$0xff] }
 0xfc5   :  { %v1715_v17 = vsel %vm1699_vm8, 13, %v1592_v60  ;;  %v3280_v43 = vpop.eup %3279  ;;  %v1712_v24 = vsel %vm1700_vm9, %v5749_v40, %v1589_v46  ;;  %v1720_v8 = vmin.f32 %v1597_v11, %v5746_v47  ;;  %vm1822_vm10 = vcmp.lt.f32.partialorder %v5750_v54, %v1719_v5  ;;  %v5758_v47 = vld [vmem:[#allocation45_spill] sm:$0xff] }
 0xfc6   :  { %v2181_v57 = vadd.f32 1e-18, %v2176_v4  ;;  %v3282_v25 = vpop.eup %3281  ;;  %v1723_v21 = vmin.f32 %v5751_v15, %v1695_v14  ;;  %v1716_v22 = vsel %vm1700_vm9, 13, %v1593_v53  ;;  %3293 = vrcp.f32 %v2056_v31  ;;  %v5755_v4 = vld [vmem:[#allocation48_spill] sm:$0xff]  ;;  %v5761_v53 = vld [vmem:[#allocation39_spill] sm:$0xff] }
 0xfc7   :  { %v2057_v38 = vadd.f32 1e-18, %v5001_v7  ;;  %v1724_v18 = vmin.f32 %v5752_v50, %v1696_v16  ;;  %v1820_v63 = vmul.f32 %v3276_v19, %v5753_v13  ;;  %3295 = vrcp.f32 %v2059_v30  ;;  %v5757_v14 = vld [vmem:[#allocation36_spill] sm:$0xff]  ;;  %v5760_v16 = vld [vmem:[#allocation49_spill] sm:$0xff] }
 0xfc8   :  { %v2179_v1 = vadd.f32 1e-18, %v2172_v10  ;;  %v1821_v56 = vmul.f32 %v3278_v34, %v5754_v61  ;;  %v1834_v49 = vsel %vm1822_vm10, %v5755_v4, %v1711_v41  ;;  %v1842_v51 = vmin.f32 %v1719_v5, %v5750_v54  ;;  %v5766_v4 = vld [vmem:[#allocation59_spill] sm:$0xff] }
 0xfc9   :  { %vm1823_vm11 = vcmp.lt.f32.partialorder %v5756_v6, %v1720_v8  ;;  %v3284_v36 = vpop.eup %3283  ;;  %v1818_v7 = vmul.f32 %v3280_v43, %v5750_v54  ;;  %v1819_v55 = vmul.f32 %v3282_v25, %v5756_v6  ;;  %3297 = vrcp.f32 %v2181_v57  ;;  %v5764_v25 = vld [vmem:[#allocation54_spill] sm:$0xff] }
 0xfca   :  { %v2180_v35 = vadd.f32 1e-18, %v2174_v33  ;;  %v1838_v32 = vsel %vm1822_vm10, 14, %v1715_v17  ;;  %v1843_v23 = vmin.f32 %v1720_v8, %v5756_v6  ;;  %3299 = vrcp.f32 %v2057_v38 }
 0xfcb   :  { %v3286_v11 = vpop.eup %3285  ;;  %v5759_v31 = vmin.f32 %v5757_v14, %v5758_v47  ;;  %v1835_v30 = vsel %vm1823_vm11, %v5760_v16, %v1712_v24  ;;  %v1839_v10 = vsel %vm1823_vm11, 14, %v1716_v22  ;;  %3301 = vrcp.f32 %v2179_v1 }
 0xfcc   :  { %v3288_v60 = vpop.eup %3287  ;;  %v5763_v5 = vmin.f32 %v5761_v53, %v5762_v39  ;;  %vm1945_vm12 = vcmp.lt.f32.partialorder %v4988_v59, %v1842_v51  ;;  %v2182_v17 = vadd.f32 1e-18, %v2178_v3  ;;  %v5254_v40 = vmin.f32 %v1723_v21, %v1818_v7 }
 0xfcd   :  { %v1848_v19 = vmin.f32 %v5759_v31, %v1820_v63  ;;  %v3290_v46 = vpop.eup %3289  ;;  %v5256_v8 = vmin.f32 %v1724_v18, %v1819_v55  ;;  %v1943_v24 = vmul.f32 %v3284_v36, %v4943_v26  ;;  %3303 = vrcp.f32 %v2180_v35  ;;  %v5765_v18 = vld [vmem:[#allocation55_spill] sm:$0xff] }
 0xfce   :  { %v5251_v41 = vmin.f32 %v5763_v5, %v1821_v56  ;;  %v5260_v54 = vmul.f32 %v3286_v11, %v4949_v52  ;;  %v1941_v57 = vmul.f32 %v3288_v60, %v4988_v59  ;;  %vm1946_vm13 = vcmp.lt.f32.partialorder %v4990_v42, %v1843_v23  ;;  %v5768_v11 = vld [vmem:[#allocation63_spill] sm:$0xff] }
 0xfcf   :  { %v1957_v3 = vsel %vm1945_vm12, %v5764_v25, %v1834_v49  ;;  %v1965_v15 = vmin.f32 %v1842_v51, %v4988_v59  ;;  %v5269_v21 = vmul.f32 %v3290_v46, %v4990_v42  ;;  %v1961_v38 = vsel %vm1945_vm12, 15, %v1838_v32  ;;  %v5767_v51 = vld [vmem:[#allocation58_spill] sm:$0xff] }
 0xfd0   :  { %v3292_v52 = vpop.eup %3291  ;;  %v5276_v33 = vmin.f32 %v1843_v23, %v4990_v42  ;;  %v1958_v13 = vsel %vm1946_vm13, %v5765_v18, %v1835_v30  ;;  %v5279_v63 = vsel %vm1946_vm13, 15, %v1839_v10  ;;  %v1972_v61 = vmin.f32 %v5251_v41, %v5260_v54  ;;  %v5769_v32 = vld [vmem:[#allocation62_spill] sm:$0xff]  ;;  %v5771_v30 = vld [vmem:[#allocation61_spill] sm:$0xff] }
 0xfd1   :  { %vm2068_vm14 = vcmp.lt.f32.partialorder %v5168_v0, %v1965_v15  ;;  %v1969_v56 = vmin.f32 %v5254_v40, %v1941_v57  ;;  %v1970_v42 = vmin.f32 %v5256_v8, %v5269_v21  ;;  %v2066_v49 = vmul.f32 %v3292_v52, %v5766_v4 }
 0xfd2   :  { %v2090_v6 = vmin.f32 %v5767_v51, %v5766_v4  ;;  %v5291_v36 = vmin.f32 %v1965_v15, %v5168_v0  ;;  %v5297_v23 = vmin.f32 %v5769_v32, %v5768_v11  ;;  %v5304_v60 = vsel %vm2068_vm14, 16, %v1961_v38  ;;  %v5773_v15 = vld [vmem:[#allocation65_spill] sm:$0xff] }
 0xfd3   :  { %v3294_v59 = vpop.eup %3293  ;;  %vm2069_vm15 = vcmp.lt.f32.partialorder %v5185_v48, %v5276_v33  ;;  %v5310_v14 = vmin.f32 %v5276_v33, %v5185_v48 }
 0xfd4   :  { %v3296_v35 = vpop.eup %3295  ;;  %v2064_v31 = vmul.f32 %v3294_v59, %v5168_v0  ;;  %v2081_v53 = vsel %vm2069_vm15, %v4974_v12, %v1958_v13 }
 0xfd5   :  { %v2067_v46 = vmul.f32 %v3296_v35, %v5768_v11 }
 0xfd6   :  { %v3298_v47 = vpop.eup %3297  ;;  %v2092_v57 = vmin.f32 %v1969_v56, %v2064_v31 }
0x1020   :  { %v2299_v58 = vpop.xlane.xlu0 %2298 }
0x1021   :  { %v2304_v28 = vadd.f32 1e-18, %v2299_v58  ;;  %v1971_v58 = vmin.f32 %v1848_v19, %v1943_v24  ;;  %v5770_v19 = vld [vmem:[#allocation60_spill] sm:$0xff] }
0x1023   :  { %3305 = vrcp.f32 %v2304_v28  ;;  %v2080_v28 = vsel %vm2068_vm14, %v4964_v20, %v1957_v3 }
0x1024   :  { %v2301_v34 = vpop.xlane.xlu1 %2300  ;;  %v2295_v29 = vpop.xlane.xlu0 %2294 }
0x1025   :  { %v2302_v43 = vadd.f32 1e-18, %v2295_v29  ;;  %v2305_v1 = vadd.f32 1e-18, %v2301_v34  ;;  %v3300_v34 = vpop.eup %3299  ;;  %v2094_v29 = vmin.f32 %v1971_v58, %v2066_v49 }
0x1026   :  { %v2065_v25 = vmul.f32 %v3300_v34, %v5185_v48 }
0x1027   :  { %3307 = vrcp.f32 %v2302_v43  ;;  %v5772_v43 = vld [vmem:[#allocation64_spill] sm:$0xff] }
0x1028   :  { %v2297_v26 = vpop.xlane.xlu1 %2296  ;;  %v5271_v22 = vpop.xlane.xlu0 %2159  ;;  %3309 = vrcp.f32 %v2182_v17 }
0x1029   :  { %v2303_v50 = vadd.f32 1e-18, %v2297_v26  ;;  %vm2191_vm0 = vcmp.lt.f32.partialorder %v5271_v22, %v5291_v36  ;;  %v5317_v20 = vmin.f32 %v5291_v36, %v5271_v22  ;;  %v3302_v17 = vpop.eup %3301 }
0x102a   :  { %v2187_v12 = vmul.f32 %v3302_v17, %v5271_v22  ;;  %v3304_v24 = vpop.eup %3303 }
0x102b   :  { %3311 = vrcp.f32 %v2303_v50 }
0x102c   :  { %v5293_v7 = vpop.xlane.xlu1 %2161  ;;  %v2164_v55 = vpop.xlane.xlu0 %2163  ;;  %3313 = vrcp.f32 %v2305_v1  ;;  %v2215_v59 = vmin.f32 %v2092_v57, %v2187_v12 }
0x102d   :  { %vm2193_vm1 = vcmp.lt.f32.partialorder %v2164_v55, %v2090_v6  ;;  %v2189_v39 = vmul.f32 %v3298_v47, %v2164_v55  ;;  %vm2192_vm2 = vcmp.lt.f32.partialorder %v5293_v7, %v5310_v14  ;;  %v2212_v3 = vmin.f32 %v5310_v14, %v5293_v7 }
0x102e   :  { %v2205_v16 = vsel %vm2193_vm1, %v5029_v45, %v5770_v19  ;;  %v2209_v10 = vsel %vm2193_vm1, 17, %v5771_v30  ;;  %v2203_v45 = vsel %vm2191_vm0, %v5033_v2, %v2080_v28  ;;  %v2188_v26 = vmul.f32 %v3304_v24, %v5293_v7 }
0x102f   :  { %v2217_v52 = vmin.f32 %v2094_v29, %v2189_v39  ;;  %v2213_v38 = vmin.f32 %v2090_v6, %v2164_v55  ;;  %v2085_v19 = vsel %vm2069_vm15, 16, %v5279_v63 }
0x1030   :  { %v2166_v0 = vpop.xlane.xlu1 %2165  ;;  %v5327_v5 = vpop.xlane.xlu0 %2282  ;;  %v2208_v41 = vsel %vm2192_vm2, 17, %v2085_v19 }
0x1031   :  { %vm2194_vm3 = vcmp.lt.f32.partialorder %v2166_v0, %v5297_v23  ;;  %vm2314_vm4 = vcmp.lt.f32.partialorder %v5327_v5, %v5317_v20  ;;  %v5349_v2 = vmin.f32 %v5317_v20, %v5327_v5  ;;  %v3306_v21 = vpop.eup %3305 }
0x1032   :  { %v5341_v40 = vsel %vm2194_vm3, %v5035_v27, %v5772_v43  ;;  %v2326_v8 = vsel %vm2314_vm4, %v5057_v44, %v2203_v45  ;;  %v2210_v27 = vsel %vm2194_vm3, 17, %v5773_v15  ;;  %v2204_v44 = vsel %vm2192_vm2, %v5041_v62, %v2081_v53 }
0x1033   :  { %2342 = vst [vmem:[#allocation8] sm:$0xff] %v2326_v8  ;;  %3315 = vrsqrt.f32 %v5349_v2  ;;  %v2093_v62 = vmin.f32 %v1970_v42, %v2065_v25 }
0x1034   :  { %v2285_v50 = vpop.xlane.xlu1 %2284  ;;  %v2287_v18 = vpop.xlane.xlu0 %2286 }
0x1035   :  { %v3308_v13 = vpop.eup %3307  ;;  %vm2315_vm5 = vcmp.lt.f32.partialorder %v2285_v50, %v2212_v3  ;;  %v5361_v1 = vmin.f32 %v2212_v3, %v2285_v50  ;;  %v2312_v58 = vmul.f32 %v3306_v21, %v2287_v18  ;;  %vm2316_vm6 = vcmp.lt.f32.partialorder %v2287_v18, %v2213_v38 }
0x1036   :  { %v3310_v56 = vpop.eup %3309  ;;  %v2310_v4 = vmul.f32 %v3308_v13, %v5327_v5  ;;  %v2327_v49 = vsel %vm2315_vm5, %v5067_v37, %v2204_v44  ;;  %v2328_v55 = vsel %vm2316_vm6, %v5053_v9, %v2205_v16  ;;  %v5372_v32 = vsel %vm2316_vm6, 18, %v2209_v10 }
0x1037   :  { %v2190_v51 = vmul.f32 %v3310_v56, %v2166_v0  ;;  %2343 = vst [vmem:[#allocation8 + $0x8] sm:$0xff] %v2327_v49  ;;  %v5366_v6 = vmin.f32 %v2217_v52, %v2312_v58  ;;  %3317 = vrsqrt.f32 %v5361_v1  ;;  %v5374_v28 = vmin.f32 %v2213_v38, %v2287_v18  ;;  %2344 = vst [vmem:[#allocation8 + $0x10] sm:$0xff] %v2328_v55 }
0x1038   :  { %v3312_v35 = vpop.eup %3311  ;;  %v5369_v11 = vmin.f32 %v2215_v59, %v2310_v4  ;;  %v2216_v47 = vmin.f32 %v2093_v62, %v2188_v26  ;;  %v2346_v37 = vlaneseq  ;;  %v2289_v42 = vpop.xlane.xlu1 %2288  ;;  %v2095_v9 = vmin.f32 %v1972_v61, %v2067_v46 }
0x1039   :  { %v2311_v31 = vmul.f32 %v3312_v35, %v2285_v50  ;;  %3319 = vrsqrt.f32 %v5366_v6  ;;  %v2214_v16 = vmin.f32 %v5297_v23, %v2166_v0  ;;  %v3314_v30 = vpop.eup %3313  ;;  %v2207_v10 = vsel %vm2191_vm0, 17, %v5304_v60  ;;  %v5774_v23 = vld [vmem:[#allocation66_spill] sm:$0xff] }
0x103a   :  { %3321 = vrsqrt.f32 %v5369_v11  ;;  %v2218_v48 = vmin.f32 %v2095_v9, %v2190_v51  ;;  %v2313_v33 = vmul.f32 %v3314_v30, %v2289_v42  ;;  %v5398_v61 = vand.u32 127, %v2346_v37 }
0x103b   :  { %v5393_v54 = vmin.f32 %v2216_v47, %v2311_v31  ;;  %3323 = vrsqrt.f32 %v5374_v28  ;;  %vm2317_vm7 = vcmp.lt.f32.partialorder %v2289_v42, %v2214_v16  ;;  %v5396_v63 = vmin.f32 %v2214_v16, %v2289_v42 }
0x103c   :  { %v2330_v22 = vsel %vm2314_vm4, 18, %v2207_v10  ;;  %v2331_v36 = vsel %vm2315_vm5, 18, %v2208_v41  ;;  %v5405_v7 = vmin.f32 %v2218_v48, %v2313_v33  ;;  %v2329_v60 = vsel %vm2317_vm7, %v5774_v23, %v5341_v40 }
0x103d   :  { %3325 = vrsqrt.f32 %v5393_v54  ;;  %v5409_v14 = vsel %vm2317_vm7, 18, %v2210_v27  ;;  %2345 = vst [vmem:[#allocation8 + $0x18] sm:$0xff] %v2329_v60  ;;  %v2407_v34 = vcvt.s32.f32 %v2330_v22  ;;  %v2408_v29 = vcvt.s32.f32 %v2331_v36 }
0x103e   :  { %3327 = vrsqrt.f32 %v5396_v63 }
0x103f   :  { %3329 = vrsqrt.f32 %v5405_v7 }
0x1040   :  { %3430 = shalt.err (!%p3427_p5)
}
0x1041   :  { %2438 = dma.vmem_to_hbm [thread:$0]  %s2433_s2, 512, %s5517_s3, [#allocation4], %s3471_s25, %s3471_s25, %s3472_s26   ;;  %vm2406_vm8 = vcmp.eq.s32.totalorder %v5398_v61, 2  ;;  %v3316_v20 = vpop.eup %3315  ;;  %vm2405_vm9 = vcmp.eq.s32.totalorder %v5398_v61, 1  ;;  %vm2404_vm10 = vcmp.eq.s32.totalorder %v5398_v61, 0  ;;  %v2409_v46 = vcvt.s32.f32 %v5372_v32 }
0x1042   :  { %vm2350_vm11 = vcmp.eq.f32.partialorder %v5349_v2, inf  ;;  %vm2352_vm12 = vcmp.eq.f32.partialorder %v5349_v2, 0.0  ;;  %v2353_v53 = vand.u32 2147483648, %v5349_v2  ;;  %v2411_v39 = vsel %vm2406_vm8, %v2407_v34, 0.0  ;;  %s3476_s3 = smov [#allocation9]  }
0x1043   :  { %v2412_v0 = vsel %vm2406_vm8, %v2408_v29, 0.0  ;;  %vm2392_vm13 = vcmp.eq.f32.partialorder %v5366_v6, inf  ;;  %vm2357_vm14 = vcmp.eq.f32.partialorder %v5361_v1, inf  ;;  %vm2378_vm15 = vcmp.eq.f32.partialorder %v5369_v11, inf  ;;  %s2444_s10 = sshll.u32 %s3476_s3, 4  ;;  %s2445_s10 = int_to_ptr.vmem [resolvable:$true] %s2444_s10 }
0x1044   :  { %v3318_v5 = vpop.eup %3317  ;;  %vm2380_vm0 = vcmp.eq.f32.partialorder %v5369_v11, 0.0  ;;  %v2381_v17 = vand.u32 2147483648, %v5369_v11  ;;  %v2349_v45 = vmul.f32 %v3316_v20, %v5349_v2  ;;  %vm2385_vm1 = vcmp.eq.f32.partialorder %v5393_v54, inf  ;;  %s3439_s11 = scalar_lea.vmem %s2445_s10, 512  ;;  %p3444_p7 = scmp.lt.s32.totalorder %s2445_s10, %s2445_s10 }
0x1045   :  { %vm2387_vm2 = vcmp.eq.f32.partialorder %v5393_v54, 0.0  ;;  %vm2394_vm3 = vcmp.eq.f32.partialorder %v5366_v6, 0.0  ;;  %v2395_v43 = vand.u32 2147483648, %v5366_v6  ;;  %v2388_v8 = vand.u32 2147483648, %v5393_v54  ;;  %p3440_p6 = scmp.ne.s32.totalorder %s2445_s10, %s3439_s11  ;;  %p3445_p8 = scmp.lt.s32.totalorder %s3439_s11, %s3439_s11 }
0x1046   :  { %v3320_v12 = vpop.eup %3319  ;;  %v2413_v57 = vsel %vm2406_vm8, %v2409_v46, 0.0  ;;  %v2410_v25 = vcvt.s32.f32 %v5409_v14  ;;  %v2356_v27 = vmul.f32 %v3318_v5, %v5361_v1  ;;  %vm2359_vm4 = vcmp.eq.f32.partialorder %v5361_v1, 0.0 }
0x1047   :  { %v3322_v40 = vpop.eup %3321  ;;  %v2391_v24 = vmul.f32 %v3320_v12, %v5366_v6  ;;  %v2360_v21 = vand.u32 2147483648, %v5361_v1  ;;  %v2351_v44 = vsel %vm2350_vm11, %v5349_v2, %v2349_v45  ;;  %vm2364_vm5 = vcmp.eq.f32.partialorder %v5374_v28, inf  ;;  %p3446_p9 = por %p3445_p8, %p3444_p7 }
0x1048   :  { %v3324_v3 = vpop.eup %3323  ;;  %v2377_v15 = vmul.f32 %v3322_v40, %v5369_v11  ;;  %vm2366_vm6 = vcmp.eq.f32.partialorder %v5374_v28, 0.0  ;;  %v2367_v13 = vand.u32 2147483648, %v5374_v28  ;;  %v2354_v51 = vsel %vm2352_vm12, %v2353_v53, %v2351_v44 }
0x1049   :  { %v2393_v26 = vsel %vm2392_vm13, %v5366_v6, %v2391_v24  ;;  %v2363_v52 = vmul.f32 %v3324_v3, %v5374_v28  ;;  %v2358_v6 = vsel %vm2357_vm14, %v5361_v1, %v2356_v27  ;;  %vm2399_vm7 = vcmp.eq.f32.partialorder %v5405_v7, inf  ;;  %p3447_p10 = pnand %p3446_p9, %p3440_p6 }
0x104a   :  { %v3326_v38 = vpop.eup %3325  ;;  %v2379_v50 = vsel %vm2378_vm15, %v5369_v11, %v2377_v15  ;;  %v2396_v18 = vsel %vm2394_vm3, %v2395_v43, %v2393_v26  ;;  %vm2371_vm11 = vcmp.eq.f32.partialorder %v5396_v63, inf  ;;  %v2402_v42 = vand.u32 2147483648, %v5405_v7 }
0x104b   :  { %v2382_v58 = vsel %vm2380_vm0, %v2381_v17, %v2379_v50  ;;  %v2384_v56 = vmul.f32 %v3326_v38, %v5393_v54  ;;  %v2417_v59 = vsel %vm2405_vm9, %v2396_v18, %v2413_v57  ;;  %v2365_v4 = vsel %vm2364_vm5, %v5374_v28, %v2363_v52  ;;  %v3328_v49 = vpop.eup %3327 }
0x104c   :  { %v2415_v62 = vsel %vm2405_vm9, %v2382_v58, %v2411_v39  ;;  %v2368_v55 = vsel %vm2366_vm6, %v2367_v13, %v2365_v4  ;;  %v3330_v35 = vpop.eup %3329  ;;  %v2370_v32 = vmul.f32 %v3328_v49, %v5396_v63  ;;  %v2361_v9 = vsel %vm2359_vm4, %v2360_v21, %v2358_v6 }
0x104d   :  { %v2386_v11 = vsel %vm2385_vm1, %v5393_v54, %v2384_v56  ;;  %v2419_v28 = vsel %vm2404_vm10, %v2354_v51, %v2415_v62  ;;  %v2421_v47 = vsel %vm2404_vm10, %v2368_v55, %v2417_v59  ;;  %v2398_v37 = vmul.f32 %v3330_v35, %v5405_v7 }
0x104e   :  { %v2389_v2 = vsel %vm2387_vm2, %v2388_v8, %v2386_v11  ;;  %2423 = vst [vmem:[#allocation9] sm:$0xff] %v2419_v28  ;;  %2425 = vst [vmem:[#allocation9 + $0x10] sm:$0xff] %v2421_v47  ;;  %v2372_v19 = vsel %vm2371_vm11, %v5396_v63, %v2370_v32  ;;  %vm2401_vm12 = vcmp.eq.f32.partialorder %v5405_v7, 0.0  ;;  %v2374_v30 = vand.u32 2147483648, %v5396_v63 }
0x104f   :  { %v2416_v31 = vsel %vm2405_vm9, %v2389_v2, %v2412_v0  ;;  %v2400_v16 = vsel %vm2399_vm7, %v5405_v7, %v2398_v37  ;;  %v2414_v54 = vsel %vm2406_vm8, %v2410_v25, 0.0  ;;  %vm2373_vm13 = vcmp.eq.f32.partialorder %v5396_v63, 0.0 }
0x1050   :  { %v2420_v10 = vsel %vm2404_vm10, %v2361_v9, %v2416_v31  ;;  %v2403_v41 = vsel %vm2401_vm12, %v2402_v42, %v2400_v16  ;;  %v2375_v48 = vsel %vm2373_vm13, %v2374_v30, %v2372_v19 }
0x1051   :  { %2424 = vst [vmem:[#allocation9 + $0x8] sm:$0xff] %v2420_v10  ;;  %v2418_v1 = vsel %vm2405_vm9, %v2403_v41, %v2414_v54 }
0x1052   :  { %v2422_v33 = vsel %vm2404_vm10, %v2375_v48, %v2418_v1 }
0x1053   :  { %2426 = vst [vmem:[#allocation9 + $0x18] sm:$0xff] %v2422_v33 }
0x1054   :  { %3450 = shalt.err (!%p3447_p10)
}
0x1055   :  { %2450 = dma.vmem_to_hbm [thread:$0]  %s2445_s10, 512, %s5518_s4, [#allocation10], %s3471_s25, %s3471_s25, %s3472_s26  }
0x1056   :  { %3463 = dma.done.wait [#allocation4], 512  }
0x1057   :  { %3464 = vsyncadd [#allocation4], 4294966784 }
0x1058   :  { %3465 = dma.done.wait [#allocation10], 512  }
0x1059   :  { %3466 = vsyncadd [#allocation10], 4294966784 }
0x105a   :  { %2457 = vsyncpa [#allocation3], 1 }
0x105b   :  { %2458 = vsyncpa [#allocation6], 1 }
0x105c   :  { %2459 = vsyncpa [#allocation4], 1 }
0x105d   :  { %2460 = vsyncpa [#allocation10], 1 }

</bundles_post_ra>
